<compile_context>
chip_gen: v7x
topology: tpu7x:2x2x1
jax: 0.10.0
libtpu: 0.0.40
codegen_flags: <defaults>
</compile_context>

<pallas_src>
import math
from functools import partial

import numpy as np
import jax
import jax.numpy as jnp
from jax.experimental import pallas as pl
from jax.experimental.pallas import tpu as pltpu


def _round_up(x, m):
    return ((x + m - 1) // m) * m


# ----------------------------- Pallas kernel ------------------------------ #

def _make_matmul_kernel(neg_slope):
    """One MXU matmul per (batch, M-tile) grid cell; LeakyReLU fused in-kernel."""
    def kernel(x_ref, w_ref, o_ref):
        # x_ref: (1, TM, Ck_pad) bf16   w_ref: (Ck_pad, Cout_pad) bf16 (whole, VMEM)
        acc = jnp.dot(x_ref[0], w_ref[...], preferred_element_type=jnp.float32)
        if neg_slope is not None:
            acc = jnp.where(acc > 0, acc, neg_slope * acc)   # LeakyReLU(0.2)
        o_ref[0] = acc                                       # (TM, 128) unmasked store
    return kernel


def conv3d_pallas(x_ndhwc, w_oikkk, stride, neg_slope):
    """Conv3d(kernel=4, padding=1, stride, bias=False) [+ LeakyReLU] via im2col + MXU."""
    N, Din, Hin, Win, Cin = x_ndhwc.shape
    K, pad, s = 4, 1, stride
    Do = (Din + 2 * pad - K) // s + 1
    Ho = (Hin + 2 * pad - K) // s + 1
    Wo = (Win + 2 * pad - K) // s + 1
    Cout = w_oikkk.shape[0]

    # --- glue: zero-pad + full im2col (layout only) ---
    xp = jnp.pad(x_ndhwc, ((0, 0), (pad, pad), (pad, pad), (pad, pad), (0, 0)))
    cols = []
    for kd in range(K):
        for kh in range(K):
            for kw in range(K):
                cols.append(xp[:,
                               kd:kd + s * (Do - 1) + 1:s,
                               kh:kh + s * (Ho - 1) + 1:s,
                               kw:kw + s * (Wo - 1) + 1:s, :])
    xcol = jnp.concatenate(cols, axis=-1)          # (N, Do, Ho, Wo, K^3*Cin)

    Ck = K * K * K * Cin
    M = Do * Ho * Wo
    Ck_pad = _round_up(Ck, 128)                    # lane-dense contraction dim
    Cout_pad = _round_up(Cout, 128)                # unmasked 128-wide output stores
    TM = min(256, _round_up(M, 8))                 # M tile -> acc at most (256,128) f32
    Mpad = _round_up(M, TM)

    xcol = xcol.reshape(N, M, Ck)
    xcol = jnp.pad(xcol, ((0, 0), (0, Mpad - M), (0, Ck_pad - Ck))).astype(jnp.bfloat16)

    # torch weight (Cout, Cin, Kd, Kh, Kw) -> (Kd, Kh, Kw, Cin, Cout) -> (Ck, Cout)
    wmat = jnp.transpose(w_oikkk, (2, 3, 4, 1, 0)).reshape(Ck, Cout)
    wmat = jnp.pad(wmat, ((0, Ck_pad - Ck), (0, Cout_pad - Cout))).astype(jnp.bfloat16)

    out = pl.pallas_call(
        _make_matmul_kernel(neg_slope),
        out_shape=jax.ShapeDtypeStruct((N, Mpad, Cout_pad), jnp.float32),
        grid=(N, Mpad // TM),
        in_specs=[
            pl.BlockSpec((1, TM, Ck_pad), lambda n, m: (n, m, 0)),
            # weights: whole array resident in VMEM, not pipelined
            pl.BlockSpec(memory_space=pltpu.MemorySpace.VMEM),
        ],
        out_specs=pl.BlockSpec((1, TM, Cout_pad), lambda n, m: (n, m, 0)),
        compiler_params=pltpu.CompilerParams(
            dimension_semantics=("parallel", "parallel")),
    )(xcol, wmat)

    out = out[:, :M, :Cout].reshape(N, Do, Ho, Wo, Cout)
    return out


# ------------------------------ model wrapper ------------------------------ #

def d_net3d_forward(x_ncdhw, weights, strides):
    """D_Net3d.forward: 5 conv layers, LeakyReLU(0.2) after the first four."""
    x = jnp.transpose(x_ncdhw, (0, 2, 3, 4, 1))            # NCDHW -> NDHWC
    for i, (w, s) in enumerate(zip(weights, strides)):
        slope = 0.2 if i < len(weights) - 1 else None
        x = conv3d_pallas(x, w, s, slope)
    return jnp.transpose(x, (0, 4, 1, 2, 3))               # NDHWC -> NCDHW


def reference_forward(x_ncdhw, weights, strides):
    """Plain-JAX reference (lax conv) with the same bf16-operand quantization."""
    x = jnp.transpose(x_ncdhw, (0, 2, 3, 4, 1))
    for i, (w, s) in enumerate(zip(weights, strides)):
        wk = jnp.transpose(w, (2, 3, 4, 1, 0)).astype(jnp.bfloat16)   # DHWIO
        x = jax.lax.conv_general_dilated(
            x.astype(jnp.bfloat16), wk, window_strides=(s, s, s),
            padding=[(1, 1)] * 3,
            dimension_numbers=('NDHWC', 'DHWIO', 'NDHWC'),
            preferred_element_type=jnp.float32)
        if i < len(weights) - 1:
            x = jnp.where(x > 0, x, 0.2 * x)
    return jnp.transpose(x, (0, 4, 1, 2, 3))


def spectral_normalize(w, n_iter=30):
    """Divide conv weight by the spectral norm of its (Cout, -1) reshape."""
    cout = w.shape[0]
    wm = w.reshape(cout, -1)
    u = jnp.ones((cout,), jnp.float32) / math.sqrt(cout)   # deterministic start
    for _ in range(n_iter):
        v = wm.T @ u
        v = v / (jnp.linalg.norm(v) + 1e-12)
        u = wm @ v
        u = u / (jnp.linalg.norm(u) + 1e-12)
    sigma = u @ (wm @ v)
    return w / sigma


# ---------------------------------- main ----------------------------------- #

if __name__ == "__main__":
    key = jax.random.PRNGKey(0)
    keys = jax.random.split(key, 6)

    # Small shapes consistent with the module: spatial must survive 3 stride-2
    # and 2 stride-1 kernel-4 convs, so use 24^3.
    N, in_channels, D = 2, 1, 24
    base = 8
    x = jax.random.normal(keys[0], (N, in_channels, D, D, D), jnp.float32)

    layer_defs = [  # (Cin, Cout, stride) -- mirrors D_Net3d.__init__
        (in_channels, base, 2),
        (base, 2 * base, 2),
        (2 * base, 4 * base, 2),
        (4 * base, 8 * base, 1),
        (8 * base, 1, 1),
    ]
    strides = [s for _, _, s in layer_defs]

    weights = []
    for k, (ci, co, _) in zip(keys[1:], layer_defs):
        bound = 1.0 / math.sqrt(ci * 4 * 4 * 4)            # PyTorch conv default init
        w = jax.random.uniform(k, (co, ci, 4, 4, 4), jnp.float32, -bound, bound)
        weights.append(spectral_normalize(w))

    fwd = jax.jit(partial(d_net3d_forward, strides=strides))
    y = jax.block_until_ready(fwd(x, weights))

    # Expected output shape: 24 -> 12 -> 6 -> 3 -> 2 -> 1 spatial, 1 channel.
    assert y.shape == (N, 1, 1, 1, 1), y.shape

    ref = jax.jit(partial(reference_forward, strides=strides))
    y_ref = jax.block_until_ready(ref(x, weights))

    max_err = float(np.max(np.abs(np.asarray(y) - np.asarray(y_ref))))
    assert np.allclose(np.asarray(y), np.asarray(y_ref), rtol=2e-2, atol=2e-3), max_err

    print("KERNEL_OK")
</pallas_src>

<mosaic_0001>
module attributes {stable_mosaic.version = 11 : i64} {
  func.func @kernel(%arg0: i32, %arg1: i32, %arg2: memref<1x256x128xbf16, #tpu.memory_space<vmem>>, %arg3: memref<128x128xbf16, #tpu.memory_space<vmem>>, %arg4: memref<1x256x128xf32, #tpu.memory_space<vmem>>) attributes {dimension_semantics = [#tpu.dimension_semantics<parallel>, #tpu.dimension_semantics<parallel>], iteration_bounds = array<i64: 2, 7>, scalar_prefetch = 0 : i64, scratch_operands = 0 : i64, tpu.core_type = #tpu.core_type<tc>, window_params = [{transform_indices = @transform_0, window_bounds = array<i64: 1, 256, 128>}, {pipeline_mode = #tpu.pipeline_mode<synchronous>, transform_indices = @transform_1, window_bounds = array<i64: 128, 128>}, {transform_indices = @transform_2, window_bounds = array<i64: 1, 256, 128>}]} {
    %c0 = arith.constant 0 : index
    %c0_0 = arith.constant 0 : index
    %c0_1 = arith.constant 0 : index
    %0 = vector.load %arg2[%c0, %c0_0, %c0_1] : memref<1x256x128xbf16, #tpu.memory_space<vmem>>, vector<1x256x128xbf16>
    %1 = vector.shape_cast %0 : vector<1x256x128xbf16> to vector<256x128xbf16>
    %c0_2 = arith.constant 0 : index
    %c0_3 = arith.constant 0 : index
    %2 = vector.load %arg3[%c0_2, %c0_3] : memref<128x128xbf16, #tpu.memory_space<vmem>>, vector<128x128xbf16>
    %cst = arith.constant dense<0.000000e+00> : vector<256x128xf32>
    %3 = tpu.matmul %1, %2, %cst {dimension_numbers = #tpu.dot_dimension_numbers<[1], [0], [0], [1], [0, 0, 1, 1], [], []>} : vector<256x128xbf16>, vector<128x128xbf16>, vector<256x128xf32> -> vector<256x128xf32>
    %cst_4 = arith.constant 0.000000e+00 : f32
    %4 = vector.broadcast %cst_4 : f32 to vector<256x128xf32>
    %5 = arith.cmpf ogt, %3, %4 : vector<256x128xf32>
    %cst_5 = arith.constant 2.000000e-01 : f32
    %6 = vector.broadcast %cst_5 : f32 to vector<256x128xf32>
    %7 = arith.mulf %6, %3 : vector<256x128xf32>
    %8 = arith.select %5, %3, %7 : vector<256x128xi1>, vector<256x128xf32>
    %c0_6 = arith.constant 0 : index
    %c0_7 = arith.constant 0 : index
    %c0_8 = arith.constant 0 : index
    %9 = vector.load %arg4[%c0_6, %c0_7, %c0_8] : memref<1x256x128xf32, #tpu.memory_space<vmem>>, vector<1x256x128xf32>
    %10 = vector.shape_cast %9 : vector<1x256x128xf32> to vector<256x128xf32>
    %11 = vector.shape_cast %8 : vector<256x128xf32> to vector<1x256x128xf32>
    tpu.vector_store %arg4[%c0_6, %c0_7, %c0_8], %11 {strides = array<i32>} : memref<1x256x128xf32, #tpu.memory_space<vmem>>, vector<1x256x128xf32>,
    return
  }
  func.func @transform_0(%arg0: i32, %arg1: i32) -> (i32, i32, i32) {
    %c0_i32 = arith.constant 0 : i32
    %c0_i32_0 = arith.constant 0 : i32
    return %arg0, %arg1, %c0_i32 : i32, i32, i32
  }
  func.func @transform_1(%arg0: i32, %arg1: i32) -> (i32, i32) {
    %c0_i32 = arith.constant 0 : i32
    %c0_i32_0 = arith.constant 0 : i32
    %c0_i32_1 = arith.constant 0 : i32
    return %c0_i32, %c0_i32_0 : i32, i32
  }
  func.func @transform_2(%arg0: i32, %arg1: i32) -> (i32, i32, i32) {
    %c0_i32 = arith.constant 0 : i32
    %c0_i32_0 = arith.constant 0 : i32
    return %arg0, %arg1, %c0_i32 : i32, i32, i32
  }
}

module attributes {stable_mosaic.version = 11 : i64} {
  func.func @kernel(%arg0: i32, %arg1: i32, %arg2: memref<1x216x512xbf16, #tpu.memory_space<vmem>>, %arg3: memref<512x128xbf16, #tpu.memory_space<vmem>>, %arg4: memref<1x216x128xf32, #tpu.memory_space<vmem>>) attributes {dimension_semantics = [#tpu.dimension_semantics<parallel>, #tpu.dimension_semantics<parallel>], iteration_bounds = array<i64: 2, 1>, scalar_prefetch = 0 : i64, scratch_operands = 0 : i64, tpu.core_type = #tpu.core_type<tc>, window_params = [{transform_indices = @transform_0, window_bounds = array<i64: 1, 216, 512>}, {pipeline_mode = #tpu.pipeline_mode<synchronous>, transform_indices = @transform_1, window_bounds = array<i64: 512, 128>}, {transform_indices = @transform_2, window_bounds = array<i64: 1, 216, 128>}]} {
    %c0 = arith.constant 0 : index
    %c0_0 = arith.constant 0 : index
    %c0_1 = arith.constant 0 : index
    %0 = vector.load %arg2[%c0, %c0_0, %c0_1] : memref<1x216x512xbf16, #tpu.memory_space<vmem>>, vector<1x216x512xbf16>
    %1 = vector.shape_cast %0 : vector<1x216x512xbf16> to vector<216x512xbf16>
    %c0_2 = arith.constant 0 : index
    %c0_3 = arith.constant 0 : index
    %2 = vector.load %arg3[%c0_2, %c0_3] : memref<512x128xbf16, #tpu.memory_space<vmem>>, vector<512x128xbf16>
    %cst = arith.constant dense<0.000000e+00> : vector<216x128xf32>
    %3 = tpu.matmul %1, %2, %cst {dimension_numbers = #tpu.dot_dimension_numbers<[1], [0], [0], [1], [0, 0, 1, 1], [], []>} : vector<216x512xbf16>, vector<512x128xbf16>, vector<216x128xf32> -> vector<216x128xf32>
    %cst_4 = arith.constant 0.000000e+00 : f32
    %4 = vector.broadcast %cst_4 : f32 to vector<216x128xf32>
    %5 = arith.cmpf ogt, %3, %4 : vector<216x128xf32>
    %cst_5 = arith.constant 2.000000e-01 : f32
    %6 = vector.broadcast %cst_5 : f32 to vector<216x128xf32>
    %7 = arith.mulf %6, %3 : vector<216x128xf32>
    %8 = arith.select %5, %3, %7 : vector<216x128xi1>, vector<216x128xf32>
    %c0_6 = arith.constant 0 : index
    %c0_7 = arith.constant 0 : index
    %c0_8 = arith.constant 0 : index
    %9 = vector.load %arg4[%c0_6, %c0_7, %c0_8] : memref<1x216x128xf32, #tpu.memory_space<vmem>>, vector<1x216x128xf32>
    %10 = vector.shape_cast %9 : vector<1x216x128xf32> to vector<216x128xf32>
    %11 = vector.shape_cast %8 : vector<216x128xf32> to vector<1x216x128xf32>
    tpu.vector_store %arg4[%c0_6, %c0_7, %c0_8], %11 {strides = array<i32>} : memref<1x216x128xf32, #tpu.memory_space<vmem>>, vector<1x216x128xf32>,
    return
  }
  func.func @transform_0(%arg0: i32, %arg1: i32) -> (i32, i32, i32) {
    %c0_i32 = arith.constant 0 : i32
    %c0_i32_0 = arith.constant 0 : i32
    return %arg0, %arg1, %c0_i32 : i32, i32, i32
  }
  func.func @transform_1(%arg0: i32, %arg1: i32) -> (i32, i32) {
    %c0_i32 = arith.constant 0 : i32
    %c0_i32_0 = arith.constant 0 : i32
    %c0_i32_1 = arith.constant 0 : i32
    return %c0_i32, %c0_i32_0 : i32, i32
  }
  func.func @transform_2(%arg0: i32, %arg1: i32) -> (i32, i32, i32) {
    %c0_i32 = arith.constant 0 : i32
    %c0_i32_0 = arith.constant 0 : i32
    return %arg0, %arg1, %c0_i32 : i32, i32, i32
  }
}

module attributes {stable_mosaic.version = 11 : i64} {
  func.func @kernel(%arg0: i32, %arg1: i32, %arg2: memref<1x32x1024xbf16, #tpu.memory_space<vmem>>, %arg3: memref<1024x128xbf16, #tpu.memory_space<vmem>>, %arg4: memref<1x32x128xf32, #tpu.memory_space<vmem>>) attributes {dimension_semantics = [#tpu.dimension_semantics<parallel>, #tpu.dimension_semantics<parallel>], iteration_bounds = array<i64: 2, 1>, scalar_prefetch = 0 : i64, scratch_operands = 0 : i64, tpu.core_type = #tpu.core_type<tc>, window_params = [{transform_indices = @transform_0, window_bounds = array<i64: 1, 32, 1024>}, {pipeline_mode = #tpu.pipeline_mode<synchronous>, transform_indices = @transform_1, window_bounds = array<i64: 1024, 128>}, {transform_indices = @transform_2, window_bounds = array<i64: 1, 32, 128>}]} {
    %c0 = arith.constant 0 : index
    %c0_0 = arith.constant 0 : index
    %c0_1 = arith.constant 0 : index
    %0 = vector.load %arg2[%c0, %c0_0, %c0_1] : memref<1x32x1024xbf16, #tpu.memory_space<vmem>>, vector<1x32x1024xbf16>
    %1 = vector.shape_cast %0 : vector<1x32x1024xbf16> to vector<32x1024xbf16>
    %c0_2 = arith.constant 0 : index
    %c0_3 = arith.constant 0 : index
    %2 = vector.load %arg3[%c0_2, %c0_3] : memref<1024x128xbf16, #tpu.memory_space<vmem>>, vector<1024x128xbf16>
    %cst = arith.constant dense<0.000000e+00> : vector<32x128xf32>
    %3 = tpu.matmul %1, %2, %cst {dimension_numbers = #tpu.dot_dimension_numbers<[1], [0], [0], [1], [0, 0, 1, 1], [], []>} : vector<32x1024xbf16>, vector<1024x128xbf16>, vector<32x128xf32> -> vector<32x128xf32>
    %cst_4 = arith.constant 0.000000e+00 : f32
    %4 = vector.broadcast %cst_4 : f32 to vector<32x128xf32>
    %5 = arith.cmpf ogt, %3, %4 : vector<32x128xf32>
    %cst_5 = arith.constant 2.000000e-01 : f32
    %6 = vector.broadcast %cst_5 : f32 to vector<32x128xf32>
    %7 = arith.mulf %6, %3 : vector<32x128xf32>
    %8 = arith.select %5, %3, %7 : vector<32x128xi1>, vector<32x128xf32>
    %c0_6 = arith.constant 0 : index
    %c0_7 = arith.constant 0 : index
    %c0_8 = arith.constant 0 : index
    %9 = vector.load %arg4[%c0_6, %c0_7, %c0_8] : memref<1x32x128xf32, #tpu.memory_space<vmem>>, vector<1x32x128xf32>
    %10 = vector.shape_cast %9 : vector<1x32x128xf32> to vector<32x128xf32>
    %11 = vector.shape_cast %8 : vector<32x128xf32> to vector<1x32x128xf32>
    tpu.vector_store %arg4[%c0_6, %c0_7, %c0_8], %11 {strides = array<i32>} : memref<1x32x128xf32, #tpu.memory_space<vmem>>, vector<1x32x128xf32>,
    return
  }
  func.func @transform_0(%arg0: i32, %arg1: i32) -> (i32, i32, i32) {
    %c0_i32 = arith.constant 0 : i32
    %c0_i32_0 = arith.constant 0 : i32
    return %arg0, %arg1, %c0_i32 : i32, i32, i32
  }
  func.func @transform_1(%arg0: i32, %arg1: i32) -> (i32, i32) {
    %c0_i32 = arith.constant 0 : i32
    %c0_i32_0 = arith.constant 0 : i32
    %c0_i32_1 = arith.constant 0 : i32
    return %c0_i32, %c0_i32_0 : i32, i32
  }
  func.func @transform_2(%arg0: i32, %arg1: i32) -> (i32, i32, i32) {
    %c0_i32 = arith.constant 0 : i32
    %c0_i32_0 = arith.constant 0 : i32
    return %arg0, %arg1, %c0_i32 : i32, i32, i32
  }
}

module attributes {stable_mosaic.version = 11 : i64} {
  func.func @kernel(%arg0: i32, %arg1: i32, %arg2: memref<1x8x2048xbf16, #tpu.memory_space<vmem>>, %arg3: memref<2048x128xbf16, #tpu.memory_space<vmem>>, %arg4: memref<1x8x128xf32, #tpu.memory_space<vmem>>) attributes {dimension_semantics = [#tpu.dimension_semantics<parallel>, #tpu.dimension_semantics<parallel>], iteration_bounds = array<i64: 2, 1>, scalar_prefetch = 0 : i64, scratch_operands = 0 : i64, tpu.core_type = #tpu.core_type<tc>, window_params = [{transform_indices = @transform_0, window_bounds = array<i64: 1, 8, 2048>}, {pipeline_mode = #tpu.pipeline_mode<synchronous>, transform_indices = @transform_1, window_bounds = array<i64: 2048, 128>}, {transform_indices = @transform_2, window_bounds = array<i64: 1, 8, 128>}]} {
    %c0 = arith.constant 0 : index
    %c0_0 = arith.constant 0 : index
    %c0_1 = arith.constant 0 : index
    %0 = vector.load %arg2[%c0, %c0_0, %c0_1] : memref<1x8x2048xbf16, #tpu.memory_space<vmem>>, vector<1x8x2048xbf16>
    %1 = vector.shape_cast %0 : vector<1x8x2048xbf16> to vector<8x2048xbf16>
    %c0_2 = arith.constant 0 : index
    %c0_3 = arith.constant 0 : index
    %2 = vector.load %arg3[%c0_2, %c0_3] : memref<2048x128xbf16, #tpu.memory_space<vmem>>, vector<2048x128xbf16>
    %cst = arith.constant dense<0.000000e+00> : vector<8x128xf32>
    %3 = tpu.matmul %1, %2, %cst {dimension_numbers = #tpu.dot_dimension_numbers<[1], [0], [0], [1], [0, 0, 1, 1], [], []>} : vector<8x2048xbf16>, vector<2048x128xbf16>, vector<8x128xf32> -> vector<8x128xf32>
    %cst_4 = arith.constant 0.000000e+00 : f32
    %4 = vector.broadcast %cst_4 : f32 to vector<8x128xf32>
    %5 = arith.cmpf ogt, %3, %4 : vector<8x128xf32>
    %cst_5 = arith.constant 2.000000e-01 : f32
    %6 = vector.broadcast %cst_5 : f32 to vector<8x128xf32>
    %7 = arith.mulf %6, %3 : vector<8x128xf32>
    %8 = arith.select %5, %3, %7 : vector<8x128xi1>, vector<8x128xf32>
    %c0_6 = arith.constant 0 : index
    %c0_7 = arith.constant 0 : index
    %c0_8 = arith.constant 0 : index
    %9 = vector.load %arg4[%c0_6, %c0_7, %c0_8] : memref<1x8x128xf32, #tpu.memory_space<vmem>>, vector<1x8x128xf32>
    %10 = vector.shape_cast %9 : vector<1x8x128xf32> to vector<8x128xf32>
    %11 = vector.shape_cast %8 : vector<8x128xf32> to vector<1x8x128xf32>
    tpu.vector_store %arg4[%c0_6, %c0_7, %c0_8], %11 {strides = array<i32>} : memref<1x8x128xf32, #tpu.memory_space<vmem>>, vector<1x8x128xf32>,
    return
  }
  func.func @transform_0(%arg0: i32, %arg1: i32) -> (i32, i32, i32) {
    %c0_i32 = arith.constant 0 : i32
    %c0_i32_0 = arith.constant 0 : i32
    return %arg0, %arg1, %c0_i32 : i32, i32, i32
  }
  func.func @transform_1(%arg0: i32, %arg1: i32) -> (i32, i32) {
    %c0_i32 = arith.constant 0 : i32
    %c0_i32_0 = arith.constant 0 : i32
    %c0_i32_1 = arith.constant 0 : i32
    return %c0_i32, %c0_i32_0 : i32, i32
  }
  func.func @transform_2(%arg0: i32, %arg1: i32) -> (i32, i32, i32) {
    %c0_i32 = arith.constant 0 : i32
    %c0_i32_0 = arith.constant 0 : i32
    return %arg0, %arg1, %c0_i32 : i32, i32, i32
  }
}

module attributes {stable_mosaic.version = 11 : i64} {
  func.func @kernel(%arg0: i32, %arg1: i32, %arg2: memref<1x8x4096xbf16, #tpu.memory_space<vmem>>, %arg3: memref<4096x128xbf16, #tpu.memory_space<vmem>>, %arg4: memref<1x8x128xf32, #tpu.memory_space<vmem>>) attributes {dimension_semantics = [#tpu.dimension_semantics<parallel>, #tpu.dimension_semantics<parallel>], iteration_bounds = array<i64: 2, 1>, scalar_prefetch = 0 : i64, scratch_operands = 0 : i64, tpu.core_type = #tpu.core_type<tc>, window_params = [{transform_indices = @transform_0, window_bounds = array<i64: 1, 8, 4096>}, {pipeline_mode = #tpu.pipeline_mode<synchronous>, transform_indices = @transform_1, window_bounds = array<i64: 4096, 128>}, {transform_indices = @transform_2, window_bounds = array<i64: 1, 8, 128>}]} {
    %c0 = arith.constant 0 : index
    %c0_0 = arith.constant 0 : index
    %c0_1 = arith.constant 0 : index
    %0 = vector.load %arg2[%c0, %c0_0, %c0_1] : memref<1x8x4096xbf16, #tpu.memory_space<vmem>>, vector<1x8x4096xbf16>
    %1 = vector.shape_cast %0 : vector<1x8x4096xbf16> to vector<8x4096xbf16>
    %c0_2 = arith.constant 0 : index
    %c0_3 = arith.constant 0 : index
    %2 = vector.load %arg3[%c0_2, %c0_3] : memref<4096x128xbf16, #tpu.memory_space<vmem>>, vector<4096x128xbf16>
    %cst = arith.constant dense<0.000000e+00> : vector<8x128xf32>
    %3 = tpu.matmul %1, %2, %cst {dimension_numbers = #tpu.dot_dimension_numbers<[1], [0], [0], [1], [0, 0, 1, 1], [], []>} : vector<8x4096xbf16>, vector<4096x128xbf16>, vector<8x128xf32> -> vector<8x128xf32>
    %c0_4 = arith.constant 0 : index
    %c0_5 = arith.constant 0 : index
    %c0_6 = arith.constant 0 : index
    %4 = vector.load %arg4[%c0_4, %c0_5, %c0_6] : memref<1x8x128xf32, #tpu.memory_space<vmem>>, vector<1x8x128xf32>
    %5 = vector.shape_cast %4 : vector<1x8x128xf32> to vector<8x128xf32>
    %6 = vector.shape_cast %3 : vector<8x128xf32> to vector<1x8x128xf32>
    tpu.vector_store %arg4[%c0_4, %c0_5, %c0_6], %6 {strides = array<i32>} : memref<1x8x128xf32, #tpu.memory_space<vmem>>, vector<1x8x128xf32>,
    return
  }
  func.func @transform_0(%arg0: i32, %arg1: i32) -> (i32, i32, i32) {
    %c0_i32 = arith.constant 0 : i32
    %c0_i32_0 = arith.constant 0 : i32
    return %arg0, %arg1, %c0_i32 : i32, i32, i32
  }
  func.func @transform_1(%arg0: i32, %arg1: i32) -> (i32, i32) {
    %c0_i32 = arith.constant 0 : i32
    %c0_i32_0 = arith.constant 0 : i32
    %c0_i32_1 = arith.constant 0 : i32
    return %c0_i32, %c0_i32_0 : i32, i32
  }
  func.func @transform_2(%arg0: i32, %arg1: i32) -> (i32, i32, i32) {
    %c0_i32 = arith.constant 0 : i32
    %c0_i32_0 = arith.constant 0 : i32
    return %arg0, %arg1, %c0_i32 : i32, i32, i32
  }
}

</mosaic_0001>

<bundles_post_ra>
// kernel: d_net3d_forward.5
= control target key start
LH: loop header
LB: loop body
LE: loop exit
PB: predicated region body
PF: predicated region fallthrough
CT: control target
= control target key end

     0   :  { %s998_s9 = smov 0   ;;  %s1000_s10 = smov 0   ;;  %s1132_s0 = inlined_call_operand.vmem [shape: bf16[2,1792,128], index: 0, kind: input, shape index: {}]   ;;  %s1133_s1 = inlined_call_operand.vmem [shape: bf16[128,128], index: 1, kind: input, shape index: {}]   ;;  %s1134_s2 = inlined_call_operand.vmem [shape: f32[2,1792,128], index: 2, kind: output, shape index: {}]  }
   0x1   :  { %s1002_s11 = smov 0   ;;  %s1004_s12 = smov 0  }
   0x2   :  { %s1006_s13 = smov 0  }
   0x3 LB: > { %s21_s14 = sadd.s32 1, %s973_s11  ;;  %s24_s15 = sadd.s32 1, %s977_s12  ;;  %s981_s13 = sphi %s1006_s13, %s12_s13   ;;  %s977_s12 = sphi %s1004_s12, %s1138_s12   ;;  %s973_s11 = sphi %s1002_s11, %s1137_s11   ;;  %s969_s10 = sphi %s1000_s10, %s1136_s10   ;;  %s965_s9 = sphi %s998_s9, %s1135_s9  }
   0x4   : > { %p22_p0 = scmp.ge.s32.totalorder %s21_s14, 7  ;;  %p759_p1 = scmp.ge.s32.totalorder %s981_s13, 1 }
   0x5   : > { %p133_p2 = scmp.lt.s32.totalorder %s981_s13, 15 }
   0x6   : > { %s1140_s14 = smov (%p22_p0, %s21_s14), 0  ;;  %s1142_s15 = smov (!%p22_p0, %s24_s15), %s977_s12 }
   0x7   : > { %p134_p3 = pnand %p759_p1, %p133_p2  ;;  %p26_p4 = scmp.ge.s32.totalorder %s1142_s15, 2 }
   0x8   : > { %v919_v0 = vld [vmem:[%s1133_s1] sm:$0xff] (!%p134_p3)   ;;  %s760_s18 = sshll.u32 (!%p134_p3), %s965_s9, 5  ;;  %v920_v1 = vld [vmem:[%s1133_s1 + $0x8] sm:$0xff] (!%p134_p3)   ;;  %p164_p5 = scmp.lt.s32.totalorder (!%p134_p3), %s969_s10, 1  ;;  %v921_v2 = vld [vmem:[%s1133_s1 + $0x10] sm:$0xff] (!%p134_p3)  }
   0x9   : > { %s1144_s15 = smov (%p26_p4, %s1142_s15), 0  ;;  %137 = sbr.rel (%p134_p3) target bundleno = 288 (0x120), region = 28 }
   0xa   : > { %814 = vmatprep.subr.bf16.mxu0 (!%p134_p3), %v919_v0  ;;  %862 = vmatprep.subr.bf16.mxu1 (!%p134_p3), %v919_v0  ;;  %p166_p6 = scmp.lt.s32.totalorder (!%p134_p3), %s760_s18, 223  ;;  %v922_v3 = vld [vmem:[%s1133_s1 + $0x18] sm:$0xff] (!%p134_p3)   ;;  %v923_v6 = vld [vmem:[%s1133_s1 + $0x20] sm:$0xff] (!%p134_p3)   ;;  %v924_v7 = vld [vmem:[%s1133_s1 + $0x28] sm:$0xff] (!%p134_p3)  }
   0xb   : > { %815 = vmatpush3.bf16.msra.mxu0 (!%p134_p3), %v919_v0  ;;  %870 = vmatpush3.bf16.msra.mxu1 (!%p134_p3), %v919_v0  ;;  %v925_v8 = vld [vmem:[%s1133_s1 + $0x30] sm:$0xff] (!%p134_p3)   ;;  %v926_v9 = vld [vmem:[%s1133_s1 + $0x38] sm:$0xff] (!%p134_p3)  }
   0xc   : > { %816 = vmatprep.subr.bf16.mxu0 (!%p134_p3), %v920_v1  ;;  %863 = vmatprep.subr.bf16.mxu1 (!%p134_p3), %v920_v1 }
   0xf   : > { %817 = vmatpush3.bf16.msra.mxu0 (!%p134_p3), %v920_v1  ;;  %871 = vmatpush3.bf16.msra.mxu1 (!%p134_p3), %v920_v1 }
  0x10   : > { %s1146_s10 = smov (!%p164_p5, %s969_s10), 1  ;;  %s1148_s18 = smov (!%p166_p6, %s760_s18), 223  ;;  %818 = vmatprep.subr.bf16.mxu0 %v921_v2  ;;  %864 = vmatprep.subr.bf16.mxu1 %v921_v2 }
  0x11   : > { %s878_s23 = smul.u32 224, %s1146_s10 }
  0x13   : > { %s1040_s24 = sadd.s32 %s878_s23, %s1148_s18  ;;  %819 = vmatpush3.bf16.msra.mxu0 %v921_v2  ;;  %872 = vmatpush3.bf16.msra.mxu1 %v921_v2 }
  0x14   : > { %s761_s27 = sshll.u32 %s1040_s24, 2  ;;  %820 = vmatprep.subr.bf16.mxu0 %v922_v3  ;;  %865 = vmatprep.subr.bf16.mxu1 %v922_v3  ;;  %s763_s16 = sshll.u32 %s1040_s24, 3 }
  0x15   : > { %s1049_s30 = scalar_lea.vmem %s1132_s0, %s761_s27  ;;  %s1083_s19 = scalar_lea.vmem %s1134_s2, %s763_s16 }
  0x16   : > { %v927_v4 = vld [vmem:[%s1049_s30] sm:$0xff]   ;;  %v929_v10 = vld [vmem:[%s1049_s30 + $0x8] sm:$0xff]   ;;  %v931_v12 = vld [vmem:[%s1049_s30 + $0x10] sm:$0xff]  }
  0x17   : > { %v928_v5 = vld [vmem:[%s1049_s30 + $0x40] sm:$0xff]   ;;  %830 = vmatprep.mubr.bf16.mxu0 %v927_v4  ;;  %821 = vmatpush3.bf16.msra.mxu0 %v922_v3  ;;  %v930_v11 = vld [vmem:[%s1049_s30 + $0x48] sm:$0xff]   ;;  %v932_v13 = vld [vmem:[%s1049_s30 + $0x50] sm:$0xff]  }
  0x18   : > { %846 = vmatprep.mubr.bf16.mxu1 %v928_v5  ;;  %873 = vmatpush3.bf16.msra.mxu1 %v922_v3  ;;  %v933_v14 = vld [vmem:[%s1049_s30 + $0x18] sm:$0xff]   ;;  %v935_v16 = vld [vmem:[%s1049_s30 + $0x20] sm:$0xff]   ;;  %v937_v18 = vld [vmem:[%s1049_s30 + $0x28] sm:$0xff]  }
  0x19   : > { %822 = vmatprep.subr.bf16.mxu0 %v923_v6  ;;  %866 = vmatprep.subr.bf16.mxu1 %v923_v6  ;;  %v934_v15 = vld [vmem:[%s1049_s30 + $0x58] sm:$0xff]   ;;  %v936_v17 = vld [vmem:[%s1049_s30 + $0x60] sm:$0xff]   ;;  %v938_v19 = vld [vmem:[%s1049_s30 + $0x68] sm:$0xff]  }
  0x1a   : > { %v939_v20 = vld [vmem:[%s1049_s30 + $0x30] sm:$0xff]   ;;  %v941_v22 = vld [vmem:[%s1049_s30 + $0x38] sm:$0xff]  }
  0x1b   : > { %823 = vmatpush3.bf16.msra.mxu0 %v923_v6  ;;  %v940_v21 = vld [vmem:[%s1049_s30 + $0x70] sm:$0xff]   ;;  %v942_v23 = vld [vmem:[%s1049_s30 + $0x78] sm:$0xff]  }
  0x1c   : > { %874 = vmatpush3.bf16.msra.mxu1 %v923_v6  ;;  %824 = vmatprep.subr.bf16.mxu0 %v924_v7 }
  0x1d   : > { %867 = vmatprep.subr.bf16.mxu1 %v924_v7 }
  0x1f   : > { %825 = vmatpush3.bf16.msra.mxu0 %v924_v7 }
  0x20   : > { %875 = vmatpush3.bf16.msra.mxu1 %v924_v7  ;;  %826 = vmatprep.subr.bf16.mxu0 %v925_v8 }
  0x21   : > { %868 = vmatprep.subr.bf16.mxu1 %v925_v8 }
  0x23   : > { %827 = vmatpush3.bf16.msra.mxu0 %v925_v8 }
  0x24   : > { %876 = vmatpush3.bf16.msra.mxu1 %v925_v8  ;;  %828 = vmatprep.subr.bf16.mxu0 %v926_v9 }
  0x25   : > { %869 = vmatprep.subr.bf16.mxu1 %v926_v9 }
  0x27   : > { %829 = vmatpush3.bf16.msra.mxu0 %v926_v9 }
  0x28   : > { %877 = vmatpush3.bf16.msra.mxu1 %v926_v9 }
  0x2a   : > { %831 = vmatmul.mubr.bf16.vlgmr.msra.gmra.mrb[0].mxu0 %v929_v10 }
  0x2b   : > { %847 = vmatmul.mubr.bf16.vlgmr.msra.gmra.mrb[0].mxu1 %v930_v11  ;;  %834 = vmatprep.mubr.bf16.mxu0 %v931_v12 }
  0x2c   : > { %850 = vmatprep.mubr.bf16.mxu1 %v932_v13 }
  0x32   : > { %835 = vmatmul.mubr.bf16.gmra.mrb[4].mxu0 %v933_v14 }
  0x33   : > { %851 = vmatmul.mubr.bf16.gmra.mrb[4].mxu1 %v934_v15  ;;  %838 = vmatprep.mubr.bf16.mxu0 %v935_v16 }
  0x34   : > { %854 = vmatprep.mubr.bf16.mxu1 %v936_v17 }
  0x3a   : > { %839 = vmatmul.mubr.bf16.gmra.mrb[8].mxu0 %v937_v18 }
  0x3b   : > { %855 = vmatmul.mubr.bf16.gmra.mrb[8].mxu1 %v938_v19  ;;  %842 = vmatprep.mubr.bf16.mxu0 %v939_v20 }
  0x3c   : > { %858 = vmatprep.mubr.bf16.mxu1 %v940_v21 }
  0x42   : > { %843 = vmatmul.mubr.bf16.gmra.mrb[12].mxu0 %v941_v22 }
  0x43   : > { %859 = vmatmul.mubr.bf16.gmra.mrb[12].mxu1 %v942_v23 }
  0xfd   : > { %v832_v24 = vpop.f32.mrb[0].mxu0 }
  0xfe   : > { %v848_v25 = vpop.f32.mrb[0].mxu1  ;;  %vm539_vm0 = vcmp.gt.f32.partialorder %v832_v24, 0.0  ;;  %v571_v26 = vmul.f32 0.2, %v832_v24  ;;  %v410_v28 = vpop.f32.mrb[1].mxu0 }
  0xff   : > { %vm555_vm1 = vcmp.gt.f32.partialorder %v848_v25, 0.0  ;;  %v587_v27 = vmul.f32 0.2, %v848_v25  ;;  %v474_v29 = vpop.f32.mrb[1].mxu1  ;;  %vm537_vm2 = vcmp.gt.f32.partialorder %v410_v28, 0.0  ;;  %v833_v33 = vpop.f32.mrb[2].mxu0 }
 0x100   : > { %v603_v30 = vsel %vm539_vm0, %v832_v24, %v571_v26  ;;  %v569_v32 = vmul.f32 0.2, %v410_v28  ;;  %v849_v34 = vpop.f32.mrb[2].mxu1  ;;  %vm553_vm3 = vcmp.gt.f32.partialorder %v474_v29, 0.0  ;;  %v585_v35 = vmul.f32 0.2, %v474_v29 }
 0x101   : > { %v619_v31 = vsel %vm555_vm1, %v848_v25, %v587_v27  ;;  %635 = vst [vmem:[%s1083_s19 + $0x10] sm:$0xff] %v603_v30  ;;  %vm540_vm4 = vcmp.gt.f32.partialorder %v833_v33, 0.0  ;;  %v572_v36 = vmul.f32 0.2, %v833_v33  ;;  %vm556_vm5 = vcmp.gt.f32.partialorder %v849_v34, 0.0  ;;  %v413_v39 = vpop.f32.mrb[3].mxu0 }
 0x102   : > { %651 = vst [vmem:[%s1083_s19 + $0x90] sm:$0xff] %v619_v31  ;;  %v601_v37 = vsel %vm537_vm2, %v410_v28, %v569_v32  ;;  %v588_v38 = vmul.f32 0.2, %v849_v34  ;;  %v477_v40 = vpop.f32.mrb[3].mxu1  ;;  %v617_v41 = vsel %vm553_vm3, %v474_v29, %v585_v35  ;;  %vm538_vm6 = vcmp.gt.f32.partialorder %v413_v39, 0.0 }
 0x103   : > { %633 = vst [vmem:[%s1083_s19] sm:$0xff] %v601_v37  ;;  %v604_v42 = vsel %vm540_vm4, %v833_v33, %v572_v36  ;;  %v570_v43 = vmul.f32 0.2, %v413_v39  ;;  %649 = vst [vmem:[%s1083_s19 + $0x80] sm:$0xff] %v617_v41  ;;  %vm554_vm7 = vcmp.gt.f32.partialorder %v477_v40, 0.0  ;;  %v586_v45 = vmul.f32 0.2, %v477_v40 }
 0x104   : > { %636 = vst [vmem:[%s1083_s19 + $0x18] sm:$0xff] %v604_v42  ;;  %v620_v44 = vsel %vm556_vm5, %v849_v34, %v588_v38 }
 0x105   : > { %652 = vst [vmem:[%s1083_s19 + $0x98] sm:$0xff] %v620_v44  ;;  %v602_v46 = vsel %vm538_vm6, %v413_v39, %v570_v43  ;;  %v836_v47 = vpop.f32.mrb[4].mxu0  ;;  %v618_v49 = vsel %vm554_vm7, %v477_v40, %v586_v45 }
 0x106   : > { %v852_v48 = vpop.f32.mrb[4].mxu1  ;;  %634 = vst [vmem:[%s1083_s19 + $0x8] sm:$0xff] %v602_v46  ;;  %vm543_vm8 = vcmp.gt.f32.partialorder %v836_v47, 0.0  ;;  %v575_v50 = vmul.f32 0.2, %v836_v47  ;;  %v426_v51 = vpop.f32.mrb[5].mxu0 }
 0x107   : > { %vm559_vm9 = vcmp.gt.f32.partialorder %v852_v48, 0.0  ;;  %v490_v52 = vpop.f32.mrb[5].mxu1  ;;  %650 = vst [vmem:[%s1083_s19 + $0x88] sm:$0xff] %v618_v49  ;;  %v591_v53 = vmul.f32 0.2, %v852_v48  ;;  %vm541_vm10 = vcmp.gt.f32.partialorder %v426_v51, 0.0 }
 0x108   : > { %v573_v54 = vmul.f32 0.2, %v426_v51  ;;  %vm557_vm11 = vcmp.gt.f32.partialorder %v490_v52, 0.0  ;;  %v607_v55 = vsel %vm543_vm8, %v836_v47, %v575_v50  ;;  %v589_v56 = vmul.f32 0.2, %v490_v52  ;;  %v837_v57 = vpop.f32.mrb[6].mxu0 }
 0x109   : > { %v853_v58 = vpop.f32.mrb[6].mxu1  ;;  %639 = vst [vmem:[%s1083_s19 + $0x30] sm:$0xff] %v607_v55  ;;  %v623_v59 = vsel %vm559_vm9, %v852_v48, %v591_v53  ;;  %vm544_vm12 = vcmp.gt.f32.partialorder %v837_v57, 0.0  ;;  %v576_v61 = vmul.f32 0.2, %v837_v57  ;;  %v429_v62 = vpop.f32.mrb[7].mxu0 }
 0x10a   : > { %v605_v60 = vsel %vm541_vm10, %v426_v51, %v573_v54  ;;  %v493_v63 = vpop.f32.mrb[7].mxu1  ;;  %655 = vst [vmem:[%s1083_s19 + $0xb0] sm:$0xff] %v623_v59  ;;  %v621_v0 = vsel %vm557_vm11, %v490_v52, %v589_v56  ;;  %vm560_vm13 = vcmp.gt.f32.partialorder %v853_v58, 0.0  ;;  %v592_v1 = vmul.f32 0.2, %v853_v58 }
 0x10b   : > { %637 = vst [vmem:[%s1083_s19 + $0x20] sm:$0xff] %v605_v60  ;;  %vm542_vm14 = vcmp.gt.f32.partialorder %v429_v62, 0.0  ;;  %653 = vst [vmem:[%s1083_s19 + $0xa0] sm:$0xff] %v621_v0  ;;  %v608_v2 = vsel %vm544_vm12, %v837_v57, %v576_v61  ;;  %v574_v3 = vmul.f32 0.2, %v429_v62  ;;  %vm558_vm15 = vcmp.gt.f32.partialorder %v493_v63, 0.0 }
 0x10c   : > { %v590_v4 = vmul.f32 0.2, %v493_v63  ;;  %640 = vst [vmem:[%s1083_s19 + $0x38] sm:$0xff] %v608_v2  ;;  %v624_v5 = vsel %vm560_vm13, %v853_v58, %v592_v1 }
 0x10d   : > { %656 = vst [vmem:[%s1083_s19 + $0xb8] sm:$0xff] %v624_v5  ;;  %v606_v6 = vsel %vm542_vm14, %v429_v62, %v574_v3  ;;  %v840_v8 = vpop.f32.mrb[8].mxu0 }
 0x10e   : > { %v622_v7 = vsel %vm558_vm15, %v493_v63, %v590_v4  ;;  %v856_v9 = vpop.f32.mrb[8].mxu1  ;;  %638 = vst [vmem:[%s1083_s19 + $0x28] sm:$0xff] %v606_v6  ;;  %vm547_vm0 = vcmp.gt.f32.partialorder %v840_v8, 0.0  ;;  %v579_v10 = vmul.f32 0.2, %v840_v8  ;;  %v442_v12 = vpop.f32.mrb[9].mxu0 }
 0x10f   : > { %654 = vst [vmem:[%s1083_s19 + $0xa8] sm:$0xff] %v622_v7  ;;  %vm563_vm1 = vcmp.gt.f32.partialorder %v856_v9, 0.0  ;;  %v595_v11 = vmul.f32 0.2, %v856_v9  ;;  %v506_v13 = vpop.f32.mrb[9].mxu1  ;;  %vm545_vm2 = vcmp.gt.f32.partialorder %v442_v12, 0.0 }
 0x110   : > { %v611_v14 = vsel %vm547_vm0, %v840_v8, %v579_v10  ;;  %v577_v16 = vmul.f32 0.2, %v442_v12  ;;  %v841_v17 = vpop.f32.mrb[10].mxu0  ;;  %v857_v18 = vpop.f32.mrb[10].mxu1  ;;  %vm561_vm3 = vcmp.gt.f32.partialorder %v506_v13, 0.0 }
 0x111   : > { %v627_v15 = vsel %vm563_vm1, %v856_v9, %v595_v11  ;;  %643 = vst [vmem:[%s1083_s19 + $0x50] sm:$0xff] %v611_v14  ;;  %v593_v19 = vmul.f32 0.2, %v506_v13  ;;  %vm548_vm4 = vcmp.gt.f32.partialorder %v841_v17, 0.0  ;;  %v580_v20 = vmul.f32 0.2, %v841_v17 }
 0x112   : > { %659 = vst [vmem:[%s1083_s19 + $0xd0] sm:$0xff] %v627_v15  ;;  %v609_v21 = vsel %vm545_vm2, %v442_v12, %v577_v16  ;;  %vm564_vm5 = vcmp.gt.f32.partialorder %v857_v18, 0.0  ;;  %v596_v22 = vmul.f32 0.2, %v857_v18  ;;  %v445_v23 = vpop.f32.mrb[11].mxu0  ;;  %v509_v24 = vpop.f32.mrb[11].mxu1 }
 0x113   : > { %641 = vst [vmem:[%s1083_s19 + $0x40] sm:$0xff] %v609_v21  ;;  %v625_v25 = vsel %vm561_vm3, %v506_v13, %v593_v19  ;;  %v612_v26 = vsel %vm548_vm4, %v841_v17, %v580_v20  ;;  %vm546_vm6 = vcmp.gt.f32.partialorder %v445_v23, 0.0  ;;  %v578_v27 = vmul.f32 0.2, %v445_v23 }
 0x114   : > { %657 = vst [vmem:[%s1083_s19 + $0xc0] sm:$0xff] %v625_v25  ;;  %644 = vst [vmem:[%s1083_s19 + $0x58] sm:$0xff] %v612_v26  ;;  %v628_v28 = vsel %vm564_vm5, %v857_v18, %v596_v22  ;;  %vm562_vm7 = vcmp.gt.f32.partialorder %v509_v24, 0.0  ;;  %v594_v29 = vmul.f32 0.2, %v509_v24 }
 0x115   : > { %660 = vst [vmem:[%s1083_s19 + $0xd8] sm:$0xff] %v628_v28  ;;  %v610_v30 = vsel %vm546_vm6, %v445_v23, %v578_v27  ;;  %v844_v31 = vpop.f32.mrb[12].mxu0 }
 0x116   : > { %v860_v32 = vpop.f32.mrb[12].mxu1  ;;  %642 = vst [vmem:[%s1083_s19 + $0x48] sm:$0xff] %v610_v30  ;;  %v626_v33 = vsel %vm562_vm7, %v509_v24, %v594_v29  ;;  %vm551_vm8 = vcmp.gt.f32.partialorder %v844_v31, 0.0  ;;  %v583_v34 = vmul.f32 0.2, %v844_v31  ;;  %v458_v35 = vpop.f32.mrb[13].mxu0 }
 0x117   : > { %vm567_vm9 = vcmp.gt.f32.partialorder %v860_v32, 0.0  ;;  %v522_v36 = vpop.f32.mrb[13].mxu1  ;;  %658 = vst [vmem:[%s1083_s19 + $0xc8] sm:$0xff] %v626_v33  ;;  %v599_v37 = vmul.f32 0.2, %v860_v32  ;;  %vm549_vm10 = vcmp.gt.f32.partialorder %v458_v35, 0.0 }
 0x118   : > { %v581_v38 = vmul.f32 0.2, %v458_v35  ;;  %vm565_vm11 = vcmp.gt.f32.partialorder %v522_v36, 0.0  ;;  %v615_v39 = vsel %vm551_vm8, %v844_v31, %v583_v34  ;;  %v597_v40 = vmul.f32 0.2, %v522_v36  ;;  %v845_v41 = vpop.f32.mrb[14].mxu0 }
 0x119   : > { %v861_v42 = vpop.f32.mrb[14].mxu1  ;;  %647 = vst [vmem:[%s1083_s19 + $0x70] sm:$0xff] %v615_v39  ;;  %v631_v43 = vsel %vm567_vm9, %v860_v32, %v599_v37  ;;  %vm552_vm12 = vcmp.gt.f32.partialorder %v845_v41, 0.0  ;;  %v584_v45 = vmul.f32 0.2, %v845_v41  ;;  %v461_v46 = vpop.f32.mrb[15].mxu0 }
 0x11a   : > { %v613_v44 = vsel %vm549_vm10, %v458_v35, %v581_v38  ;;  %v525_v47 = vpop.f32.mrb[15].mxu1  ;;  %663 = vst [vmem:[%s1083_s19 + $0xf0] sm:$0xff] %v631_v43  ;;  %v629_v48 = vsel %vm565_vm11, %v522_v36, %v597_v40  ;;  %vm568_vm13 = vcmp.gt.f32.partialorder %v861_v42, 0.0  ;;  %v600_v49 = vmul.f32 0.2, %v861_v42 }
 0x11b   : > { %645 = vst [vmem:[%s1083_s19 + $0x60] sm:$0xff] %v613_v44  ;;  %vm550_vm14 = vcmp.gt.f32.partialorder %v461_v46, 0.0  ;;  %661 = vst [vmem:[%s1083_s19 + $0xe0] sm:$0xff] %v629_v48  ;;  %v616_v50 = vsel %vm552_vm12, %v845_v41, %v584_v45  ;;  %v582_v51 = vmul.f32 0.2, %v461_v46  ;;  %vm566_vm15 = vcmp.gt.f32.partialorder %v525_v47, 0.0 }
 0x11c   : > { %v598_v52 = vmul.f32 0.2, %v525_v47  ;;  %648 = vst [vmem:[%s1083_s19 + $0x78] sm:$0xff] %v616_v50  ;;  %v632_v53 = vsel %vm568_vm13, %v861_v42, %v600_v49 }
 0x11d   : > { %664 = vst [vmem:[%s1083_s19 + $0xf8] sm:$0xff] %v632_v53  ;;  %v614_v54 = vsel %vm550_vm14, %v461_v46, %v582_v51 }
 0x11e   : > { %v630_v55 = vsel %vm566_vm15, %v525_v47, %v598_v52  ;;  %646 = vst [vmem:[%s1083_s19 + $0x68] sm:$0xff] %v614_v54 }
 0x11f   : > { %662 = vst [vmem:[%s1083_s19 + $0xe8] sm:$0xff] %v630_v55 }
 0x120 PF: > { %s12_s13 = sadd.s32 1, %s981_s13   ;;  %s1135_s9 = smov %s973_s11 }
 0x121   : > { %p9_p7 = scmp.ge.s32.totalorder %s12_s13, 16   ;;  %s1136_s10 = smov %s977_s12 }
 0x122   : > { %s1137_s11 = smov %s1140_s14  ;;  %s1138_s12 = smov %s1144_s15 }
 0x123   :  { %11 = sbr.rel (!%p9_p7) target bundleno = 3 (0x3), region = 58 }

// kernel: d_net3d_forward.6
= control target key start
LH: loop header
LB: loop body
LE: loop exit
PB: predicated region body
PF: predicated region fallthrough
CT: control target
= control target key end

     0   :  { %s1733_s9 = smov 0   ;;  %s1735_s10 = smov 0   ;;  %s1955_s0 = inlined_call_operand.vmem [shape: bf16[2,216,512], index: 0, kind: input, shape index: {}]   ;;  %s1956_s1 = inlined_call_operand.vmem [shape: bf16[512,128], index: 1, kind: input, shape index: {}]   ;;  %s1957_s2 = inlined_call_operand.vmem [shape: f32[2,216,128], index: 2, kind: output, shape index: {}]  }
   0x1   :  { %s1737_s11 = smov 0  }
   0x2 LB: > { %s24_s12 = sadd.s32 1, %s1712_s10  ;;  %p1261_p0 = scmp.ge.s32.totalorder %s1716_s11, 1  ;;  %s1716_s11 = sphi %s1737_s11, %s12_s11   ;;  %s1712_s10 = sphi %s1735_s10, %s1959_s10   ;;  %s1708_s9 = sphi %s1733_s9, %s1958_s9  }
   0x3   : > { %p26_p1 = scmp.ge.s32.totalorder %s24_s12, 2  ;;  %p134_p2 = scmp.lt.s32.totalorder %s1716_s11, 3 }
   0x5   : > { %s1961_s12 = smov (%p26_p1, %s24_s12), 0  ;;  %p135_p3 = pnand %p1261_p0, %p134_p2 }
   0x6   : > { %v1580_v0 = vld [vmem:[%s1956_s1 + $0x40] sm:$0xff] (!%p135_p3)   ;;  %v1584_v4 = vld [vmem:[%s1956_s1 + $0x48] sm:$0xff] (!%p135_p3)   ;;  %v1588_v8 = vld [vmem:[%s1956_s1 + $0x50] sm:$0xff] (!%p135_p3)   ;;  %p166_p4 = scmp.lt.s32.totalorder (!%p135_p3), %s1708_s9, 1 }
   0x7   : > { %138 = sbr.rel (%p135_p3) target bundleno = 366 (0x16e), region = 28  ;;  %v1581_v1 = vld [vmem:[%s1956_s1 + $0xc0] sm:$0xff] (!%p135_p3)   ;;  %1354 = vmatprep.subr.bf16.mxu0 (!%p135_p3), %v1580_v0  ;;  %v1585_v5 = vld [vmem:[%s1956_s1 + $0xc8] sm:$0xff] (!%p135_p3)   ;;  %v1589_v9 = vld [vmem:[%s1956_s1 + $0xd0] sm:$0xff] (!%p135_p3)  }
   0x8   : > { %v1582_v2 = vld [vmem:[%s1956_s1] sm:$0xff] (!%p135_p3)   ;;  %1454 = vmatprep.subr.bf16.mxu1 (!%p135_p3), %v1581_v1  ;;  %v1586_v6 = vld [vmem:[%s1956_s1 + $0x8] sm:$0xff] (!%p135_p3)   ;;  %v1590_v10 = vld [vmem:[%s1956_s1 + $0x10] sm:$0xff] (!%p135_p3)  }
   0x9   : > { %v1583_v3 = vld [vmem:[%s1956_s1 + $0x80] sm:$0xff] (!%p135_p3)   ;;  %1355 = vmatpush3.bf16.msra.mxu0 (!%p135_p3), %v1582_v2  ;;  %v1587_v7 = vld [vmem:[%s1956_s1 + $0x88] sm:$0xff] (!%p135_p3)   ;;  %v1591_v11 = vld [vmem:[%s1956_s1 + $0x90] sm:$0xff] (!%p135_p3)  }
   0xa   : > { %1455 = vmatpush3.bf16.msra.mxu1 (!%p135_p3), %v1583_v3  ;;  %1356 = vmatprep.subr.bf16.mxu0 (!%p135_p3), %v1584_v4  ;;  %v1592_v12 = vld [vmem:[%s1956_s1 + $0x58] sm:$0xff] (!%p135_p3)   ;;  %v1596_v16 = vld [vmem:[%s1956_s1 + $0x60] sm:$0xff] (!%p135_p3)   ;;  %v1600_v20 = vld [vmem:[%s1956_s1 + $0x68] sm:$0xff] (!%p135_p3)  }
   0xb   : > { %1456 = vmatprep.subr.bf16.mxu1 (!%p135_p3), %v1585_v5  ;;  %v1593_v13 = vld [vmem:[%s1956_s1 + $0xd8] sm:$0xff] (!%p135_p3)   ;;  %v1597_v17 = vld [vmem:[%s1956_s1 + $0xe0] sm:$0xff] (!%p135_p3)   ;;  %v1601_v21 = vld [vmem:[%s1956_s1 + $0xe8] sm:$0xff] (!%p135_p3)  }
   0xc   : > { %v1594_v14 = vld [vmem:[%s1956_s1 + $0x18] sm:$0xff] (!%p135_p3)   ;;  %v1598_v18 = vld [vmem:[%s1956_s1 + $0x20] sm:$0xff] (!%p135_p3)   ;;  %v1602_v22 = vld [vmem:[%s1956_s1 + $0x28] sm:$0xff] (!%p135_p3)  }
   0xd   : > { %1357 = vmatpush3.bf16.msra.mxu0 (!%p135_p3), %v1586_v6  ;;  %v1595_v15 = vld [vmem:[%s1956_s1 + $0x98] sm:$0xff] (!%p135_p3)   ;;  %v1599_v19 = vld [vmem:[%s1956_s1 + $0xa0] sm:$0xff] (!%p135_p3)   ;;  %v1603_v23 = vld [vmem:[%s1956_s1 + $0xa8] sm:$0xff] (!%p135_p3)  }
   0xe   : > { %1457 = vmatpush3.bf16.msra.mxu1 %v1587_v7  ;;  %1358 = vmatprep.subr.bf16.mxu0 %v1588_v8  ;;  %s1963_s9 = smov (!%p166_p4, %s1708_s9), 1  ;;  %v1604_v24 = vld [vmem:[%s1956_s1 + $0x70] sm:$0xff]   ;;  %v1608_v28 = vld [vmem:[%s1956_s1 + $0x78] sm:$0xff]  }
   0xf   : > { %1458 = vmatprep.subr.bf16.mxu1 %v1589_v9  ;;  %v1605_v25 = vld [vmem:[%s1956_s1 + $0xf0] sm:$0xff]   ;;  %s1554_s17 = smul.u32 432, %s1963_s9  ;;  %v1609_v29 = vld [vmem:[%s1956_s1 + $0xf8] sm:$0xff]  }
  0x10   : > { %v1606_v26 = vld [vmem:[%s1956_s1 + $0x30] sm:$0xff]   ;;  %v1610_v30 = vld [vmem:[%s1956_s1 + $0x38] sm:$0xff]   ;;  %s1555_s5 = smul.u32 216, %s1963_s9 }
  0x11   : > { %1359 = vmatpush3.bf16.msra.mxu0 %v1590_v10  ;;  %v1607_v27 = vld [vmem:[%s1956_s1 + $0xb0] sm:$0xff]   ;;  %s1851_s28 = scalar_lea.vmem %s1955_s0, %s1554_s17  ;;  %v1611_v31 = vld [vmem:[%s1956_s1 + $0xb8] sm:$0xff]  }
  0x12   : > { %1459 = vmatpush3.bf16.msra.mxu1 %v1591_v11  ;;  %1360 = vmatprep.subr.bf16.mxu0 %v1592_v12  ;;  %v1612_v32 = vld [vmem:[%s1851_s28] ss:$16 sps:$4 sm:$0xff]   ;;  %v1614_v33 = vld [vmem:[%s1851_s28 + $0x4] ss:$16 sps:$4 sm:$0xff]   ;;  %v1615_v34 = vld [vmem:[%s1851_s28 + $0x8] ss:$16 sps:$4 sm:$0xff]   ;;  %s1917_s8 = scalar_lea.vmem %s1957_s2, %s1555_s5 }
  0x13   : > { %1460 = vmatprep.subr.bf16.mxu1 %v1593_v13  ;;  %v1617_v35 = vld [vmem:[%s1851_s28 + $0xc] ss:$16 sps:$4 sm:$0xff]   ;;  %803 = vmatprep.mubr.bf16.mxu0 %v1614_v33  ;;  %v1618_v36 = vld [vmem:[%s1851_s28 + $0x24] ss:$16 sps:$4 sm:$0xff]   ;;  %v1622_v38 = vld [vmem:[%s1851_s28 + $0x20] ss:$16 sps:$4 sm:$0xff]  }
  0x14   : > { %947 = vmatprep.mubr.bf16.mxu1 %v1617_v35  ;;  %v1620_v37 = vld [vmem:[%s1851_s28 + $0x2c] ss:$16 sps:$4 sm:$0xff]   ;;  %v1623_v39 = vld [vmem:[%s1851_s28 + $0x28] ss:$16 sps:$4 sm:$0xff]   ;;  %v1624_v40 = vld [vmem:[%s1851_s28 + $0x44] ss:$16 sps:$4 sm:$0xff]  }
  0x15   : > { %1361 = vmatpush3.bf16.msra.mxu0 %v1594_v14  ;;  %v1626_v41 = vld [vmem:[%s1851_s28 + $0x4c] ss:$16 sps:$4 sm:$0xff]   ;;  %v1628_v42 = vld [vmem:[%s1851_s28 + $0x40] ss:$16 sps:$4 sm:$0xff]   ;;  %v1629_v43 = vld [vmem:[%s1851_s28 + $0x48] ss:$16 sps:$4 sm:$0xff]  }
  0x16   : > { %1461 = vmatpush3.bf16.msra.mxu1 %v1595_v15  ;;  %1362 = vmatprep.subr.bf16.mxu0 %v1596_v16  ;;  %v1630_v44 = vld [vmem:[%s1851_s28 + $0x64] ss:$16 sps:$4 sm:$0xff]   ;;  %v1632_v45 = vld [vmem:[%s1851_s28 + $0x6c] ss:$16 sps:$4 sm:$0xff]   ;;  %v1634_v46 = vld [vmem:[%s1851_s28 + $0x60] ss:$16 sps:$4 sm:$0xff]  }
  0x17   : > { %1462 = vmatprep.subr.bf16.mxu1 %v1597_v17  ;;  %v1635_v47 = vld [vmem:[%s1851_s28 + $0x68] ss:$16 sps:$4 sm:$0xff]   ;;  %v1636_v48 = vld [vmem:[%s1851_s28 + $0x84] ss:$16 sps:$4 sm:$0xff]   ;;  %v1638_v49 = vld [vmem:[%s1851_s28 + $0x8c] ss:$16 sps:$4 sm:$0xff]  }
  0x18   : > { %v1640_v50 = vld [vmem:[%s1851_s28 + $0x80] ss:$16 sps:$4 sm:$0xff]   ;;  %v1641_v51 = vld [vmem:[%s1851_s28 + $0x88] ss:$16 sps:$4 sm:$0xff]   ;;  %v1642_v52 = vld [vmem:[%s1851_s28 + $0xa4] ss:$16 sps:$4 sm:$0xff]  }
  0x19   : > { %1363 = vmatpush3.bf16.msra.mxu0 %v1598_v18  ;;  %v1644_v53 = vld [vmem:[%s1851_s28 + $0xac] ss:$16 sps:$4 sm:$0xff]   ;;  %v1646_v54 = vld [vmem:[%s1851_s28 + $0xa0] ss:$16 sps:$4 sm:$0xff]   ;;  %v1647_v55 = vld [vmem:[%s1851_s28 + $0xa8] ss:$16 sps:$4 sm:$0xff]  }
  0x1a   : > { %1463 = vmatpush3.bf16.msra.mxu1 %v1599_v19  ;;  %1364 = vmatprep.subr.bf16.mxu0 %v1600_v20  ;;  %v1648_v56 = vld [vmem:[%s1851_s28 + $0xc4] ss:$16 sps:$4 sm:$0xff]   ;;  %v1650_v57 = vld [vmem:[%s1851_s28 + $0xcc] ss:$16 sps:$4 sm:$0xff]   ;;  %v1652_v58 = vld [vmem:[%s1851_s28 + $0xc0] ss:$16 sps:$4 sm:$0xff]  }
  0x1b   : > { %1464 = vmatprep.subr.bf16.mxu1 %v1601_v21  ;;  %v1653_v59 = vld [vmem:[%s1851_s28 + $0xc8] ss:$16 sps:$4 sm:$0xff]   ;;  %v1654_v60 = vld [vmem:[%s1851_s28 + $0xe4] ss:$16 sps:$4 sm:$0xff]   ;;  %v1656_v61 = vld [vmem:[%s1851_s28 + $0xec] ss:$16 sps:$4 sm:$0xff]  }
  0x1c   : > { %v1658_v62 = vld [vmem:[%s1851_s28 + $0xe0] ss:$16 sps:$4 sm:$0xff]   ;;  %v1659_v63 = vld [vmem:[%s1851_s28 + $0xe8] ss:$16 sps:$4 sm:$0xff]   ;;  %v1660_v0 = vld [vmem:[%s1851_s28 + $0x104] ss:$16 sps:$4 sm:$0xff]  }
  0x1d   : > { %1365 = vmatpush3.bf16.msra.mxu0 %v1602_v22  ;;  %v1662_v1 = vld [vmem:[%s1851_s28 + $0x10c] ss:$16 sps:$4 sm:$0xff]   ;;  %v1664_v2 = vld [vmem:[%s1851_s28 + $0x100] ss:$16 sps:$4 sm:$0xff]   ;;  %v1665_v3 = vld [vmem:[%s1851_s28 + $0x108] ss:$16 sps:$4 sm:$0xff]  }
  0x1e   : > { %1465 = vmatpush3.bf16.msra.mxu1 %v1603_v23  ;;  %1366 = vmatprep.subr.bf16.mxu0 %v1604_v24  ;;  %v1666_v4 = vld [vmem:[%s1851_s28 + $0x124] ss:$16 sps:$4 sm:$0xff]   ;;  %v1668_v5 = vld [vmem:[%s1851_s28 + $0x12c] ss:$16 sps:$4 sm:$0xff]   ;;  %v1670_v6 = vld [vmem:[%s1851_s28 + $0x120] ss:$16 sps:$4 sm:$0xff]  }
  0x1f   : > { %1466 = vmatprep.subr.bf16.mxu1 %v1605_v25  ;;  %v1671_v7 = vld [vmem:[%s1851_s28 + $0x128] ss:$16 sps:$4 sm:$0xff]   ;;  %v1672_v8 = vld [vmem:[%s1851_s28 + $0x144] ss:$16 sps:$4 sm:$0xff]   ;;  %v1674_v9 = vld [vmem:[%s1851_s28 + $0x14c] ss:$16 sps:$4 sm:$0xff]  }
  0x20   : > { %v1676_v10 = vld [vmem:[%s1851_s28 + $0x140] ss:$16 sps:$4 sm:$0xff]   ;;  %v1677_v11 = vld [vmem:[%s1851_s28 + $0x148] ss:$16 sps:$4 sm:$0xff]   ;;  %v1678_v12 = vld [vmem:[%s1851_s28 + $0x164] ss:$16 sps:$4 sm:$0xff]  }
  0x21   : > { %1367 = vmatpush3.bf16.msra.mxu0 %v1606_v26  ;;  %v1680_v13 = vld [vmem:[%s1851_s28 + $0x16c] ss:$16 sps:$4 sm:$0xff]   ;;  %v1682_v14 = vld [vmem:[%s1851_s28 + $0x160] ss:$16 sps:$4 sm:$0xff]   ;;  %v1683_v15 = vld [vmem:[%s1851_s28 + $0x168] ss:$16 sps:$4 sm:$0xff]  }
  0x22   : > { %1467 = vmatpush3.bf16.msra.mxu1 %v1607_v27  ;;  %1368 = vmatprep.subr.bf16.mxu0 %v1608_v28  ;;  %v1684_v16 = vld [vmem:[%s1851_s28 + $0x184] ss:$16 sps:$4 sm:$0xff]   ;;  %v1686_v17 = vld [vmem:[%s1851_s28 + $0x18c] ss:$16 sps:$4 sm:$0xff]   ;;  %v1688_v20 = vld [vmem:[%s1851_s28 + $0x180] ss:$16 sps:$4 sm:$0xff]  }
  0x23   : > { %1468 = vmatprep.subr.bf16.mxu1 %v1609_v29  ;;  %v239_v18 = vld [vmem:[%s1851_s28 + $0x1a0] sm:$0xff]  ;;  %v240_v19 = vld [vmem:[%s1851_s28 + $0x1a8] sm:$0xff] }
  0x24   : > { %v1689_v21 = vld [vmem:[%s1851_s28 + $0x188] ss:$16 sps:$4 sm:$0xff]   ;;  %v1317_v22 = vcombine.high %v239_v18, %v239_v18  ;;  %v1319_v23 = vcombine.high %v240_v19, %v240_v19  ;;  %v1316_v24 = vcombine.low %v239_v18, %v239_v18  ;;  %v1318_v25 = vcombine.low %v240_v19, %v240_v19 }
  0x25   : > { %1369 = vmatpush3.bf16.msra.mxu0 %v1610_v30 }
  0x26   : > { %1469 = vmatpush3.bf16.msra.mxu1 %v1611_v31 }
  0x28   : > { %804 = vmatmul.mubr.bf16.vlgmr.msra.gmra.mrb[0].mxu0 %v1612_v32 }
  0x29   : > { %948 = vmatmul.mubr.bf16.vlgmr.msra.gmra.mrb[0].mxu1 %v1615_v34  ;;  %811 = vmatprep.mubr.bf16.mxu0 %v1618_v36 }
  0x2a   : > { %955 = vmatprep.mubr.bf16.mxu1 %v1620_v37 }
  0x30   : > { %812 = vmatmul.mubr.bf16.gmra.mrb[4].mxu0 %v1622_v38 }
  0x31   : > { %956 = vmatmul.mubr.bf16.gmra.mrb[4].mxu1 %v1623_v39  ;;  %819 = vmatprep.mubr.bf16.mxu0 %v1624_v40 }
  0x32   : > { %963 = vmatprep.mubr.bf16.mxu1 %v1626_v41 }
  0x38   : > { %820 = vmatmul.mubr.bf16.gmra.mrb[8].mxu0 %v1628_v42 }
  0x39   : > { %964 = vmatmul.mubr.bf16.gmra.mrb[8].mxu1 %v1629_v43  ;;  %827 = vmatprep.mubr.bf16.mxu0 %v1630_v44 }
  0x3a   : > { %971 = vmatprep.mubr.bf16.mxu1 %v1632_v45 }
  0x40   : > { %828 = vmatmul.mubr.bf16.gmra.mrb[12].mxu0 %v1634_v46 }
  0x41   : > { %972 = vmatmul.mubr.bf16.gmra.mrb[12].mxu1 %v1635_v47  ;;  %835 = vmatprep.mubr.bf16.mxu0 %v1636_v48 }
  0x42   : > { %979 = vmatprep.mubr.bf16.mxu1 %v1638_v49 }
  0x48   : > { %836 = vmatmul.mubr.bf16.gmra.mrb[16].mxu0 %v1640_v50 }
  0x49   : > { %980 = vmatmul.mubr.bf16.gmra.mrb[16].mxu1 %v1641_v51  ;;  %843 = vmatprep.mubr.bf16.mxu0 %v1642_v52 }
  0x4a   : > { %987 = vmatprep.mubr.bf16.mxu1 %v1644_v53 }
  0x50   : > { %844 = vmatmul.mubr.bf16.gmra.mrb[20].mxu0 %v1646_v54 }
  0x51   : > { %988 = vmatmul.mubr.bf16.gmra.mrb[20].mxu1 %v1647_v55  ;;  %851 = vmatprep.mubr.bf16.mxu0 %v1648_v56 }
  0x52   : > { %995 = vmatprep.mubr.bf16.mxu1 %v1650_v57 }
  0x58   : > { %852 = vmatmul.mubr.bf16.gmra.mrb[24].mxu0 %v1652_v58 }
  0x59   : > { %996 = vmatmul.mubr.bf16.gmra.mrb[24].mxu1 %v1653_v59  ;;  %859 = vmatprep.mubr.bf16.mxu0 %v1654_v60 }
  0x5a   : > { %1003 = vmatprep.mubr.bf16.mxu1 %v1656_v61 }
  0x60   : > { %860 = vmatmul.mubr.bf16.gmra.mrb[28].mxu0 %v1658_v62 }
  0x61   : > { %1004 = vmatmul.mubr.bf16.gmra.mrb[28].mxu1 %v1659_v63  ;;  %867 = vmatprep.mubr.bf16.mxu0 %v1660_v0 }
  0x62   : > { %1011 = vmatprep.mubr.bf16.mxu1 %v1662_v1 }
  0x68   : > { %868 = vmatmul.mubr.bf16.gmra.mrb[32].mxu0 %v1664_v2 }
  0x69   : > { %1012 = vmatmul.mubr.bf16.gmra.mrb[32].mxu1 %v1665_v3  ;;  %875 = vmatprep.mubr.bf16.mxu0 %v1666_v4 }
  0x6a   : > { %1019 = vmatprep.mubr.bf16.mxu1 %v1668_v5 }
  0x70   : > { %876 = vmatmul.mubr.bf16.gmra.mrb[36].mxu0 %v1670_v6 }
  0x71   : > { %1020 = vmatmul.mubr.bf16.gmra.mrb[36].mxu1 %v1671_v7  ;;  %883 = vmatprep.mubr.bf16.mxu0 %v1672_v8 }
  0x72   : > { %1027 = vmatprep.mubr.bf16.mxu1 %v1674_v9 }
  0x78   : > { %884 = vmatmul.mubr.bf16.gmra.mrb[40].mxu0 %v1676_v10 }
  0x79   : > { %1028 = vmatmul.mubr.bf16.gmra.mrb[40].mxu1 %v1677_v11  ;;  %891 = vmatprep.mubr.bf16.mxu0 %v1678_v12 }
  0x7a   : > { %1035 = vmatprep.mubr.bf16.mxu1 %v1680_v13 }
  0x80   : > { %892 = vmatmul.mubr.bf16.gmra.mrb[44].mxu0 %v1682_v14 }
  0x81   : > { %1036 = vmatmul.mubr.bf16.gmra.mrb[44].mxu1 %v1683_v15  ;;  %899 = vmatprep.mubr.bf16.mxu0 %v1684_v16 }
  0x82   : > { %1043 = vmatprep.mubr.bf16.mxu1 %v1686_v17 }
  0x88   : > { %900 = vmatmul.mubr.bf16.gmra.mrb[48].mxu0 %v1688_v20 }
  0x89   : > { %1044 = vmatmul.mubr.bf16.gmra.mrb[48].mxu1 %v1689_v21  ;;  %907 = vmatprep.mubr.bf16.mxu0 %v1317_v22 }
  0x8a   : > { %1051 = vmatprep.mubr.bf16.mxu1 %v1319_v23 }
  0x90   : > { %908 = vmatmul.mubr.bf16.gmra.mrb[52].mxu0 %v1316_v24 }
  0x91   : > { %1052 = vmatmul.mubr.bf16.gmra.mrb[52].mxu1 %v1318_v25 }
  0xfb   : > { %v1370_v26 = vpop.f32.mrb[0].mxu0 }
  0xfc   : > { %v1470_v27 = vpop.f32.mrb[0].mxu1  ;;  %v1371_v28 = vpop.f32.mrb[1].mxu0 }
  0xfd   : > { %v1372_v29 = vadd.f32 %v1371_v28, %v1370_v26  ;;  %v1471_v30 = vpop.f32.mrb[1].mxu1  ;;  %v1373_v31 = vpop.f32.mrb[2].mxu0 }
  0xfe   : > { %v1472_v32 = vadd.f32 %v1471_v30, %v1470_v27  ;;  %v1473_v33 = vpop.f32.mrb[2].mxu1  ;;  %v1374_v34 = vpop.f32.mrb[3].mxu0 }
  0xff   : > { %v1375_v35 = vadd.f32 %v1374_v34, %v1373_v31  ;;  %v1474_v36 = vpop.f32.mrb[3].mxu1 }
 0x100   : > { %v950_v37 = vadd.f32 %v1472_v32, %v1372_v29  ;;  %v1475_v38 = vadd.f32 %v1474_v36, %v1473_v33 }
 0x102   : > { %vm1059_vm0 = vcmp.gt.f32.partialorder %v950_v37, 0.0  ;;  %v1086_v39 = vmul.f32 0.2, %v950_v37  ;;  %v953_v40 = vadd.f32 %v1475_v38, %v1375_v35 }
 0x103   : > { %v1376_v41 = vpop.f32.mrb[4].mxu0 }
 0x104   : > { %v1113_v42 = vsel %vm1059_vm0, %v950_v37, %v1086_v39  ;;  %vm1060_vm1 = vcmp.gt.f32.partialorder %v953_v40, 0.0  ;;  %v1087_v43 = vmul.f32 0.2, %v953_v40  ;;  %v1476_v44 = vpop.f32.mrb[4].mxu1  ;;  %v1377_v45 = vpop.f32.mrb[5].mxu0 }
 0x105   : > { %1140 = vst [vmem:[%s1917_s8] sm:$0xff] %v1113_v42  ;;  %v1378_v46 = vadd.f32 %v1377_v45, %v1376_v41  ;;  %v1477_v47 = vpop.f32.mrb[5].mxu1  ;;  %v1379_v48 = vpop.f32.mrb[6].mxu0 }
 0x106   : > { %v1114_v49 = vsel %vm1060_vm1, %v953_v40, %v1087_v43  ;;  %v1478_v50 = vadd.f32 %v1477_v47, %v1476_v44  ;;  %v1479_v51 = vpop.f32.mrb[6].mxu1  ;;  %v1380_v52 = vpop.f32.mrb[7].mxu0 }
 0x107   : > { %1141 = vst [vmem:[%s1917_s8 + $0x8] sm:$0xff] %v1114_v49  ;;  %v1381_v53 = vadd.f32 %v1380_v52, %v1379_v48  ;;  %v1480_v54 = vpop.f32.mrb[7].mxu1 }
 0x108   : > { %v958_v55 = vadd.f32 %v1478_v50, %v1378_v46  ;;  %v1481_v56 = vadd.f32 %v1480_v54, %v1479_v51 }
 0x10a   : > { %vm1061_vm2 = vcmp.gt.f32.partialorder %v958_v55, 0.0  ;;  %v1088_v57 = vmul.f32 0.2, %v958_v55  ;;  %v961_v58 = vadd.f32 %v1481_v56, %v1381_v53 }
 0x10b   : > { %v1382_v59 = vpop.f32.mrb[8].mxu0 }
 0x10c   : > { %v1115_v60 = vsel %vm1061_vm2, %v958_v55, %v1088_v57  ;;  %vm1062_vm3 = vcmp.gt.f32.partialorder %v961_v58, 0.0  ;;  %v1089_v61 = vmul.f32 0.2, %v961_v58  ;;  %v1482_v62 = vpop.f32.mrb[8].mxu1  ;;  %v1383_v63 = vpop.f32.mrb[9].mxu0 }
 0x10d   : > { %1142 = vst [vmem:[%s1917_s8 + $0x10] sm:$0xff] %v1115_v60  ;;  %v1384_v0 = vadd.f32 %v1383_v63, %v1382_v59  ;;  %v1483_v1 = vpop.f32.mrb[9].mxu1  ;;  %v1385_v2 = vpop.f32.mrb[10].mxu0 }
 0x10e   : > { %v1116_v3 = vsel %vm1062_vm3, %v961_v58, %v1089_v61  ;;  %v1484_v4 = vadd.f32 %v1483_v1, %v1482_v62  ;;  %v1485_v5 = vpop.f32.mrb[10].mxu1  ;;  %v1386_v6 = vpop.f32.mrb[11].mxu0 }
 0x10f   : > { %1143 = vst [vmem:[%s1917_s8 + $0x18] sm:$0xff] %v1116_v3  ;;  %v1387_v7 = vadd.f32 %v1386_v6, %v1385_v2  ;;  %v1486_v8 = vpop.f32.mrb[11].mxu1 }
 0x110   : > { %v966_v9 = vadd.f32 %v1484_v4, %v1384_v0  ;;  %v1487_v10 = vadd.f32 %v1486_v8, %v1485_v5 }
 0x112   : > { %vm1063_vm4 = vcmp.gt.f32.partialorder %v966_v9, 0.0  ;;  %v1090_v11 = vmul.f32 0.2, %v966_v9  ;;  %v969_v12 = vadd.f32 %v1487_v10, %v1387_v7 }
 0x113   : > { %v1388_v13 = vpop.f32.mrb[12].mxu0 }
 0x114   : > { %v1117_v14 = vsel %vm1063_vm4, %v966_v9, %v1090_v11  ;;  %vm1064_vm5 = vcmp.gt.f32.partialorder %v969_v12, 0.0  ;;  %v1091_v15 = vmul.f32 0.2, %v969_v12  ;;  %v1488_v16 = vpop.f32.mrb[12].mxu1  ;;  %v1389_v17 = vpop.f32.mrb[13].mxu0 }
 0x115   : > { %1144 = vst [vmem:[%s1917_s8 + $0x20] sm:$0xff] %v1117_v14  ;;  %v1390_v18 = vadd.f32 %v1389_v17, %v1388_v13  ;;  %v1489_v19 = vpop.f32.mrb[13].mxu1  ;;  %v1391_v20 = vpop.f32.mrb[14].mxu0 }
 0x116   : > { %v1118_v21 = vsel %vm1064_vm5, %v969_v12, %v1091_v15  ;;  %v1490_v22 = vadd.f32 %v1489_v19, %v1488_v16  ;;  %v1491_v23 = vpop.f32.mrb[14].mxu1  ;;  %v1392_v24 = vpop.f32.mrb[15].mxu0 }
 0x117   : > { %1145 = vst [vmem:[%s1917_s8 + $0x28] sm:$0xff] %v1118_v21  ;;  %v1393_v25 = vadd.f32 %v1392_v24, %v1391_v20  ;;  %v1492_v26 = vpop.f32.mrb[15].mxu1 }
 0x118   : > { %v974_v27 = vadd.f32 %v1490_v22, %v1390_v18  ;;  %v1493_v28 = vadd.f32 %v1492_v26, %v1491_v23 }
 0x11a   : > { %vm1065_vm6 = vcmp.gt.f32.partialorder %v974_v27, 0.0  ;;  %v1092_v29 = vmul.f32 0.2, %v974_v27  ;;  %v977_v30 = vadd.f32 %v1493_v28, %v1393_v25 }
 0x11b   : > { %v1394_v31 = vpop.f32.mrb[16].mxu0 }
 0x11c   : > { %v1119_v32 = vsel %vm1065_vm6, %v974_v27, %v1092_v29  ;;  %vm1066_vm7 = vcmp.gt.f32.partialorder %v977_v30, 0.0  ;;  %v1093_v33 = vmul.f32 0.2, %v977_v30  ;;  %v1494_v34 = vpop.f32.mrb[16].mxu1  ;;  %v1395_v35 = vpop.f32.mrb[17].mxu0 }
 0x11d   : > { %1146 = vst [vmem:[%s1917_s8 + $0x30] sm:$0xff] %v1119_v32  ;;  %v1396_v36 = vadd.f32 %v1395_v35, %v1394_v31  ;;  %v1495_v37 = vpop.f32.mrb[17].mxu1  ;;  %v1397_v38 = vpop.f32.mrb[18].mxu0 }
 0x11e   : > { %v1120_v39 = vsel %vm1066_vm7, %v977_v30, %v1093_v33  ;;  %v1496_v40 = vadd.f32 %v1495_v37, %v1494_v34  ;;  %v1497_v41 = vpop.f32.mrb[18].mxu1  ;;  %v1398_v42 = vpop.f32.mrb[19].mxu0 }
 0x11f   : > { %1147 = vst [vmem:[%s1917_s8 + $0x38] sm:$0xff] %v1120_v39  ;;  %v1399_v43 = vadd.f32 %v1398_v42, %v1397_v38  ;;  %v1498_v44 = vpop.f32.mrb[19].mxu1 }
 0x120   : > { %v982_v45 = vadd.f32 %v1496_v40, %v1396_v36  ;;  %v1499_v46 = vadd.f32 %v1498_v44, %v1497_v41 }
 0x122   : > { %vm1067_vm8 = vcmp.gt.f32.partialorder %v982_v45, 0.0  ;;  %v1094_v47 = vmul.f32 0.2, %v982_v45  ;;  %v985_v48 = vadd.f32 %v1499_v46, %v1399_v43 }
 0x123   : > { %v1400_v49 = vpop.f32.mrb[20].mxu0 }
 0x124   : > { %v1121_v50 = vsel %vm1067_vm8, %v982_v45, %v1094_v47  ;;  %vm1068_vm9 = vcmp.gt.f32.partialorder %v985_v48, 0.0  ;;  %v1095_v51 = vmul.f32 0.2, %v985_v48  ;;  %v1500_v52 = vpop.f32.mrb[20].mxu1  ;;  %v1401_v53 = vpop.f32.mrb[21].mxu0 }
 0x125   : > { %1148 = vst [vmem:[%s1917_s8 + $0x40] sm:$0xff] %v1121_v50  ;;  %v1402_v54 = vadd.f32 %v1401_v53, %v1400_v49  ;;  %v1501_v55 = vpop.f32.mrb[21].mxu1  ;;  %v1403_v56 = vpop.f32.mrb[22].mxu0 }
 0x126   : > { %v1122_v57 = vsel %vm1068_vm9, %v985_v48, %v1095_v51  ;;  %v1502_v58 = vadd.f32 %v1501_v55, %v1500_v52  ;;  %v1503_v59 = vpop.f32.mrb[22].mxu1  ;;  %v1404_v60 = vpop.f32.mrb[23].mxu0 }
 0x127   : > { %1149 = vst [vmem:[%s1917_s8 + $0x48] sm:$0xff] %v1122_v57  ;;  %v1405_v61 = vadd.f32 %v1404_v60, %v1403_v56  ;;  %v1504_v62 = vpop.f32.mrb[23].mxu1 }
 0x128   : > { %v990_v63 = vadd.f32 %v1502_v58, %v1402_v54  ;;  %v1505_v0 = vadd.f32 %v1504_v62, %v1503_v59 }
 0x12a   : > { %vm1069_vm10 = vcmp.gt.f32.partialorder %v990_v63, 0.0  ;;  %v1096_v1 = vmul.f32 0.2, %v990_v63  ;;  %v993_v2 = vadd.f32 %v1505_v0, %v1405_v61 }
 0x12b   : > { %v1406_v3 = vpop.f32.mrb[24].mxu0 }
 0x12c   : > { %v1123_v4 = vsel %vm1069_vm10, %v990_v63, %v1096_v1  ;;  %vm1070_vm11 = vcmp.gt.f32.partialorder %v993_v2, 0.0  ;;  %v1097_v5 = vmul.f32 0.2, %v993_v2  ;;  %v1506_v6 = vpop.f32.mrb[24].mxu1  ;;  %v1407_v7 = vpop.f32.mrb[25].mxu0 }
 0x12d   : > { %1150 = vst [vmem:[%s1917_s8 + $0x50] sm:$0xff] %v1123_v4  ;;  %v1408_v8 = vadd.f32 %v1407_v7, %v1406_v3  ;;  %v1507_v9 = vpop.f32.mrb[25].mxu1  ;;  %v1409_v10 = vpop.f32.mrb[26].mxu0 }
 0x12e   : > { %v1124_v11 = vsel %vm1070_vm11, %v993_v2, %v1097_v5  ;;  %v1508_v12 = vadd.f32 %v1507_v9, %v1506_v6  ;;  %v1509_v13 = vpop.f32.mrb[26].mxu1  ;;  %v1410_v14 = vpop.f32.mrb[27].mxu0 }
 0x12f   : > { %1151 = vst [vmem:[%s1917_s8 + $0x58] sm:$0xff] %v1124_v11  ;;  %v1411_v15 = vadd.f32 %v1410_v14, %v1409_v10  ;;  %v1510_v16 = vpop.f32.mrb[27].mxu1 }
 0x130   : > { %v998_v17 = vadd.f32 %v1508_v12, %v1408_v8  ;;  %v1511_v18 = vadd.f32 %v1510_v16, %v1509_v13 }
 0x132   : > { %vm1071_vm12 = vcmp.gt.f32.partialorder %v998_v17, 0.0  ;;  %v1098_v19 = vmul.f32 0.2, %v998_v17  ;;  %v1001_v20 = vadd.f32 %v1511_v18, %v1411_v15 }
 0x133   : > { %v1412_v21 = vpop.f32.mrb[28].mxu0 }
 0x134   : > { %v1125_v22 = vsel %vm1071_vm12, %v998_v17, %v1098_v19  ;;  %vm1072_vm13 = vcmp.gt.f32.partialorder %v1001_v20, 0.0  ;;  %v1099_v23 = vmul.f32 0.2, %v1001_v20  ;;  %v1512_v24 = vpop.f32.mrb[28].mxu1  ;;  %v1413_v25 = vpop.f32.mrb[29].mxu0 }
 0x135   : > { %1152 = vst [vmem:[%s1917_s8 + $0x60] sm:$0xff] %v1125_v22  ;;  %v1414_v26 = vadd.f32 %v1413_v25, %v1412_v21  ;;  %v1513_v27 = vpop.f32.mrb[29].mxu1  ;;  %v1415_v28 = vpop.f32.mrb[30].mxu0 }
 0x136   : > { %v1126_v29 = vsel %vm1072_vm13, %v1001_v20, %v1099_v23  ;;  %v1514_v30 = vadd.f32 %v1513_v27, %v1512_v24  ;;  %v1515_v31 = vpop.f32.mrb[30].mxu1  ;;  %v1416_v32 = vpop.f32.mrb[31].mxu0 }
 0x137   : > { %1153 = vst [vmem:[%s1917_s8 + $0x68] sm:$0xff] %v1126_v29  ;;  %v1417_v33 = vadd.f32 %v1416_v32, %v1415_v28  ;;  %v1516_v34 = vpop.f32.mrb[31].mxu1 }
 0x138   : > { %v1006_v35 = vadd.f32 %v1514_v30, %v1414_v26  ;;  %v1517_v36 = vadd.f32 %v1516_v34, %v1515_v31 }
 0x13a   : > { %vm1073_vm14 = vcmp.gt.f32.partialorder %v1006_v35, 0.0  ;;  %v1100_v37 = vmul.f32 0.2, %v1006_v35  ;;  %v1009_v38 = vadd.f32 %v1517_v36, %v1417_v33 }
 0x13b   : > { %v1418_v39 = vpop.f32.mrb[32].mxu0 }
 0x13c   : > { %v1127_v40 = vsel %vm1073_vm14, %v1006_v35, %v1100_v37  ;;  %vm1074_vm15 = vcmp.gt.f32.partialorder %v1009_v38, 0.0  ;;  %v1101_v41 = vmul.f32 0.2, %v1009_v38  ;;  %v1518_v42 = vpop.f32.mrb[32].mxu1  ;;  %v1419_v43 = vpop.f32.mrb[33].mxu0 }
 0x13d   : > { %1154 = vst [vmem:[%s1917_s8 + $0x70] sm:$0xff] %v1127_v40  ;;  %v1420_v44 = vadd.f32 %v1419_v43, %v1418_v39  ;;  %v1519_v45 = vpop.f32.mrb[33].mxu1  ;;  %v1421_v46 = vpop.f32.mrb[34].mxu0 }
 0x13e   : > { %v1128_v47 = vsel %vm1074_vm15, %v1009_v38, %v1101_v41  ;;  %v1520_v48 = vadd.f32 %v1519_v45, %v1518_v42  ;;  %v1521_v49 = vpop.f32.mrb[34].mxu1  ;;  %v1422_v50 = vpop.f32.mrb[35].mxu0 }
 0x13f   : > { %1155 = vst [vmem:[%s1917_s8 + $0x78] sm:$0xff] %v1128_v47  ;;  %v1423_v51 = vadd.f32 %v1422_v50, %v1421_v46  ;;  %v1522_v52 = vpop.f32.mrb[35].mxu1 }
 0x140   : > { %v1014_v53 = vadd.f32 %v1520_v48, %v1420_v44  ;;  %v1523_v54 = vadd.f32 %v1522_v52, %v1521_v49 }
 0x142   : > { %vm1075_vm0 = vcmp.gt.f32.partialorder %v1014_v53, 0.0  ;;  %v1102_v55 = vmul.f32 0.2, %v1014_v53  ;;  %v1017_v56 = vadd.f32 %v1523_v54, %v1423_v51 }
 0x143   : > { %v1424_v57 = vpop.f32.mrb[36].mxu0 }
 0x144   : > { %v1129_v58 = vsel %vm1075_vm0, %v1014_v53, %v1102_v55  ;;  %vm1076_vm1 = vcmp.gt.f32.partialorder %v1017_v56, 0.0  ;;  %v1103_v59 = vmul.f32 0.2, %v1017_v56  ;;  %v1524_v60 = vpop.f32.mrb[36].mxu1  ;;  %v1425_v61 = vpop.f32.mrb[37].mxu0 }
 0x145   : > { %1156 = vst [vmem:[%s1917_s8 + $0x80] sm:$0xff] %v1129_v58  ;;  %v1426_v62 = vadd.f32 %v1425_v61, %v1424_v57  ;;  %v1525_v63 = vpop.f32.mrb[37].mxu1  ;;  %v1427_v0 = vpop.f32.mrb[38].mxu0 }
 0x146   : > { %v1130_v1 = vsel %vm1076_vm1, %v1017_v56, %v1103_v59  ;;  %v1526_v2 = vadd.f32 %v1525_v63, %v1524_v60  ;;  %v1527_v3 = vpop.f32.mrb[38].mxu1  ;;  %v1428_v4 = vpop.f32.mrb[39].mxu0 }
 0x147   : > { %1157 = vst [vmem:[%s1917_s8 + $0x88] sm:$0xff] %v1130_v1  ;;  %v1429_v5 = vadd.f32 %v1428_v4, %v1427_v0  ;;  %v1528_v6 = vpop.f32.mrb[39].mxu1 }
 0x148   : > { %v1022_v7 = vadd.f32 %v1526_v2, %v1426_v62  ;;  %v1529_v8 = vadd.f32 %v1528_v6, %v1527_v3 }
 0x14a   : > { %vm1077_vm2 = vcmp.gt.f32.partialorder %v1022_v7, 0.0  ;;  %v1104_v9 = vmul.f32 0.2, %v1022_v7  ;;  %v1025_v10 = vadd.f32 %v1529_v8, %v1429_v5 }
 0x14b   : > { %v1430_v11 = vpop.f32.mrb[40].mxu0 }
 0x14c   : > { %v1131_v12 = vsel %vm1077_vm2, %v1022_v7, %v1104_v9  ;;  %vm1078_vm3 = vcmp.gt.f32.partialorder %v1025_v10, 0.0  ;;  %v1105_v13 = vmul.f32 0.2, %v1025_v10  ;;  %v1530_v14 = vpop.f32.mrb[40].mxu1  ;;  %v1431_v15 = vpop.f32.mrb[41].mxu0 }
 0x14d   : > { %1158 = vst [vmem:[%s1917_s8 + $0x90] sm:$0xff] %v1131_v12  ;;  %v1432_v16 = vadd.f32 %v1431_v15, %v1430_v11  ;;  %v1531_v17 = vpop.f32.mrb[41].mxu1  ;;  %v1433_v18 = vpop.f32.mrb[42].mxu0 }
 0x14e   : > { %v1132_v19 = vsel %vm1078_vm3, %v1025_v10, %v1105_v13  ;;  %v1532_v20 = vadd.f32 %v1531_v17, %v1530_v14  ;;  %v1533_v21 = vpop.f32.mrb[42].mxu1  ;;  %v1434_v22 = vpop.f32.mrb[43].mxu0 }
 0x14f   : > { %1159 = vst [vmem:[%s1917_s8 + $0x98] sm:$0xff] %v1132_v19  ;;  %v1435_v23 = vadd.f32 %v1434_v22, %v1433_v18  ;;  %v1534_v24 = vpop.f32.mrb[43].mxu1 }
 0x150   : > { %v1030_v25 = vadd.f32 %v1532_v20, %v1432_v16  ;;  %v1535_v26 = vadd.f32 %v1534_v24, %v1533_v21 }
 0x152   : > { %vm1079_vm4 = vcmp.gt.f32.partialorder %v1030_v25, 0.0  ;;  %v1106_v27 = vmul.f32 0.2, %v1030_v25  ;;  %v1033_v28 = vadd.f32 %v1535_v26, %v1435_v23 }
 0x153   : > { %v1436_v29 = vpop.f32.mrb[44].mxu0 }
 0x154   : > { %v1133_v30 = vsel %vm1079_vm4, %v1030_v25, %v1106_v27  ;;  %vm1080_vm5 = vcmp.gt.f32.partialorder %v1033_v28, 0.0  ;;  %v1107_v31 = vmul.f32 0.2, %v1033_v28  ;;  %v1536_v32 = vpop.f32.mrb[44].mxu1  ;;  %v1437_v33 = vpop.f32.mrb[45].mxu0 }
 0x155   : > { %1160 = vst [vmem:[%s1917_s8 + $0xa0] sm:$0xff] %v1133_v30  ;;  %v1438_v34 = vadd.f32 %v1437_v33, %v1436_v29  ;;  %v1537_v35 = vpop.f32.mrb[45].mxu1  ;;  %v1439_v36 = vpop.f32.mrb[46].mxu0 }
 0x156   : > { %v1134_v37 = vsel %vm1080_vm5, %v1033_v28, %v1107_v31  ;;  %v1538_v38 = vadd.f32 %v1537_v35, %v1536_v32  ;;  %v1539_v39 = vpop.f32.mrb[46].mxu1  ;;  %v1440_v40 = vpop.f32.mrb[47].mxu0 }
 0x157   : > { %1161 = vst [vmem:[%s1917_s8 + $0xa8] sm:$0xff] %v1134_v37  ;;  %v1441_v41 = vadd.f32 %v1440_v40, %v1439_v36  ;;  %v1540_v42 = vpop.f32.mrb[47].mxu1 }
 0x158   : > { %v1038_v43 = vadd.f32 %v1538_v38, %v1438_v34  ;;  %v1541_v44 = vadd.f32 %v1540_v42, %v1539_v39 }
 0x15a   : > { %vm1081_vm6 = vcmp.gt.f32.partialorder %v1038_v43, 0.0  ;;  %v1108_v45 = vmul.f32 0.2, %v1038_v43  ;;  %v1041_v46 = vadd.f32 %v1541_v44, %v1441_v41 }
 0x15b   : > { %v1442_v47 = vpop.f32.mrb[48].mxu0 }
 0x15c   : > { %v1135_v48 = vsel %vm1081_vm6, %v1038_v43, %v1108_v45  ;;  %vm1082_vm7 = vcmp.gt.f32.partialorder %v1041_v46, 0.0  ;;  %v1109_v49 = vmul.f32 0.2, %v1041_v46  ;;  %v1542_v50 = vpop.f32.mrb[48].mxu1  ;;  %v1443_v51 = vpop.f32.mrb[49].mxu0 }
 0x15d   : > { %1162 = vst [vmem:[%s1917_s8 + $0xb0] sm:$0xff] %v1135_v48  ;;  %v1444_v52 = vadd.f32 %v1443_v51, %v1442_v47  ;;  %v1543_v53 = vpop.f32.mrb[49].mxu1  ;;  %v1445_v54 = vpop.f32.mrb[50].mxu0 }
 0x15e   : > { %v1136_v55 = vsel %vm1082_vm7, %v1041_v46, %v1109_v49  ;;  %v1544_v56 = vadd.f32 %v1543_v53, %v1542_v50  ;;  %v1545_v57 = vpop.f32.mrb[50].mxu1  ;;  %v1446_v58 = vpop.f32.mrb[51].mxu0 }
 0x15f   : > { %1163 = vst [vmem:[%s1917_s8 + $0xb8] sm:$0xff] %v1136_v55  ;;  %v1447_v59 = vadd.f32 %v1446_v58, %v1445_v54  ;;  %v1546_v60 = vpop.f32.mrb[51].mxu1 }
 0x160   : > { %v1046_v61 = vadd.f32 %v1544_v56, %v1444_v52  ;;  %v1547_v62 = vadd.f32 %v1546_v60, %v1545_v57 }
 0x162   : > { %vm1083_vm8 = vcmp.gt.f32.partialorder %v1046_v61, 0.0  ;;  %v1110_v63 = vmul.f32 0.2, %v1046_v61  ;;  %v1049_v0 = vadd.f32 %v1547_v62, %v1447_v59 }
 0x163   : > { %v1448_v1 = vpop.f32.mrb[52].mxu0 }
 0x164   : > { %v1137_v2 = vsel %vm1083_vm8, %v1046_v61, %v1110_v63  ;;  %vm1084_vm9 = vcmp.gt.f32.partialorder %v1049_v0, 0.0  ;;  %v1111_v3 = vmul.f32 0.2, %v1049_v0  ;;  %v1548_v4 = vpop.f32.mrb[52].mxu1  ;;  %v1449_v5 = vpop.f32.mrb[53].mxu0 }
 0x165   : > { %1164 = vst [vmem:[%s1917_s8 + $0xc0] sm:$0xff] %v1137_v2  ;;  %v1450_v6 = vadd.f32 %v1449_v5, %v1448_v1  ;;  %v1549_v7 = vpop.f32.mrb[53].mxu1  ;;  %v1451_v8 = vpop.f32.mrb[54].mxu0 }
 0x166   : > { %v1138_v9 = vsel %vm1084_vm9, %v1049_v0, %v1111_v3  ;;  %v1550_v10 = vadd.f32 %v1549_v7, %v1548_v4  ;;  %v1551_v11 = vpop.f32.mrb[54].mxu1  ;;  %v1452_v12 = vpop.f32.mrb[55].mxu0 }
 0x167   : > { %1165 = vst [vmem:[%s1917_s8 + $0xc8] sm:$0xff] %v1138_v9  ;;  %v1552_v13 = vpop.f32.mrb[55].mxu1 }
 0x168   : > { %v1054_v14 = vadd.f32 %v1550_v10, %v1450_v6 }
 0x16a   : > { %vm1085_vm10 = vcmp.gt.f32.partialorder %v1054_v14, 0.0  ;;  %v1112_v15 = vmul.f32 0.2, %v1054_v14 }
 0x16c   : > { %v1139_v16 = vsel %vm1085_vm10, %v1054_v14, %v1112_v15 }
 0x16d   : > { %1166 = vst [vmem:[%s1917_s8 + $0xd0] sm:$0xff] %v1139_v16 }
 0x16e PF: > { %s12_s11 = sadd.s32 1, %s1716_s11   ;;  %s1958_s9 = smov %s1712_s10 }
 0x16f   : > { %p9_p5 = scmp.ge.s32.totalorder %s12_s11, 4   ;;  %s1959_s10 = smov %s1961_s12 }
 0x171   :  { %11 = sbr.rel (!%p9_p5) target bundleno = 2 (0x2), region = 58 }

// kernel: d_net3d_forward.7
= control target key start
LH: loop header
LB: loop body
LE: loop exit
PB: predicated region body
PF: predicated region fallthrough
CT: control target
= control target key end

     0   :  { %s1429_s9 = smov 0   ;;  %s1431_s10 = smov 0   ;;  %s1686_s0 = inlined_call_operand.vmem [shape: bf16[2,32,1024], index: 0, kind: input, shape index: {}]   ;;  %s1687_s1 = inlined_call_operand.vmem [shape: bf16[1024,128], index: 1, kind: input, shape index: {}]   ;;  %s1688_s2 = inlined_call_operand.vmem [shape: f32[2,32,128], index: 2, kind: output, shape index: {}]  }
   0x1   :  { %s1433_s11 = smov 0  }
   0x2 LB: > { %s24_s12 = sadd.s32 1, %s1408_s10  ;;  %p1101_p0 = scmp.ge.s32.totalorder %s1412_s11, 1  ;;  %s1412_s11 = sphi %s1433_s11, %s12_s11   ;;  %s1408_s10 = sphi %s1431_s10, %s1690_s10   ;;  %s1404_s9 = sphi %s1429_s9, %s1689_s9  }
   0x3   : > { %p26_p1 = scmp.ge.s32.totalorder %s24_s12, 2  ;;  %p134_p2 = scmp.lt.s32.totalorder %s1412_s11, 3 }
   0x5   : > { %s1692_s12 = smov (%p26_p1, %s24_s12), 0  ;;  %p135_p3 = pnand %p1101_p0, %p134_p2 }
   0x6   : > { %v1326_v0 = vld [vmem:[%s1687_s1 + $0x40] sm:$0xff] (!%p135_p3)   ;;  %v1330_v4 = vld [vmem:[%s1687_s1 + $0x48] sm:$0xff] (!%p135_p3)   ;;  %v1334_v8 = vld [vmem:[%s1687_s1 + $0x50] sm:$0xff] (!%p135_p3)   ;;  %p166_p4 = scmp.lt.s32.totalorder (!%p135_p3), %s1404_s9, 1 }
   0x7   : > { %138 = sbr.rel (%p135_p3) target bundleno = 305 (0x131), region = 28  ;;  %v1327_v1 = vld [vmem:[%s1687_s1 + $0xc0] sm:$0xff] (!%p135_p3)   ;;  %1190 = vmatprep.subr.bf16.mxu0 (!%p135_p3), %v1326_v0  ;;  %v1331_v5 = vld [vmem:[%s1687_s1 + $0xc8] sm:$0xff] (!%p135_p3)   ;;  %v1335_v9 = vld [vmem:[%s1687_s1 + $0xd0] sm:$0xff] (!%p135_p3)  }
   0x8   : > { %v1328_v2 = vld [vmem:[%s1687_s1] sm:$0xff] (!%p135_p3)   ;;  %1218 = vmatprep.subr.bf16.mxu1 (!%p135_p3), %v1327_v1  ;;  %v1332_v6 = vld [vmem:[%s1687_s1 + $0x8] sm:$0xff] (!%p135_p3)   ;;  %v1336_v10 = vld [vmem:[%s1687_s1 + $0x10] sm:$0xff] (!%p135_p3)  }
   0x9   : > { %v1329_v3 = vld [vmem:[%s1687_s1 + $0x80] sm:$0xff] (!%p135_p3)   ;;  %1191 = vmatpush3.bf16.msra.mxu0 (!%p135_p3), %v1328_v2  ;;  %v1333_v7 = vld [vmem:[%s1687_s1 + $0x88] sm:$0xff] (!%p135_p3)   ;;  %v1337_v11 = vld [vmem:[%s1687_s1 + $0x90] sm:$0xff] (!%p135_p3)  }
   0xa   : > { %1219 = vmatpush3.bf16.msra.mxu1 (!%p135_p3), %v1329_v3  ;;  %1192 = vmatprep.subr.bf16.mxu0 (!%p135_p3), %v1330_v4  ;;  %v1338_v12 = vld [vmem:[%s1687_s1 + $0x58] sm:$0xff] (!%p135_p3)   ;;  %v1342_v16 = vld [vmem:[%s1687_s1 + $0x60] sm:$0xff] (!%p135_p3)   ;;  %v1346_v20 = vld [vmem:[%s1687_s1 + $0x68] sm:$0xff] (!%p135_p3)  }
   0xb   : > { %1220 = vmatprep.subr.bf16.mxu1 (!%p135_p3), %v1331_v5  ;;  %v1339_v13 = vld [vmem:[%s1687_s1 + $0xd8] sm:$0xff] (!%p135_p3)   ;;  %v1343_v17 = vld [vmem:[%s1687_s1 + $0xe0] sm:$0xff] (!%p135_p3)   ;;  %v1347_v21 = vld [vmem:[%s1687_s1 + $0xe8] sm:$0xff] (!%p135_p3)  }
   0xc   : > { %v1340_v14 = vld [vmem:[%s1687_s1 + $0x18] sm:$0xff] (!%p135_p3)   ;;  %v1344_v18 = vld [vmem:[%s1687_s1 + $0x20] sm:$0xff] (!%p135_p3)   ;;  %v1348_v22 = vld [vmem:[%s1687_s1 + $0x28] sm:$0xff] (!%p135_p3)  }
   0xd   : > { %1193 = vmatpush3.bf16.msra.mxu0 (!%p135_p3), %v1332_v6  ;;  %v1341_v15 = vld [vmem:[%s1687_s1 + $0x98] sm:$0xff] (!%p135_p3)   ;;  %v1345_v19 = vld [vmem:[%s1687_s1 + $0xa0] sm:$0xff] (!%p135_p3)   ;;  %v1349_v23 = vld [vmem:[%s1687_s1 + $0xa8] sm:$0xff] (!%p135_p3)  }
   0xe   : > { %1221 = vmatpush3.bf16.msra.mxu1 %v1333_v7  ;;  %1194 = vmatprep.subr.bf16.mxu0 %v1334_v8  ;;  %s1694_s9 = smov (!%p166_p4, %s1404_s9), 1  ;;  %v1350_v24 = vld [vmem:[%s1687_s1 + $0x70] sm:$0xff]   ;;  %v1354_v28 = vld [vmem:[%s1687_s1 + $0x78] sm:$0xff]   ;;  %v1358_v40 = vld [vmem:[%s1687_s1 + $0x140] sm:$0xff]  }
   0xf   : > { %1222 = vmatprep.subr.bf16.mxu1 %v1335_v9  ;;  %v1351_v25 = vld [vmem:[%s1687_s1 + $0xf0] sm:$0xff]   ;;  %s1188_s19 = sshll.u32 %s1694_s9, 7  ;;  %v1355_v29 = vld [vmem:[%s1687_s1 + $0xf8] sm:$0xff]   ;;  %v1359_v41 = vld [vmem:[%s1687_s1 + $0x1c0] sm:$0xff]  }
  0x10   : > { %v1352_v26 = vld [vmem:[%s1687_s1 + $0x30] sm:$0xff]   ;;  %s1547_s28 = scalar_lea.vmem %s1686_s0, %s1188_s19  ;;  %v1356_v30 = vld [vmem:[%s1687_s1 + $0x38] sm:$0xff]   ;;  %v1360_v42 = vld [vmem:[%s1687_s1 + $0x100] sm:$0xff]  }
  0x11   : > { %1195 = vmatpush3.bf16.msra.mxu0 %v1336_v10  ;;  %v1353_v27 = vld [vmem:[%s1687_s1 + $0xb0] sm:$0xff]   ;;  %v1357_v31 = vld [vmem:[%s1687_s1 + $0xb8] sm:$0xff]   ;;  %v187_v32 = vld [vmem:[%s1547_s28] sm:$0xff] }
  0x12   : > { %1223 = vmatpush3.bf16.msra.mxu1 %v1337_v11  ;;  %1196 = vmatprep.subr.bf16.mxu0 %v1338_v12  ;;  %v191_v33 = vld [vmem:[%s1547_s28 + $0x20] sm:$0xff]  ;;  %v188_v34 = vld [vmem:[%s1547_s28 + $0x8] sm:$0xff]  ;;  %v1366_v48 = vld [vmem:[%s1687_s1 + $0x150] sm:$0xff]  }
  0x13   : > { %1224 = vmatprep.subr.bf16.mxu1 %v1339_v13  ;;  %v1106_v35 = vcombine.low %v187_v32, %v191_v33  ;;  %v1107_v36 = vcombine.high %v187_v32, %v191_v33  ;;  %v192_v37 = vld [vmem:[%s1547_s28 + $0x28] sm:$0xff]  ;;  %v1361_v43 = vld [vmem:[%s1687_s1 + $0x180] sm:$0xff]   ;;  %v1367_v49 = vld [vmem:[%s1687_s1 + $0x1d0] sm:$0xff]  }
  0x14   : > { %v1108_v38 = vcombine.low %v188_v34, %v192_v37  ;;  %v1109_v39 = vcombine.high %v188_v34, %v192_v37  ;;  %v1362_v44 = vld [vmem:[%s1687_s1 + $0x148] sm:$0xff]   ;;  %v1368_v50 = vld [vmem:[%s1687_s1 + $0x110] sm:$0xff]   ;;  %v1370_v52 = vld [vmem:[%s1687_s1 + $0x158] sm:$0xff]  }
  0x15   : > { %1197 = vmatpush3.bf16.msra.mxu0 %v1340_v14  ;;  %827 = vmatprep.mubr.bf16.mxu0 %v1107_v36  ;;  %v1363_v45 = vld [vmem:[%s1687_s1 + $0x1c8] sm:$0xff]   ;;  %v1369_v51 = vld [vmem:[%s1687_s1 + $0x190] sm:$0xff]   ;;  %v1371_v53 = vld [vmem:[%s1687_s1 + $0x1d8] sm:$0xff]  }
  0x16   : > { %1225 = vmatpush3.bf16.msra.mxu1 %v1341_v15  ;;  %1198 = vmatprep.subr.bf16.mxu0 %v1342_v16  ;;  %v1364_v46 = vld [vmem:[%s1687_s1 + $0x108] sm:$0xff]   ;;  %v1372_v54 = vld [vmem:[%s1687_s1 + $0x118] sm:$0xff]   ;;  %v1374_v56 = vld [vmem:[%s1687_s1 + $0x160] sm:$0xff]  }
  0x17   : > { %1226 = vmatprep.subr.bf16.mxu1 %v1343_v17  ;;  %876 = vmatprep.mubr.bf16.mxu1 %v1109_v39  ;;  %v1365_v47 = vld [vmem:[%s1687_s1 + $0x188] sm:$0xff]   ;;  %v1373_v55 = vld [vmem:[%s1687_s1 + $0x198] sm:$0xff]   ;;  %v1375_v57 = vld [vmem:[%s1687_s1 + $0x1e0] sm:$0xff]  }
  0x18   : > { %v1376_v58 = vld [vmem:[%s1687_s1 + $0x120] sm:$0xff]   ;;  %v196_v63 = vld [vmem:[%s1547_s28 + $0x48] sm:$0xff]  ;;  %v1382_v8 = vld [vmem:[%s1687_s1 + $0x170] sm:$0xff]  }
  0x19   : > { %1199 = vmatpush3.bf16.msra.mxu0 %v1344_v18  ;;  %v1377_v59 = vld [vmem:[%s1687_s1 + $0x1a0] sm:$0xff]   ;;  %v200_v0 = vld [vmem:[%s1547_s28 + $0x68] sm:$0xff]  ;;  %v1383_v9 = vld [vmem:[%s1687_s1 + $0x1f0] sm:$0xff]  }
  0x1a   : > { %1227 = vmatpush3.bf16.msra.mxu1 %v1345_v19  ;;  %1200 = vmatprep.subr.bf16.mxu0 %v1346_v20  ;;  %v195_v60 = vld [vmem:[%s1547_s28 + $0x40] sm:$0xff]  ;;  %v1117_v2 = vcombine.high %v196_v63, %v200_v0  ;;  %v1378_v3 = vld [vmem:[%s1687_s1 + $0x168] sm:$0xff]   ;;  %v1116_v4 = vcombine.low %v196_v63, %v200_v0  ;;  %v1384_v10 = vld [vmem:[%s1687_s1 + $0x130] sm:$0xff]  }
  0x1b   : > { %1228 = vmatprep.subr.bf16.mxu1 %v1347_v21  ;;  %v199_v61 = vld [vmem:[%s1547_s28 + $0x60] sm:$0xff]  ;;  %v1379_v5 = vld [vmem:[%s1687_s1 + $0x1e8] sm:$0xff]   ;;  %v1385_v11 = vld [vmem:[%s1687_s1 + $0x1b0] sm:$0xff]  }
  0x1c   : > { %v1115_v62 = vcombine.high %v195_v60, %v199_v61  ;;  %v1114_v1 = vcombine.low %v195_v60, %v199_v61  ;;  %v1380_v6 = vld [vmem:[%s1687_s1 + $0x128] sm:$0xff]   ;;  %v1386_v12 = vld [vmem:[%s1687_s1 + $0x178] sm:$0xff]   ;;  %v189_v16 = vld [vmem:[%s1547_s28 + $0x10] sm:$0xff] }
  0x1d   : > { %1201 = vmatpush3.bf16.msra.mxu0 %v1348_v22  ;;  %v1381_v7 = vld [vmem:[%s1687_s1 + $0x1a8] sm:$0xff]   ;;  %v1387_v13 = vld [vmem:[%s1687_s1 + $0x1f8] sm:$0xff]   ;;  %v193_v17 = vld [vmem:[%s1547_s28 + $0x30] sm:$0xff] }
  0x1e   : > { %1229 = vmatpush3.bf16.msra.mxu1 %v1349_v23  ;;  %1202 = vmatprep.subr.bf16.mxu0 %v1350_v24  ;;  %v1388_v14 = vld [vmem:[%s1687_s1 + $0x138] sm:$0xff]   ;;  %v1110_v20 = vcombine.low %v189_v16, %v193_v17  ;;  %v1111_v21 = vcombine.high %v189_v16, %v193_v17  ;;  %v197_v24 = vld [vmem:[%s1547_s28 + $0x50] sm:$0xff] }
  0x1f   : > { %1230 = vmatprep.subr.bf16.mxu1 %v1351_v25  ;;  %v1389_v15 = vld [vmem:[%s1687_s1 + $0x1b8] sm:$0xff]   ;;  %v201_v25 = vld [vmem:[%s1547_s28 + $0x70] sm:$0xff] }
  0x20   : > { %v190_v18 = vld [vmem:[%s1547_s28 + $0x18] sm:$0xff] }
  0x21   : > { %1203 = vmatpush3.bf16.msra.mxu0 %v1352_v26  ;;  %v194_v19 = vld [vmem:[%s1547_s28 + $0x38] sm:$0xff] }
  0x22   : > { %1231 = vmatpush3.bf16.msra.mxu1 %v1353_v27  ;;  %1204 = vmatprep.subr.bf16.mxu0 %v1354_v28  ;;  %v1112_v22 = vcombine.low %v190_v18, %v194_v19  ;;  %v1113_v23 = vcombine.high %v190_v18, %v194_v19  ;;  %v198_v26 = vld [vmem:[%s1547_s28 + $0x58] sm:$0xff]  ;;  %v1119_v27 = vcombine.high %v197_v24, %v201_v25 }
  0x23   : > { %1232 = vmatprep.subr.bf16.mxu1 %v1355_v29  ;;  %v202_v28 = vld [vmem:[%s1547_s28 + $0x78] sm:$0xff]  ;;  %s1189_s28 = sshll.u32 %s1694_s9, 5 }
  0x24   : > { %v1121_v29 = vcombine.high %v198_v26, %v202_v28  ;;  %s1671_s30 = scalar_lea.vmem %s1688_s2, %s1189_s28 }
  0x25   : > { %1205 = vmatpush3.bf16.msra.mxu0 %v1356_v30  ;;  %v1118_v30 = vcombine.low %v197_v24, %v201_v25 }
  0x26   : > { %1233 = vmatpush3.bf16.msra.mxu1 %v1357_v31  ;;  %1246 = vmatprep.subr.bf16.mxu0 %v1358_v40  ;;  %v1120_v31 = vcombine.low %v198_v26, %v202_v28 }
  0x27   : > { %1274 = vmatprep.subr.bf16.mxu1 %v1359_v41 }
  0x28   : > { %828 = vmatmul.mubr.bf16.vlgmr.msra.gmra.mrb[0].mxu0 %v1106_v35 }
  0x29   : > { %877 = vmatmul.mubr.bf16.vlgmr.msra.gmra.mrb[0].mxu1 %v1108_v38  ;;  %1247 = vmatpush3.bf16.msra.mxu0 %v1360_v42 }
  0x2a   : > { %1275 = vmatpush3.bf16.msra.mxu1 %v1361_v43  ;;  %1248 = vmatprep.subr.bf16.mxu0 %v1362_v44 }
  0x2b   : > { %1276 = vmatprep.subr.bf16.mxu1 %v1363_v45  ;;  %835 = vmatprep.mubr.bf16.mxu0 %v1115_v62 }
  0x2c   : > { %884 = vmatprep.mubr.bf16.mxu1 %v1117_v2 }
  0x2d   : > { %1249 = vmatpush3.bf16.msra.mxu0 %v1364_v46 }
  0x2e   : > { %1277 = vmatpush3.bf16.msra.mxu1 %v1365_v47  ;;  %1250 = vmatprep.subr.bf16.mxu0 %v1366_v48 }
  0x2f   : > { %1278 = vmatprep.subr.bf16.mxu1 %v1367_v49 }
  0x30   : > { %836 = vmatmul.mubr.bf16.gmra.mrb[4].mxu0 %v1114_v1 }
  0x31   : > { %1251 = vmatpush3.bf16.msra.mxu0 %v1368_v50  ;;  %885 = vmatmul.mubr.bf16.gmra.mrb[4].mxu1 %v1116_v4 }
  0x32   : > { %1279 = vmatpush3.bf16.msra.mxu1 %v1369_v51  ;;  %1252 = vmatprep.subr.bf16.mxu0 %v1370_v52 }
  0x33   : > { %1280 = vmatprep.subr.bf16.mxu1 %v1371_v53  ;;  %925 = vmatprep.mubr.bf16.mxu0 %v1111_v21 }
  0x34   : > { %974 = vmatprep.mubr.bf16.mxu1 %v1113_v23 }
  0x35   : > { %1253 = vmatpush3.bf16.msra.mxu0 %v1372_v54 }
  0x36   : > { %1281 = vmatpush3.bf16.msra.mxu1 %v1373_v55  ;;  %1254 = vmatprep.subr.bf16.mxu0 %v1374_v56 }
  0x37   : > { %1282 = vmatprep.subr.bf16.mxu1 %v1375_v57 }
  0x39   : > { %1255 = vmatpush3.bf16.msra.mxu0 %v1376_v58 }
  0x3a   : > { %1283 = vmatpush3.bf16.msra.mxu1 %v1377_v59  ;;  %1256 = vmatprep.subr.bf16.mxu0 %v1378_v3 }
  0x3b   : > { %1284 = vmatprep.subr.bf16.mxu1 %v1379_v5 }
  0x3d   : > { %1257 = vmatpush3.bf16.msra.mxu0 %v1380_v6 }
  0x3e   : > { %1285 = vmatpush3.bf16.msra.mxu1 %v1381_v7  ;;  %1258 = vmatprep.subr.bf16.mxu0 %v1382_v8 }
  0x3f   : > { %1286 = vmatprep.subr.bf16.mxu1 %v1383_v9 }
  0x41   : > { %1259 = vmatpush3.bf16.msra.mxu0 %v1384_v10 }
  0x42   : > { %1287 = vmatpush3.bf16.msra.mxu1 %v1385_v11  ;;  %1260 = vmatprep.subr.bf16.mxu0 %v1386_v12 }
  0x43   : > { %1288 = vmatprep.subr.bf16.mxu1 %v1387_v13 }
  0x45   : > { %1261 = vmatpush3.bf16.msra.mxu0 %v1388_v14 }
  0x46   : > { %1289 = vmatpush3.bf16.msra.mxu1 %v1389_v15 }
  0x48   : > { %926 = vmatmul.mubr.bf16.vlgmr.msra.gmra.mrb[8].mxu0 %v1110_v20 }
  0x49   : > { %975 = vmatmul.mubr.bf16.vlgmr.msra.gmra.mrb[8].mxu1 %v1112_v22  ;;  %933 = vmatprep.mubr.bf16.mxu0 %v1119_v27 }
  0x4a   : > { %982 = vmatprep.mubr.bf16.mxu1 %v1121_v29 }
  0x50   : > { %934 = vmatmul.mubr.bf16.gmra.mrb[12].mxu0 %v1118_v30 }
  0x51   : > { %983 = vmatmul.mubr.bf16.gmra.mrb[12].mxu1 %v1120_v31 }
  0xfb   : > { %v1206_v32 = vpop.f32.mrb[0].mxu0 }
  0xfc   : > { %v1234_v33 = vpop.f32.mrb[0].mxu1  ;;  %v1207_v34 = vpop.f32.mrb[1].mxu0 }
  0xfd   : > { %v1208_v35 = vadd.f32 %v1207_v34, %v1206_v32  ;;  %v1235_v36 = vpop.f32.mrb[1].mxu1  ;;  %v1209_v37 = vpop.f32.mrb[2].mxu0 }
  0xfe   : > { %v1236_v38 = vadd.f32 %v1235_v36, %v1234_v33  ;;  %v1237_v39 = vpop.f32.mrb[2].mxu1  ;;  %v1210_v40 = vpop.f32.mrb[3].mxu0 }
  0xff   : > { %v1211_v41 = vadd.f32 %v1210_v40, %v1209_v37  ;;  %v1238_v42 = vpop.f32.mrb[3].mxu1 }
 0x100   : > { %v879_v43 = vadd.f32 %v1236_v38, %v1208_v35  ;;  %v1239_v44 = vadd.f32 %v1238_v42, %v1237_v39 }
 0x102   : > { %v882_v45 = vadd.f32 %v1239_v44, %v1211_v41 }
 0x103   : > { %v1212_v46 = vpop.f32.mrb[4].mxu0 }
 0x104   : > { %v1240_v47 = vpop.f32.mrb[4].mxu1  ;;  %v1213_v48 = vpop.f32.mrb[5].mxu0 }
 0x105   : > { %v1214_v49 = vadd.f32 %v1213_v48, %v1212_v46  ;;  %v1241_v50 = vpop.f32.mrb[5].mxu1  ;;  %v1215_v51 = vpop.f32.mrb[6].mxu0 }
 0x106   : > { %v1242_v52 = vadd.f32 %v1241_v50, %v1240_v47  ;;  %v1243_v53 = vpop.f32.mrb[6].mxu1  ;;  %v1216_v54 = vpop.f32.mrb[7].mxu0 }
 0x107   : > { %v1217_v55 = vadd.f32 %v1216_v54, %v1215_v51  ;;  %v1244_v56 = vpop.f32.mrb[7].mxu1 }
 0x108   : > { %v887_v57 = vadd.f32 %v1242_v52, %v1214_v49  ;;  %v1245_v58 = vadd.f32 %v1244_v56, %v1243_v53 }
 0x10a   : > { %v890_v59 = vadd.f32 %v1245_v58, %v1217_v55 }
 0x11b   : > { %v1262_v60 = vpop.f32.mrb[8].mxu0 }
 0x11c   : > { %v1290_v61 = vpop.f32.mrb[8].mxu1  ;;  %v1263_v62 = vpop.f32.mrb[9].mxu0 }
 0x11d   : > { %v1291_v63 = vpop.f32.mrb[9].mxu1  ;;  %v1264_v0 = vadd.f32 %v1263_v62, %v1262_v60  ;;  %v1265_v2 = vpop.f32.mrb[10].mxu0 }
 0x11e   : > { %v1292_v1 = vadd.f32 %v1291_v63, %v1290_v61  ;;  %v1293_v3 = vpop.f32.mrb[10].mxu1  ;;  %v1266_v4 = vpop.f32.mrb[11].mxu0 }
 0x11f   : > { %v1294_v5 = vpop.f32.mrb[11].mxu1  ;;  %v928_v6 = vadd.f32 %v1264_v0, %v879_v43  ;;  %v1267_v7 = vadd.f32 %v1266_v4, %v1265_v2 }
 0x120   : > { %v1295_v8 = vadd.f32 %v1294_v5, %v1293_v3 }
 0x121   : > { %v977_v9 = vadd.f32 %v1292_v1, %v928_v6  ;;  %v931_v10 = vadd.f32 %v1267_v7, %v882_v45 }
 0x123   : > { %vm991_vm0 = vcmp.gt.f32.partialorder %v977_v9, 0.0  ;;  %v995_v11 = vmul.f32 0.2, %v977_v9  ;;  %v980_v12 = vadd.f32 %v1295_v8, %v931_v10  ;;  %v1268_v13 = vpop.f32.mrb[12].mxu0 }
 0x124   : > { %v1296_v14 = vpop.f32.mrb[12].mxu1  ;;  %v1269_v15 = vpop.f32.mrb[13].mxu0 }
 0x125   : > { %v1297_v16 = vpop.f32.mrb[13].mxu1  ;;  %v999_v17 = vsel %vm991_vm0, %v977_v9, %v995_v11  ;;  %vm992_vm1 = vcmp.gt.f32.partialorder %v980_v12, 0.0  ;;  %v996_v18 = vmul.f32 0.2, %v980_v12  ;;  %v1270_v19 = vadd.f32 %v1269_v15, %v1268_v13  ;;  %v1271_v20 = vpop.f32.mrb[14].mxu0 }
 0x126   : > { %v1299_v21 = vpop.f32.mrb[14].mxu1  ;;  %1003 = vst [vmem:[%s1671_s30] sm:$0xff] %v999_v17  ;;  %v1298_v22 = vadd.f32 %v1297_v16, %v1296_v14  ;;  %v1272_v23 = vpop.f32.mrb[15].mxu0 }
 0x127   : > { %v1300_v24 = vpop.f32.mrb[15].mxu1  ;;  %v1000_v25 = vsel %vm992_vm1, %v980_v12, %v996_v18  ;;  %v936_v26 = vadd.f32 %v1270_v19, %v887_v57  ;;  %v1273_v27 = vadd.f32 %v1272_v23, %v1271_v20 }
 0x128   : > { %v1301_v28 = vadd.f32 %v1300_v24, %v1299_v21  ;;  %1004 = vst [vmem:[%s1671_s30 + $0x8] sm:$0xff] %v1000_v25 }
 0x129   : > { %v985_v29 = vadd.f32 %v1298_v22, %v936_v26  ;;  %v939_v30 = vadd.f32 %v1273_v27, %v890_v59 }
 0x12b   : > { %vm993_vm2 = vcmp.gt.f32.partialorder %v985_v29, 0.0  ;;  %v997_v31 = vmul.f32 0.2, %v985_v29  ;;  %v988_v32 = vadd.f32 %v1301_v28, %v939_v30 }
 0x12d   : > { %v1001_v33 = vsel %vm993_vm2, %v985_v29, %v997_v31  ;;  %vm994_vm3 = vcmp.gt.f32.partialorder %v988_v32, 0.0  ;;  %v998_v34 = vmul.f32 0.2, %v988_v32 }
 0x12e   : > { %1005 = vst [vmem:[%s1671_s30 + $0x10] sm:$0xff] %v1001_v33 }
 0x12f   : > { %v1002_v35 = vsel %vm994_vm3, %v988_v32, %v998_v34 }
 0x130   : > { %1006 = vst [vmem:[%s1671_s30 + $0x18] sm:$0xff] %v1002_v35 }
 0x131 PF: > { %s12_s11 = sadd.s32 1, %s1412_s11   ;;  %s1689_s9 = smov %s1408_s10 }
 0x132   : > { %p9_p5 = scmp.ge.s32.totalorder %s12_s11, 4   ;;  %s1690_s10 = smov %s1692_s12 }
 0x134   :  { %11 = sbr.rel (!%p9_p5) target bundleno = 2 (0x2), region = 58 }

// kernel: d_net3d_forward.8
= control target key start
LH: loop header
LB: loop body
LE: loop exit
PB: predicated region body
PF: predicated region fallthrough
CT: control target
= control target key end

     0   :  { %s2207_s9 = smov 0   ;;  %s2209_s10 = smov 0   ;;  %s2642_s0 = inlined_call_operand.vmem [shape: bf16[2,8,2048], index: 0, kind: input, shape index: {}]   ;;  %s2643_s1 = inlined_call_operand.vmem [shape: bf16[2048,128], index: 1, kind: input, shape index: {}]   ;;  %s2644_s2 = inlined_call_operand.vmem [shape: f32[2,8,128], index: 2, kind: output, shape index: {}]  }
   0x1   :  { %s2211_s11 = smov 0  }
   0x2 LB: > { %s24_s12 = sadd.s32 1, %s2186_s10  ;;  %p1673_p0 = scmp.ge.s32.totalorder %s2190_s11, 1  ;;  %s2190_s11 = sphi %s2211_s11, %s12_s11   ;;  %s2186_s10 = sphi %s2209_s10, %s2646_s10   ;;  %s2182_s9 = sphi %s2207_s9, %s2645_s9  }
   0x3   : > { %p26_p1 = scmp.ge.s32.totalorder %s24_s12, 2  ;;  %p132_p2 = scmp.lt.s32.totalorder %s2190_s11, 3 }
   0x5   : > { %s2648_s12 = smov (%p26_p1, %s24_s12), 0  ;;  %p133_p3 = pnand %p1673_p0, %p132_p2 }
   0x6   : > { %v2024_v0 = vld [vmem:[%s2643_s1 + $0x40] sm:$0xff] (!%p133_p3)   ;;  %v2028_v4 = vld [vmem:[%s2643_s1 + $0x48] sm:$0xff] (!%p133_p3)   ;;  %v2032_v8 = vld [vmem:[%s2643_s1 + $0x50] sm:$0xff] (!%p133_p3)   ;;  %p160_p4 = scmp.lt.s32.totalorder (!%p133_p3), %s2182_s9, 1 }
   0x7   : > { %136 = sbr.rel (%p133_p3) target bundleno = 359 (0x167), region = 28  ;;  %v2025_v1 = vld [vmem:[%s2643_s1 + $0xc0] sm:$0xff] (!%p133_p3)   ;;  %1824 = vmatprep.subr.bf16.mxu0 (!%p133_p3), %v2024_v0  ;;  %v2029_v5 = vld [vmem:[%s2643_s1 + $0xc8] sm:$0xff] (!%p133_p3)   ;;  %v2033_v9 = vld [vmem:[%s2643_s1 + $0xd0] sm:$0xff] (!%p133_p3)  }
   0x8   : > { %v2026_v2 = vld [vmem:[%s2643_s1] sm:$0xff] (!%p133_p3)   ;;  %1846 = vmatprep.subr.bf16.mxu1 (!%p133_p3), %v2025_v1  ;;  %v2030_v6 = vld [vmem:[%s2643_s1 + $0x8] sm:$0xff] (!%p133_p3)   ;;  %v2034_v10 = vld [vmem:[%s2643_s1 + $0x10] sm:$0xff] (!%p133_p3)  }
   0x9   : > { %v2027_v3 = vld [vmem:[%s2643_s1 + $0x80] sm:$0xff] (!%p133_p3)   ;;  %1825 = vmatpush3.bf16.msra.mxu0 (!%p133_p3), %v2026_v2  ;;  %v2031_v7 = vld [vmem:[%s2643_s1 + $0x88] sm:$0xff] (!%p133_p3)   ;;  %v2035_v11 = vld [vmem:[%s2643_s1 + $0x90] sm:$0xff] (!%p133_p3)  }
   0xa   : > { %1847 = vmatpush3.bf16.msra.mxu1 (!%p133_p3), %v2027_v3  ;;  %1826 = vmatprep.subr.bf16.mxu0 (!%p133_p3), %v2028_v4  ;;  %v2036_v12 = vld [vmem:[%s2643_s1 + $0x58] sm:$0xff] (!%p133_p3)   ;;  %v2040_v16 = vld [vmem:[%s2643_s1 + $0x60] sm:$0xff] (!%p133_p3)   ;;  %v2044_v20 = vld [vmem:[%s2643_s1 + $0x68] sm:$0xff] (!%p133_p3)  }
   0xb   : > { %1848 = vmatprep.subr.bf16.mxu1 (!%p133_p3), %v2029_v5  ;;  %v2037_v13 = vld [vmem:[%s2643_s1 + $0xd8] sm:$0xff] (!%p133_p3)   ;;  %v2041_v17 = vld [vmem:[%s2643_s1 + $0xe0] sm:$0xff] (!%p133_p3)   ;;  %v2045_v21 = vld [vmem:[%s2643_s1 + $0xe8] sm:$0xff] (!%p133_p3)  }
   0xc   : > { %v2038_v14 = vld [vmem:[%s2643_s1 + $0x18] sm:$0xff] (!%p133_p3)   ;;  %v2042_v18 = vld [vmem:[%s2643_s1 + $0x20] sm:$0xff] (!%p133_p3)   ;;  %v2046_v22 = vld [vmem:[%s2643_s1 + $0x28] sm:$0xff] (!%p133_p3)  }
   0xd   : > { %1827 = vmatpush3.bf16.msra.mxu0 (!%p133_p3), %v2030_v6  ;;  %v2039_v15 = vld [vmem:[%s2643_s1 + $0x98] sm:$0xff] (!%p133_p3)   ;;  %v2043_v19 = vld [vmem:[%s2643_s1 + $0xa0] sm:$0xff] (!%p133_p3)   ;;  %v2047_v23 = vld [vmem:[%s2643_s1 + $0xa8] sm:$0xff] (!%p133_p3)  }
   0xe   : > { %1849 = vmatpush3.bf16.msra.mxu1 %v2031_v7  ;;  %1828 = vmatprep.subr.bf16.mxu0 %v2032_v8  ;;  %s2650_s9 = smov (!%p160_p4, %s2182_s9), 1  ;;  %v2048_v24 = vld [vmem:[%s2643_s1 + $0x70] sm:$0xff]   ;;  %v2052_v28 = vld [vmem:[%s2643_s1 + $0x78] sm:$0xff]   ;;  %v2060_v38 = vld [vmem:[%s2643_s1 + $0x140] sm:$0xff]  }
   0xf   : > { %1850 = vmatprep.subr.bf16.mxu1 %v2033_v9  ;;  %v2049_v25 = vld [vmem:[%s2643_s1 + $0xf0] sm:$0xff]   ;;  %s1823_s19 = sshll.u32 %s2650_s9, 6  ;;  %v2053_v29 = vld [vmem:[%s2643_s1 + $0xf8] sm:$0xff]   ;;  %v2061_v39 = vld [vmem:[%s2643_s1 + $0x1c0] sm:$0xff]  }
  0x10   : > { %v2050_v26 = vld [vmem:[%s2643_s1 + $0x30] sm:$0xff]   ;;  %s2325_s28 = scalar_lea.vmem %s2642_s0, %s1823_s19  ;;  %v2054_v30 = vld [vmem:[%s2643_s1 + $0x38] sm:$0xff]   ;;  %v2062_v40 = vld [vmem:[%s2643_s1 + $0x100] sm:$0xff]  }
  0x11   : > { %1829 = vmatpush3.bf16.msra.mxu0 %v2034_v10  ;;  %v2051_v27 = vld [vmem:[%s2643_s1 + $0xb0] sm:$0xff]   ;;  %v2055_v31 = vld [vmem:[%s2643_s1 + $0xb8] sm:$0xff]   ;;  %v177_v32 = vld [vmem:[%s2325_s28] sm:$0xff] }
  0x12   : > { %1851 = vmatpush3.bf16.msra.mxu1 %v2035_v11  ;;  %1830 = vmatprep.subr.bf16.mxu0 %v2036_v12  ;;  %v178_v33 = vld [vmem:[%s2325_s28 + $0x8] sm:$0xff]  ;;  %v1677_v34 = vcombine.low %v177_v32, %v177_v32  ;;  %v1678_v35 = vcombine.high %v177_v32, %v177_v32  ;;  %v2063_v41 = vld [vmem:[%s2643_s1 + $0x180] sm:$0xff]   ;;  %v2068_v46 = vld [vmem:[%s2643_s1 + $0x150] sm:$0xff]  }
  0x13   : > { %1852 = vmatprep.subr.bf16.mxu1 %v2037_v13  ;;  %v1679_v36 = vcombine.low %v178_v33, %v178_v33  ;;  %v1680_v37 = vcombine.high %v178_v33, %v178_v33  ;;  %v2064_v42 = vld [vmem:[%s2643_s1 + $0x148] sm:$0xff]   ;;  %v2069_v47 = vld [vmem:[%s2643_s1 + $0x1d0] sm:$0xff]   ;;  %v2072_v50 = vld [vmem:[%s2643_s1 + $0x158] sm:$0xff]  }
  0x14   : > { %1297 = vmatprep.mubr.bf16.mxu0 %v1678_v35  ;;  %v2065_v43 = vld [vmem:[%s2643_s1 + $0x1c8] sm:$0xff]   ;;  %v2070_v48 = vld [vmem:[%s2643_s1 + $0x110] sm:$0xff]   ;;  %v2073_v51 = vld [vmem:[%s2643_s1 + $0x1d8] sm:$0xff]  }
  0x15   : > { %1831 = vmatpush3.bf16.msra.mxu0 %v2038_v14  ;;  %1337 = vmatprep.mubr.bf16.mxu1 %v1680_v37  ;;  %v2066_v44 = vld [vmem:[%s2643_s1 + $0x108] sm:$0xff]   ;;  %v2071_v49 = vld [vmem:[%s2643_s1 + $0x190] sm:$0xff]   ;;  %v2074_v52 = vld [vmem:[%s2643_s1 + $0x118] sm:$0xff]  }
  0x16   : > { %1853 = vmatpush3.bf16.msra.mxu1 %v2039_v15  ;;  %1832 = vmatprep.subr.bf16.mxu0 %v2040_v16  ;;  %v2067_v45 = vld [vmem:[%s2643_s1 + $0x188] sm:$0xff]   ;;  %v2075_v53 = vld [vmem:[%s2643_s1 + $0x198] sm:$0xff]   ;;  %v2076_v54 = vld [vmem:[%s2643_s1 + $0x160] sm:$0xff]  }
  0x17   : > { %1854 = vmatprep.subr.bf16.mxu1 %v2041_v17  ;;  %v2077_v55 = vld [vmem:[%s2643_s1 + $0x1e0] sm:$0xff]   ;;  %v2080_v58 = vld [vmem:[%s2643_s1 + $0x168] sm:$0xff]   ;;  %v2084_v62 = vld [vmem:[%s2643_s1 + $0x170] sm:$0xff]  }
  0x18   : > { %v2078_v56 = vld [vmem:[%s2643_s1 + $0x120] sm:$0xff]   ;;  %v2081_v59 = vld [vmem:[%s2643_s1 + $0x1e8] sm:$0xff]   ;;  %v2085_v63 = vld [vmem:[%s2643_s1 + $0x1f0] sm:$0xff]  }
  0x19   : > { %1833 = vmatpush3.bf16.msra.mxu0 %v2042_v18  ;;  %v2079_v57 = vld [vmem:[%s2643_s1 + $0x1a0] sm:$0xff]   ;;  %v2082_v60 = vld [vmem:[%s2643_s1 + $0x128] sm:$0xff]   ;;  %v2086_v0 = vld [vmem:[%s2643_s1 + $0x130] sm:$0xff]  }
  0x1a   : > { %1855 = vmatpush3.bf16.msra.mxu1 %v2043_v19  ;;  %1834 = vmatprep.subr.bf16.mxu0 %v2044_v20  ;;  %v2083_v61 = vld [vmem:[%s2643_s1 + $0x1a8] sm:$0xff]   ;;  %v2087_v1 = vld [vmem:[%s2643_s1 + $0x1b0] sm:$0xff]   ;;  %v2088_v2 = vld [vmem:[%s2643_s1 + $0x178] sm:$0xff]  }
  0x1b   : > { %1856 = vmatprep.subr.bf16.mxu1 %v2045_v21  ;;  %v2089_v3 = vld [vmem:[%s2643_s1 + $0x1f8] sm:$0xff]   ;;  %v179_v6 = vld [vmem:[%s2325_s28 + $0x10] sm:$0xff]  ;;  %v2096_v12 = vld [vmem:[%s2643_s1 + $0x240] sm:$0xff]  }
  0x1c   : > { %v2090_v4 = vld [vmem:[%s2643_s1 + $0x138] sm:$0xff]   ;;  %v1681_v7 = vcombine.low %v179_v6, %v179_v6  ;;  %v1682_v8 = vcombine.high %v179_v6, %v179_v6  ;;  %v2097_v13 = vld [vmem:[%s2643_s1 + $0x2c0] sm:$0xff]   ;;  %v2100_v16 = vld [vmem:[%s2643_s1 + $0x248] sm:$0xff]  }
  0x1d   : > { %1835 = vmatpush3.bf16.msra.mxu0 %v2046_v22  ;;  %v2091_v5 = vld [vmem:[%s2643_s1 + $0x1b8] sm:$0xff]   ;;  %v2098_v14 = vld [vmem:[%s2643_s1 + $0x200] sm:$0xff]   ;;  %v2101_v17 = vld [vmem:[%s2643_s1 + $0x2c8] sm:$0xff]  }
  0x1e   : > { %1857 = vmatpush3.bf16.msra.mxu1 %v2047_v23  ;;  %1836 = vmatprep.subr.bf16.mxu0 %v2048_v24  ;;  %v180_v9 = vld [vmem:[%s2325_s28 + $0x18] sm:$0xff]  ;;  %v2099_v15 = vld [vmem:[%s2643_s1 + $0x280] sm:$0xff]   ;;  %v2102_v18 = vld [vmem:[%s2643_s1 + $0x208] sm:$0xff]  }
  0x1f   : > { %1858 = vmatprep.subr.bf16.mxu1 %v2049_v25  ;;  %v1683_v10 = vcombine.low %v180_v9, %v180_v9  ;;  %v1684_v11 = vcombine.high %v180_v9, %v180_v9  ;;  %v2103_v19 = vld [vmem:[%s2643_s1 + $0x288] sm:$0xff]   ;;  %v2104_v20 = vld [vmem:[%s2643_s1 + $0x250] sm:$0xff]   ;;  %v2108_v24 = vld [vmem:[%s2643_s1 + $0x258] sm:$0xff]  }
  0x20   : > { %v2105_v21 = vld [vmem:[%s2643_s1 + $0x2d0] sm:$0xff]   ;;  %v2109_v25 = vld [vmem:[%s2643_s1 + $0x2d8] sm:$0xff]   ;;  %v2116_v32 = vld [vmem:[%s2643_s1 + $0x268] sm:$0xff]  }
  0x21   : > { %1837 = vmatpush3.bf16.msra.mxu0 %v2050_v26  ;;  %v2106_v22 = vld [vmem:[%s2643_s1 + $0x210] sm:$0xff]   ;;  %v2110_v26 = vld [vmem:[%s2643_s1 + $0x218] sm:$0xff]   ;;  %v2117_v33 = vld [vmem:[%s2643_s1 + $0x2e8] sm:$0xff]  }
  0x22   : > { %1859 = vmatpush3.bf16.msra.mxu1 %v2051_v27  ;;  %1838 = vmatprep.subr.bf16.mxu0 %v2052_v28  ;;  %v2107_v23 = vld [vmem:[%s2643_s1 + $0x290] sm:$0xff]   ;;  %v2111_v27 = vld [vmem:[%s2643_s1 + $0x298] sm:$0xff]   ;;  %v2112_v28 = vld [vmem:[%s2643_s1 + $0x260] sm:$0xff]  }
  0x23   : > { %1860 = vmatprep.subr.bf16.mxu1 %v2053_v29  ;;  %v2113_v29 = vld [vmem:[%s2643_s1 + $0x2e0] sm:$0xff]   ;;  %v2119_v35 = vld [vmem:[%s2643_s1 + $0x2a8] sm:$0xff]   ;;  %v2121_v37 = vld [vmem:[%s2643_s1 + $0x2f0] sm:$0xff]  }
  0x24   : > { %v2152_v6 = vld [vmem:[%s2643_s1 + $0x368] sm:$0xff]  }
  0x25   : > { %1839 = vmatpush3.bf16.msra.mxu0 %v2054_v30  ;;  %v2114_v30 = vld [vmem:[%s2643_s1 + $0x220] sm:$0xff]   ;;  %v2155_v9 = vld [vmem:[%s2643_s1 + $0x3a8] sm:$0xff]  }
  0x26   : > { %1861 = vmatpush3.bf16.msra.mxu1 %v2055_v31  ;;  %1868 = vmatprep.subr.bf16.mxu0 %v2060_v38  ;;  %v2115_v31 = vld [vmem:[%s2643_s1 + $0x2a0] sm:$0xff]   ;;  %v2122_v38 = vld [vmem:[%s2643_s1 + $0x230] sm:$0xff]  }
  0x27   : > { %1890 = vmatprep.subr.bf16.mxu1 %v2061_v39  ;;  %v2123_v39 = vld [vmem:[%s2643_s1 + $0x2b0] sm:$0xff]  }
  0x28   : > { %1298 = vmatmul.mubr.bf16.vlgmr.msra.gmra.mrb[0].mxu0 %v1677_v34  ;;  %v2118_v34 = vld [vmem:[%s2643_s1 + $0x228] sm:$0xff]  }
  0x29   : > { %1338 = vmatmul.mubr.bf16.vlgmr.msra.gmra.mrb[0].mxu1 %v1679_v36  ;;  %1869 = vmatpush3.bf16.msra.mxu0 %v2062_v40  ;;  %v2120_v36 = vld [vmem:[%s2643_s1 + $0x270] sm:$0xff]   ;;  %v2124_v40 = vld [vmem:[%s2643_s1 + $0x278] sm:$0xff]  }
  0x2a   : > { %1891 = vmatpush3.bf16.msra.mxu1 %v2063_v41  ;;  %1870 = vmatprep.subr.bf16.mxu0 %v2064_v42  ;;  %v2125_v41 = vld [vmem:[%s2643_s1 + $0x2f8] sm:$0xff]  }
  0x2b   : > { %1892 = vmatprep.subr.bf16.mxu1 %v2065_v43  ;;  %1377 = vmatprep.mubr.bf16.mxu0 %v1682_v8  ;;  %v2126_v42 = vld [vmem:[%s2643_s1 + $0x238] sm:$0xff]   ;;  %v2154_v8 = vld [vmem:[%s2643_s1 + $0x328] sm:$0xff]  }
  0x2c   : > { %1417 = vmatprep.mubr.bf16.mxu1 %v1684_v11  ;;  %v2127_v43 = vld [vmem:[%s2643_s1 + $0x2b8] sm:$0xff]   ;;  %v2157_v11 = vld [vmem:[%s2643_s1 + $0x3f0] sm:$0xff]  }
  0x2d   : > { %1871 = vmatpush3.bf16.msra.mxu0 %v2066_v44  ;;  %v181_v44 = vld [vmem:[%s2325_s28 + $0x20] sm:$0xff] }
  0x2e   : > { %1893 = vmatpush3.bf16.msra.mxu1 %v2067_v45  ;;  %1872 = vmatprep.subr.bf16.mxu0 %v2068_v46  ;;  %v182_v45 = vld [vmem:[%s2325_s28 + $0x28] sm:$0xff]  ;;  %v1685_v46 = vcombine.low %v181_v44, %v181_v44 }
  0x2f   : > { %1894 = vmatprep.subr.bf16.mxu1 %v2069_v47  ;;  %v1686_v47 = vcombine.high %v181_v44, %v181_v44 }
  0x31   : > { %1873 = vmatpush3.bf16.msra.mxu0 %v2070_v48  ;;  %v1687_v48 = vcombine.low %v182_v45, %v182_v45 }
  0x32   : > { %1895 = vmatpush3.bf16.msra.mxu1 %v2071_v49  ;;  %1874 = vmatprep.subr.bf16.mxu0 %v2072_v50  ;;  %v1688_v49 = vcombine.high %v182_v45, %v182_v45  ;;  %v2132_v50 = vld [vmem:[%s2643_s1 + $0x340] sm:$0xff]  }
  0x33   : > { %1896 = vmatprep.subr.bf16.mxu1 %v2073_v51  ;;  %v2133_v51 = vld [vmem:[%s2643_s1 + $0x3c0] sm:$0xff]  }
  0x35   : > { %1875 = vmatpush3.bf16.msra.mxu0 %v2074_v52  ;;  %v2134_v52 = vld [vmem:[%s2643_s1 + $0x300] sm:$0xff]  }
  0x36   : > { %1897 = vmatpush3.bf16.msra.mxu1 %v2075_v53  ;;  %1876 = vmatprep.subr.bf16.mxu0 %v2076_v54  ;;  %v2135_v53 = vld [vmem:[%s2643_s1 + $0x380] sm:$0xff]   ;;  %v2136_v54 = vld [vmem:[%s2643_s1 + $0x348] sm:$0xff]  }
  0x37   : > { %1898 = vmatprep.subr.bf16.mxu1 %v2077_v55  ;;  %v2137_v55 = vld [vmem:[%s2643_s1 + $0x3c8] sm:$0xff]  }
  0x39   : > { %1877 = vmatpush3.bf16.msra.mxu0 %v2078_v56  ;;  %v2138_v56 = vld [vmem:[%s2643_s1 + $0x308] sm:$0xff]  }
  0x3a   : > { %1899 = vmatpush3.bf16.msra.mxu1 %v2079_v57  ;;  %1878 = vmatprep.subr.bf16.mxu0 %v2080_v58  ;;  %v2139_v57 = vld [vmem:[%s2643_s1 + $0x388] sm:$0xff]   ;;  %v2140_v58 = vld [vmem:[%s2643_s1 + $0x350] sm:$0xff]  }
  0x3b   : > { %1900 = vmatprep.subr.bf16.mxu1 %v2081_v59  ;;  %v2141_v59 = vld [vmem:[%s2643_s1 + $0x3d0] sm:$0xff]  }
  0x3d   : > { %1879 = vmatpush3.bf16.msra.mxu0 %v2082_v60  ;;  %v2142_v60 = vld [vmem:[%s2643_s1 + $0x310] sm:$0xff]  }
  0x3e   : > { %1901 = vmatpush3.bf16.msra.mxu1 %v2083_v61  ;;  %1880 = vmatprep.subr.bf16.mxu0 %v2084_v62  ;;  %v2143_v61 = vld [vmem:[%s2643_s1 + $0x390] sm:$0xff]   ;;  %v2144_v62 = vld [vmem:[%s2643_s1 + $0x358] sm:$0xff]  }
  0x3f   : > { %1902 = vmatprep.subr.bf16.mxu1 %v2085_v63  ;;  %v2145_v63 = vld [vmem:[%s2643_s1 + $0x3d8] sm:$0xff]  }
  0x41   : > { %1881 = vmatpush3.bf16.msra.mxu0 %v2086_v0  ;;  %v2146_v0 = vld [vmem:[%s2643_s1 + $0x318] sm:$0xff]  }
  0x42   : > { %1903 = vmatpush3.bf16.msra.mxu1 %v2087_v1  ;;  %1882 = vmatprep.subr.bf16.mxu0 %v2088_v2  ;;  %v2147_v1 = vld [vmem:[%s2643_s1 + $0x398] sm:$0xff]   ;;  %v2148_v2 = vld [vmem:[%s2643_s1 + $0x360] sm:$0xff]  }
  0x43   : > { %1904 = vmatprep.subr.bf16.mxu1 %v2089_v3  ;;  %v2149_v3 = vld [vmem:[%s2643_s1 + $0x3e0] sm:$0xff]  }
  0x45   : > { %1883 = vmatpush3.bf16.msra.mxu0 %v2090_v4  ;;  %v2150_v4 = vld [vmem:[%s2643_s1 + $0x320] sm:$0xff]  }
  0x46   : > { %1905 = vmatpush3.bf16.msra.mxu1 %v2091_v5  ;;  %1912 = vmatprep.subr.bf16.mxu0 %v2096_v12  ;;  %v2151_v5 = vld [vmem:[%s2643_s1 + $0x3a0] sm:$0xff]   ;;  %v2158_v12 = vld [vmem:[%s2643_s1 + $0x330] sm:$0xff]  }
  0x47   : > { %1934 = vmatprep.subr.bf16.mxu1 %v2097_v13  ;;  %v2159_v13 = vld [vmem:[%s2643_s1 + $0x3b0] sm:$0xff]  }
  0x48   : > { %1378 = vmatmul.mubr.bf16.vlgmr.msra.gmra.mrb[4].mxu0 %v1681_v7  ;;  %v2153_v7 = vld [vmem:[%s2643_s1 + $0x3e8] sm:$0xff]  }
  0x49   : > { %1418 = vmatmul.mubr.bf16.vlgmr.msra.gmra.mrb[4].mxu1 %v1683_v10  ;;  %1913 = vmatpush3.bf16.msra.mxu0 %v2098_v14  ;;  %v2156_v10 = vld [vmem:[%s2643_s1 + $0x370] sm:$0xff]   ;;  %v2160_v14 = vld [vmem:[%s2643_s1 + $0x378] sm:$0xff]  }
  0x4a   : > { %1935 = vmatpush3.bf16.msra.mxu1 %v2099_v15  ;;  %1914 = vmatprep.subr.bf16.mxu0 %v2100_v16  ;;  %v2161_v15 = vld [vmem:[%s2643_s1 + $0x3f8] sm:$0xff]  }
  0x4b   : > { %1936 = vmatprep.subr.bf16.mxu1 %v2101_v17  ;;  %1457 = vmatprep.mubr.bf16.mxu0 %v1686_v47  ;;  %v2162_v16 = vld [vmem:[%s2643_s1 + $0x338] sm:$0xff]  }
  0x4c   : > { %1497 = vmatprep.mubr.bf16.mxu1 %v1688_v49  ;;  %v2163_v17 = vld [vmem:[%s2643_s1 + $0x3b8] sm:$0xff]  }
  0x4d   : > { %1915 = vmatpush3.bf16.msra.mxu0 %v2102_v18  ;;  %v183_v18 = vld [vmem:[%s2325_s28 + $0x30] sm:$0xff] }
  0x4e   : > { %1937 = vmatpush3.bf16.msra.mxu1 %v2103_v19  ;;  %1916 = vmatprep.subr.bf16.mxu0 %v2104_v20  ;;  %v184_v19 = vld [vmem:[%s2325_s28 + $0x38] sm:$0xff]  ;;  %v1689_v20 = vcombine.low %v183_v18, %v183_v18  ;;  %s1676_s28 = sshll.u32 %s2650_s9, 3 }
  0x4f   : > { %1938 = vmatprep.subr.bf16.mxu1 %v2105_v21  ;;  %v1690_v21 = vcombine.high %v183_v18, %v183_v18  ;;  %s175_s19 = scalar_lea.vmem %s2644_s2, %s1676_s28 }
  0x51   : > { %1917 = vmatpush3.bf16.msra.mxu0 %v2106_v22  ;;  %v1691_v22 = vcombine.low %v184_v19, %v184_v19 }
  0x52   : > { %1939 = vmatpush3.bf16.msra.mxu1 %v2107_v23  ;;  %1918 = vmatprep.subr.bf16.mxu0 %v2108_v24  ;;  %v1692_v23 = vcombine.high %v184_v19, %v184_v19 }
  0x53   : > { %1940 = vmatprep.subr.bf16.mxu1 %v2109_v25 }
  0x55   : > { %1919 = vmatpush3.bf16.msra.mxu0 %v2110_v26 }
  0x56   : > { %1941 = vmatpush3.bf16.msra.mxu1 %v2111_v27  ;;  %1920 = vmatprep.subr.bf16.mxu0 %v2112_v28 }
  0x57   : > { %1942 = vmatprep.subr.bf16.mxu1 %v2113_v29 }
  0x59   : > { %1921 = vmatpush3.bf16.msra.mxu0 %v2114_v30 }
  0x5a   : > { %1943 = vmatpush3.bf16.msra.mxu1 %v2115_v31  ;;  %1922 = vmatprep.subr.bf16.mxu0 %v2116_v32 }
  0x5b   : > { %1944 = vmatprep.subr.bf16.mxu1 %v2117_v33 }
  0x5d   : > { %1923 = vmatpush3.bf16.msra.mxu0 %v2118_v34 }
  0x5e   : > { %1945 = vmatpush3.bf16.msra.mxu1 %v2119_v35  ;;  %1924 = vmatprep.subr.bf16.mxu0 %v2120_v36 }
  0x5f   : > { %1946 = vmatprep.subr.bf16.mxu1 %v2121_v37 }
  0x61   : > { %1925 = vmatpush3.bf16.msra.mxu0 %v2122_v38 }
  0x62   : > { %1947 = vmatpush3.bf16.msra.mxu1 %v2123_v39  ;;  %1926 = vmatprep.subr.bf16.mxu0 %v2124_v40 }
  0x63   : > { %1948 = vmatprep.subr.bf16.mxu1 %v2125_v41 }
  0x65   : > { %1927 = vmatpush3.bf16.msra.mxu0 %v2126_v42 }
  0x66   : > { %1949 = vmatpush3.bf16.msra.mxu1 %v2127_v43  ;;  %1956 = vmatprep.subr.bf16.mxu0 %v2132_v50 }
  0x67   : > { %1978 = vmatprep.subr.bf16.mxu1 %v2133_v51 }
  0x68   : > { %1458 = vmatmul.mubr.bf16.vlgmr.msra.gmra.mrb[8].mxu0 %v1685_v46 }
  0x69   : > { %1498 = vmatmul.mubr.bf16.vlgmr.msra.gmra.mrb[8].mxu1 %v1687_v48  ;;  %1957 = vmatpush3.bf16.msra.mxu0 %v2134_v52 }
  0x6a   : > { %1979 = vmatpush3.bf16.msra.mxu1 %v2135_v53  ;;  %1958 = vmatprep.subr.bf16.mxu0 %v2136_v54 }
  0x6b   : > { %1980 = vmatprep.subr.bf16.mxu1 %v2137_v55  ;;  %1537 = vmatprep.mubr.bf16.mxu0 %v1690_v21 }
  0x6c   : > { %1577 = vmatprep.mubr.bf16.mxu1 %v1692_v23 }
  0x6d   : > { %1959 = vmatpush3.bf16.msra.mxu0 %v2138_v56 }
  0x6e   : > { %1981 = vmatpush3.bf16.msra.mxu1 %v2139_v57  ;;  %1960 = vmatprep.subr.bf16.mxu0 %v2140_v58 }
  0x6f   : > { %1982 = vmatprep.subr.bf16.mxu1 %v2141_v59 }
  0x71   : > { %1961 = vmatpush3.bf16.msra.mxu0 %v2142_v60 }
  0x72   : > { %1983 = vmatpush3.bf16.msra.mxu1 %v2143_v61  ;;  %1962 = vmatprep.subr.bf16.mxu0 %v2144_v62 }
  0x73   : > { %1984 = vmatprep.subr.bf16.mxu1 %v2145_v63 }
  0x75   : > { %1963 = vmatpush3.bf16.msra.mxu0 %v2146_v0 }
  0x76   : > { %1985 = vmatpush3.bf16.msra.mxu1 %v2147_v1  ;;  %1964 = vmatprep.subr.bf16.mxu0 %v2148_v2 }
  0x77   : > { %1986 = vmatprep.subr.bf16.mxu1 %v2149_v3 }
  0x79   : > { %1965 = vmatpush3.bf16.msra.mxu0 %v2150_v4 }
  0x7a   : > { %1987 = vmatpush3.bf16.msra.mxu1 %v2151_v5  ;;  %1966 = vmatprep.subr.bf16.mxu0 %v2152_v6 }
  0x7b   : > { %1988 = vmatprep.subr.bf16.mxu1 %v2153_v7 }
  0x7d   : > { %1967 = vmatpush3.bf16.msra.mxu0 %v2154_v8 }
  0x7e   : > { %1989 = vmatpush3.bf16.msra.mxu1 %v2155_v9  ;;  %1968 = vmatprep.subr.bf16.mxu0 %v2156_v10 }
  0x7f   : > { %1990 = vmatprep.subr.bf16.mxu1 %v2157_v11 }
  0x81   : > { %1969 = vmatpush3.bf16.msra.mxu0 %v2158_v12 }
  0x82   : > { %1991 = vmatpush3.bf16.msra.mxu1 %v2159_v13  ;;  %1970 = vmatprep.subr.bf16.mxu0 %v2160_v14 }
  0x83   : > { %1992 = vmatprep.subr.bf16.mxu1 %v2161_v15 }
  0x85   : > { %1971 = vmatpush3.bf16.msra.mxu0 %v2162_v16 }
  0x86   : > { %1993 = vmatpush3.bf16.msra.mxu1 %v2163_v17 }
  0x88   : > { %1538 = vmatmul.mubr.bf16.vlgmr.msra.gmra.mrb[12].mxu0 %v1689_v20 }
  0x89   : > { %1578 = vmatmul.mubr.bf16.vlgmr.msra.gmra.mrb[12].mxu1 %v1691_v22 }
  0xfb   : > { %v1840_v24 = vpop.f32.mrb[0].mxu0 }
  0xfc   : > { %v1862_v25 = vpop.f32.mrb[0].mxu1  ;;  %v1841_v26 = vpop.f32.mrb[1].mxu0 }
  0xfd   : > { %v1863_v27 = vpop.f32.mrb[1].mxu1  ;;  %v1842_v28 = vadd.f32 %v1841_v26, %v1840_v24  ;;  %v1843_v30 = vpop.f32.mrb[2].mxu0 }
  0xfe   : > { %v1864_v29 = vadd.f32 %v1863_v27, %v1862_v25  ;;  %v1865_v31 = vpop.f32.mrb[2].mxu1  ;;  %v1844_v32 = vpop.f32.mrb[3].mxu0 }
  0xff   : > { %v1866_v33 = vpop.f32.mrb[3].mxu1 }
 0x100   : > { %v1340_v34 = vadd.f32 %v1864_v29, %v1842_v28 }
 0x11b   : > { %v1884_v35 = vpop.f32.mrb[4].mxu0 }
 0x11c   : > { %v1906_v36 = vpop.f32.mrb[4].mxu1  ;;  %v1885_v37 = vpop.f32.mrb[5].mxu0 }
 0x11d   : > { %v1907_v38 = vpop.f32.mrb[5].mxu1  ;;  %v1886_v39 = vadd.f32 %v1885_v37, %v1884_v35  ;;  %v1887_v41 = vpop.f32.mrb[6].mxu0 }
 0x11e   : > { %v1908_v40 = vadd.f32 %v1907_v38, %v1906_v36  ;;  %v1909_v42 = vpop.f32.mrb[6].mxu1  ;;  %v1888_v43 = vpop.f32.mrb[7].mxu0 }
 0x11f   : > { %v1910_v44 = vpop.f32.mrb[7].mxu1  ;;  %v1380_v45 = vadd.f32 %v1886_v39, %v1340_v34 }
 0x121   : > { %v1420_v46 = vadd.f32 %v1908_v40, %v1380_v45 }
 0x13b   : > { %v1928_v47 = vpop.f32.mrb[8].mxu0 }
 0x13c   : > { %v1950_v48 = vpop.f32.mrb[8].mxu1  ;;  %v1929_v49 = vpop.f32.mrb[9].mxu0 }
 0x13d   : > { %v1930_v50 = vadd.f32 %v1929_v49, %v1928_v47  ;;  %v1951_v51 = vpop.f32.mrb[9].mxu1  ;;  %v1931_v52 = vpop.f32.mrb[10].mxu0 }
 0x13e   : > { %v1952_v53 = vadd.f32 %v1951_v51, %v1950_v48  ;;  %v1953_v54 = vpop.f32.mrb[10].mxu1  ;;  %v1932_v55 = vpop.f32.mrb[11].mxu0 }
 0x13f   : > { %v1460_v56 = vadd.f32 %v1930_v50, %v1420_v46  ;;  %v1954_v57 = vpop.f32.mrb[11].mxu1 }
 0x141   : > { %v1500_v58 = vadd.f32 %v1952_v53, %v1460_v56 }
 0x15b   : > { %v1972_v59 = vpop.f32.mrb[12].mxu0 }
 0x15c   : > { %v1994_v60 = vpop.f32.mrb[12].mxu1  ;;  %v1973_v61 = vpop.f32.mrb[13].mxu0 }
 0x15d   : > { %v1974_v62 = vadd.f32 %v1973_v61, %v1972_v59  ;;  %v1995_v63 = vpop.f32.mrb[13].mxu1  ;;  %v1975_v0 = vpop.f32.mrb[14].mxu0 }
 0x15e   : > { %v1996_v1 = vadd.f32 %v1995_v63, %v1994_v60  ;;  %v1997_v2 = vpop.f32.mrb[14].mxu1  ;;  %v1976_v3 = vpop.f32.mrb[15].mxu0 }
 0x15f   : > { %v1540_v4 = vadd.f32 %v1974_v62, %v1500_v58  ;;  %v1998_v5 = vpop.f32.mrb[15].mxu1 }
 0x161   : > { %v1580_v6 = vadd.f32 %v1996_v1, %v1540_v4 }
 0x163   : > { %vm1585_vm0 = vcmp.gt.f32.partialorder %v1580_v6, 0.0  ;;  %v1586_v7 = vmul.f32 0.2, %v1580_v6 }
 0x165   : > { %v1587_v8 = vsel %vm1585_vm0, %v1580_v6, %v1586_v7 }
 0x166   : > { %1588 = vst [vmem:[%s175_s19] sm:$0xff] %v1587_v8 }
 0x167 PF: > { %s12_s11 = sadd.s32 1, %s2190_s11   ;;  %s2645_s9 = smov %s2186_s10 }
 0x168   : > { %p9_p5 = scmp.ge.s32.totalorder %s12_s11, 4   ;;  %s2646_s10 = smov %s2648_s12 }
 0x16a   :  { %11 = sbr.rel (!%p9_p5) target bundleno = 2 (0x2), region = 58 }

// kernel: d_net3d_forward.9
= control target key start
LH: loop header
LB: loop body
LE: loop exit
PB: predicated region body
PF: predicated region fallthrough
CT: control target
= control target key end

     0   :  { %s4076_s9 = smov 0   ;;  %s4078_s10 = smov 0   ;;  %s4903_s0 = inlined_call_operand.vmem [shape: bf16[2,8,4096], index: 0, kind: input, shape index: {}]   ;;  %s4904_s1 = inlined_call_operand.vmem [shape: bf16[4096,128], index: 1, kind: input, shape index: {}]   ;;  %s4905_s2 = inlined_call_operand.vmem [shape: f32[2,8,128], index: 2, kind: output, shape index: {}]  }
   0x1   :  { %s4080_s11 = smov 0  }
   0x2 LB: > { %s24_s12 = sadd.s32 1, %s4055_s10  ;;  %p3078_p0 = scmp.ge.s32.totalorder %s4059_s11, 1  ;;  %s4059_s11 = sphi %s4080_s11, %s12_s11   ;;  %s4055_s10 = sphi %s4078_s10, %s4907_s10   ;;  %s4051_s9 = sphi %s4076_s9, %s4906_s9  }
   0x3   : > { %p26_p1 = scmp.ge.s32.totalorder %s24_s12, 2  ;;  %p132_p2 = scmp.lt.s32.totalorder %s4059_s11, 3 }
   0x5   : > { %s4909_s12 = smov (%p26_p1, %s24_s12), 0  ;;  %p133_p3 = pnand %p3078_p0, %p132_p2 }
   0x6   : > { %v3749_v0 = vld [vmem:[%s4904_s1 + $0x40] sm:$0xff] (!%p133_p3)   ;;  %v3753_v4 = vld [vmem:[%s4904_s1 + $0x48] sm:$0xff] (!%p133_p3)   ;;  %v3757_v8 = vld [vmem:[%s4904_s1 + $0x50] sm:$0xff] (!%p133_p3)   ;;  %p160_p4 = scmp.lt.s32.totalorder (!%p133_p3), %s4051_s9, 1 }
   0x7   : > { %136 = sbr.rel (%p133_p3) target bundleno = 484 (0x1e4), region = 28  ;;  %v3750_v1 = vld [vmem:[%s4904_s1 + $0xc0] sm:$0xff] (!%p133_p3)   ;;  %3373 = vmatprep.subr.bf16.mxu0 (!%p133_p3), %v3749_v0  ;;  %v3754_v5 = vld [vmem:[%s4904_s1 + $0xc8] sm:$0xff] (!%p133_p3)   ;;  %v3758_v9 = vld [vmem:[%s4904_s1 + $0xd0] sm:$0xff] (!%p133_p3)  }
   0x8   : > { %v3751_v2 = vld [vmem:[%s4904_s1] sm:$0xff] (!%p133_p3)   ;;  %3395 = vmatprep.subr.bf16.mxu1 (!%p133_p3), %v3750_v1  ;;  %v3755_v6 = vld [vmem:[%s4904_s1 + $0x8] sm:$0xff] (!%p133_p3)   ;;  %v3759_v10 = vld [vmem:[%s4904_s1 + $0x10] sm:$0xff] (!%p133_p3)  }
   0x9   : > { %v3752_v3 = vld [vmem:[%s4904_s1 + $0x80] sm:$0xff] (!%p133_p3)   ;;  %3374 = vmatpush3.bf16.msra.mxu0 (!%p133_p3), %v3751_v2  ;;  %v3756_v7 = vld [vmem:[%s4904_s1 + $0x88] sm:$0xff] (!%p133_p3)   ;;  %v3760_v11 = vld [vmem:[%s4904_s1 + $0x90] sm:$0xff] (!%p133_p3)  }
   0xa   : > { %3396 = vmatpush3.bf16.msra.mxu1 (!%p133_p3), %v3752_v3  ;;  %3375 = vmatprep.subr.bf16.mxu0 (!%p133_p3), %v3753_v4  ;;  %v3761_v12 = vld [vmem:[%s4904_s1 + $0x58] sm:$0xff] (!%p133_p3)   ;;  %v3765_v16 = vld [vmem:[%s4904_s1 + $0x60] sm:$0xff] (!%p133_p3)   ;;  %v3769_v20 = vld [vmem:[%s4904_s1 + $0x68] sm:$0xff] (!%p133_p3)  }
   0xb   : > { %3397 = vmatprep.subr.bf16.mxu1 (!%p133_p3), %v3754_v5  ;;  %v3762_v13 = vld [vmem:[%s4904_s1 + $0xd8] sm:$0xff] (!%p133_p3)   ;;  %v3766_v17 = vld [vmem:[%s4904_s1 + $0xe0] sm:$0xff] (!%p133_p3)   ;;  %v3770_v21 = vld [vmem:[%s4904_s1 + $0xe8] sm:$0xff] (!%p133_p3)  }
   0xc   : > { %v3763_v14 = vld [vmem:[%s4904_s1 + $0x18] sm:$0xff] (!%p133_p3)   ;;  %v3767_v18 = vld [vmem:[%s4904_s1 + $0x20] sm:$0xff] (!%p133_p3)   ;;  %v3771_v22 = vld [vmem:[%s4904_s1 + $0x28] sm:$0xff] (!%p133_p3)  }
   0xd   : > { %3376 = vmatpush3.bf16.msra.mxu0 (!%p133_p3), %v3755_v6  ;;  %v3764_v15 = vld [vmem:[%s4904_s1 + $0x98] sm:$0xff] (!%p133_p3)   ;;  %v3768_v19 = vld [vmem:[%s4904_s1 + $0xa0] sm:$0xff] (!%p133_p3)   ;;  %v3772_v23 = vld [vmem:[%s4904_s1 + $0xa8] sm:$0xff] (!%p133_p3)  }
   0xe   : > { %3398 = vmatpush3.bf16.msra.mxu1 %v3756_v7  ;;  %3377 = vmatprep.subr.bf16.mxu0 %v3757_v8  ;;  %s4911_s9 = smov (!%p160_p4, %s4051_s9), 1  ;;  %v3773_v24 = vld [vmem:[%s4904_s1 + $0x70] sm:$0xff]   ;;  %v3777_v28 = vld [vmem:[%s4904_s1 + $0x78] sm:$0xff]   ;;  %v3785_v38 = vld [vmem:[%s4904_s1 + $0x140] sm:$0xff]  }
   0xf   : > { %3399 = vmatprep.subr.bf16.mxu1 %v3758_v9  ;;  %v3774_v25 = vld [vmem:[%s4904_s1 + $0xf0] sm:$0xff]   ;;  %s3372_s19 = sshll.u32 %s4911_s9, 7  ;;  %v3778_v29 = vld [vmem:[%s4904_s1 + $0xf8] sm:$0xff]   ;;  %v3786_v39 = vld [vmem:[%s4904_s1 + $0x1c0] sm:$0xff]  }
  0x10   : > { %v3775_v26 = vld [vmem:[%s4904_s1 + $0x30] sm:$0xff]   ;;  %s4194_s28 = scalar_lea.vmem %s4903_s0, %s3372_s19  ;;  %v3779_v30 = vld [vmem:[%s4904_s1 + $0x38] sm:$0xff]   ;;  %v3787_v40 = vld [vmem:[%s4904_s1 + $0x100] sm:$0xff]  }
  0x11   : > { %3378 = vmatpush3.bf16.msra.mxu0 %v3759_v10  ;;  %v3776_v27 = vld [vmem:[%s4904_s1 + $0xb0] sm:$0xff]   ;;  %v3780_v31 = vld [vmem:[%s4904_s1 + $0xb8] sm:$0xff]   ;;  %v177_v32 = vld [vmem:[%s4194_s28] sm:$0xff] }
  0x12   : > { %3400 = vmatpush3.bf16.msra.mxu1 %v3760_v11  ;;  %3379 = vmatprep.subr.bf16.mxu0 %v3761_v12  ;;  %v178_v33 = vld [vmem:[%s4194_s28 + $0x8] sm:$0xff]  ;;  %v3082_v34 = vcombine.low %v177_v32, %v177_v32  ;;  %v3083_v35 = vcombine.high %v177_v32, %v177_v32  ;;  %v3788_v41 = vld [vmem:[%s4904_s1 + $0x180] sm:$0xff]   ;;  %v3793_v46 = vld [vmem:[%s4904_s1 + $0x150] sm:$0xff]  }
  0x13   : > { %3401 = vmatprep.subr.bf16.mxu1 %v3762_v13  ;;  %v3084_v36 = vcombine.low %v178_v33, %v178_v33  ;;  %v3085_v37 = vcombine.high %v178_v33, %v178_v33  ;;  %v3789_v42 = vld [vmem:[%s4904_s1 + $0x148] sm:$0xff]   ;;  %v3794_v47 = vld [vmem:[%s4904_s1 + $0x1d0] sm:$0xff]   ;;  %v3797_v50 = vld [vmem:[%s4904_s1 + $0x158] sm:$0xff]  }
  0x14   : > { %2385 = vmatprep.mubr.bf16.mxu0 %v3083_v35  ;;  %v3790_v43 = vld [vmem:[%s4904_s1 + $0x1c8] sm:$0xff]   ;;  %v3795_v48 = vld [vmem:[%s4904_s1 + $0x110] sm:$0xff]   ;;  %v3798_v51 = vld [vmem:[%s4904_s1 + $0x1d8] sm:$0xff]  }
  0x15   : > { %3380 = vmatpush3.bf16.msra.mxu0 %v3763_v14  ;;  %2425 = vmatprep.mubr.bf16.mxu1 %v3085_v37  ;;  %v3791_v44 = vld [vmem:[%s4904_s1 + $0x108] sm:$0xff]   ;;  %v3796_v49 = vld [vmem:[%s4904_s1 + $0x190] sm:$0xff]   ;;  %v3799_v52 = vld [vmem:[%s4904_s1 + $0x118] sm:$0xff]  }
  0x16   : > { %3402 = vmatpush3.bf16.msra.mxu1 %v3764_v15  ;;  %3381 = vmatprep.subr.bf16.mxu0 %v3765_v16  ;;  %v3792_v45 = vld [vmem:[%s4904_s1 + $0x188] sm:$0xff]   ;;  %v3800_v53 = vld [vmem:[%s4904_s1 + $0x198] sm:$0xff]   ;;  %v3801_v54 = vld [vmem:[%s4904_s1 + $0x160] sm:$0xff]  }
  0x17   : > { %3403 = vmatprep.subr.bf16.mxu1 %v3766_v17  ;;  %v3802_v55 = vld [vmem:[%s4904_s1 + $0x1e0] sm:$0xff]   ;;  %v3805_v58 = vld [vmem:[%s4904_s1 + $0x168] sm:$0xff]   ;;  %v3809_v62 = vld [vmem:[%s4904_s1 + $0x170] sm:$0xff]  }
  0x18   : > { %v3803_v56 = vld [vmem:[%s4904_s1 + $0x120] sm:$0xff]   ;;  %v3806_v59 = vld [vmem:[%s4904_s1 + $0x1e8] sm:$0xff]   ;;  %v3810_v63 = vld [vmem:[%s4904_s1 + $0x1f0] sm:$0xff]  }
  0x19   : > { %3382 = vmatpush3.bf16.msra.mxu0 %v3767_v18  ;;  %v3804_v57 = vld [vmem:[%s4904_s1 + $0x1a0] sm:$0xff]   ;;  %v3807_v60 = vld [vmem:[%s4904_s1 + $0x128] sm:$0xff]   ;;  %v3811_v0 = vld [vmem:[%s4904_s1 + $0x130] sm:$0xff]  }
  0x1a   : > { %3404 = vmatpush3.bf16.msra.mxu1 %v3768_v19  ;;  %3383 = vmatprep.subr.bf16.mxu0 %v3769_v20  ;;  %v3808_v61 = vld [vmem:[%s4904_s1 + $0x1a8] sm:$0xff]   ;;  %v3812_v1 = vld [vmem:[%s4904_s1 + $0x1b0] sm:$0xff]   ;;  %v3813_v2 = vld [vmem:[%s4904_s1 + $0x178] sm:$0xff]  }
  0x1b   : > { %3405 = vmatprep.subr.bf16.mxu1 %v3770_v21  ;;  %v3814_v3 = vld [vmem:[%s4904_s1 + $0x1f8] sm:$0xff]   ;;  %v179_v6 = vld [vmem:[%s4194_s28 + $0x10] sm:$0xff]  ;;  %v3821_v12 = vld [vmem:[%s4904_s1 + $0x240] sm:$0xff]  }
  0x1c   : > { %v3815_v4 = vld [vmem:[%s4904_s1 + $0x138] sm:$0xff]   ;;  %v3086_v7 = vcombine.low %v179_v6, %v179_v6  ;;  %v3087_v8 = vcombine.high %v179_v6, %v179_v6  ;;  %v3822_v13 = vld [vmem:[%s4904_s1 + $0x2c0] sm:$0xff]   ;;  %v3825_v16 = vld [vmem:[%s4904_s1 + $0x248] sm:$0xff]  }
  0x1d   : > { %3384 = vmatpush3.bf16.msra.mxu0 %v3771_v22  ;;  %v3816_v5 = vld [vmem:[%s4904_s1 + $0x1b8] sm:$0xff]   ;;  %v3823_v14 = vld [vmem:[%s4904_s1 + $0x200] sm:$0xff]   ;;  %v3826_v17 = vld [vmem:[%s4904_s1 + $0x2c8] sm:$0xff]  }
  0x1e   : > { %3406 = vmatpush3.bf16.msra.mxu1 %v3772_v23  ;;  %3385 = vmatprep.subr.bf16.mxu0 %v3773_v24  ;;  %v180_v9 = vld [vmem:[%s4194_s28 + $0x18] sm:$0xff]  ;;  %v3824_v15 = vld [vmem:[%s4904_s1 + $0x280] sm:$0xff]   ;;  %v3827_v18 = vld [vmem:[%s4904_s1 + $0x208] sm:$0xff]  }
  0x1f   : > { %3407 = vmatprep.subr.bf16.mxu1 %v3774_v25  ;;  %v3088_v10 = vcombine.low %v180_v9, %v180_v9  ;;  %v3089_v11 = vcombine.high %v180_v9, %v180_v9  ;;  %v3828_v19 = vld [vmem:[%s4904_s1 + $0x288] sm:$0xff]   ;;  %v3829_v20 = vld [vmem:[%s4904_s1 + $0x250] sm:$0xff]   ;;  %v3833_v24 = vld [vmem:[%s4904_s1 + $0x258] sm:$0xff]  }
  0x20   : > { %v3830_v21 = vld [vmem:[%s4904_s1 + $0x2d0] sm:$0xff]   ;;  %v3834_v25 = vld [vmem:[%s4904_s1 + $0x2d8] sm:$0xff]   ;;  %v3841_v32 = vld [vmem:[%s4904_s1 + $0x268] sm:$0xff]  }
  0x21   : > { %3386 = vmatpush3.bf16.msra.mxu0 %v3775_v26  ;;  %v3831_v22 = vld [vmem:[%s4904_s1 + $0x210] sm:$0xff]   ;;  %v3835_v26 = vld [vmem:[%s4904_s1 + $0x218] sm:$0xff]   ;;  %v3842_v33 = vld [vmem:[%s4904_s1 + $0x2e8] sm:$0xff]  }
  0x22   : > { %3408 = vmatpush3.bf16.msra.mxu1 %v3776_v27  ;;  %3387 = vmatprep.subr.bf16.mxu0 %v3777_v28  ;;  %v3832_v23 = vld [vmem:[%s4904_s1 + $0x290] sm:$0xff]   ;;  %v3836_v27 = vld [vmem:[%s4904_s1 + $0x298] sm:$0xff]   ;;  %v3837_v28 = vld [vmem:[%s4904_s1 + $0x260] sm:$0xff]  }
  0x23   : > { %3409 = vmatprep.subr.bf16.mxu1 %v3778_v29  ;;  %v3838_v29 = vld [vmem:[%s4904_s1 + $0x2e0] sm:$0xff]   ;;  %v3844_v35 = vld [vmem:[%s4904_s1 + $0x2a8] sm:$0xff]   ;;  %v3846_v37 = vld [vmem:[%s4904_s1 + $0x2f0] sm:$0xff]  }
  0x24   : > { %v3877_v6 = vld [vmem:[%s4904_s1 + $0x368] sm:$0xff]  }
  0x25   : > { %3388 = vmatpush3.bf16.msra.mxu0 %v3779_v30  ;;  %v3839_v30 = vld [vmem:[%s4904_s1 + $0x220] sm:$0xff]   ;;  %v3880_v9 = vld [vmem:[%s4904_s1 + $0x3a8] sm:$0xff]  }
  0x26   : > { %3410 = vmatpush3.bf16.msra.mxu1 %v3780_v31  ;;  %3417 = vmatprep.subr.bf16.mxu0 %v3785_v38  ;;  %v3840_v31 = vld [vmem:[%s4904_s1 + $0x2a0] sm:$0xff]   ;;  %v3847_v38 = vld [vmem:[%s4904_s1 + $0x230] sm:$0xff]  }
  0x27   : > { %3439 = vmatprep.subr.bf16.mxu1 %v3786_v39  ;;  %v3848_v39 = vld [vmem:[%s4904_s1 + $0x2b0] sm:$0xff]  }
  0x28   : > { %2386 = vmatmul.mubr.bf16.vlgmr.msra.gmra.mrb[0].mxu0 %v3082_v34  ;;  %v3843_v34 = vld [vmem:[%s4904_s1 + $0x228] sm:$0xff]  }
  0x29   : > { %2426 = vmatmul.mubr.bf16.vlgmr.msra.gmra.mrb[0].mxu1 %v3084_v36  ;;  %3418 = vmatpush3.bf16.msra.mxu0 %v3787_v40  ;;  %v3845_v36 = vld [vmem:[%s4904_s1 + $0x270] sm:$0xff]   ;;  %v3849_v40 = vld [vmem:[%s4904_s1 + $0x278] sm:$0xff]  }
  0x2a   : > { %3440 = vmatpush3.bf16.msra.mxu1 %v3788_v41  ;;  %3419 = vmatprep.subr.bf16.mxu0 %v3789_v42  ;;  %v3850_v41 = vld [vmem:[%s4904_s1 + $0x2f8] sm:$0xff]  }
  0x2b   : > { %3441 = vmatprep.subr.bf16.mxu1 %v3790_v43  ;;  %2465 = vmatprep.mubr.bf16.mxu0 %v3087_v8  ;;  %v3851_v42 = vld [vmem:[%s4904_s1 + $0x238] sm:$0xff]   ;;  %v3879_v8 = vld [vmem:[%s4904_s1 + $0x328] sm:$0xff]  }
  0x2c   : > { %2505 = vmatprep.mubr.bf16.mxu1 %v3089_v11  ;;  %v3852_v43 = vld [vmem:[%s4904_s1 + $0x2b8] sm:$0xff]   ;;  %v3882_v11 = vld [vmem:[%s4904_s1 + $0x3f0] sm:$0xff]  }
  0x2d   : > { %3420 = vmatpush3.bf16.msra.mxu0 %v3791_v44  ;;  %v181_v44 = vld [vmem:[%s4194_s28 + $0x20] sm:$0xff] }
  0x2e   : > { %3442 = vmatpush3.bf16.msra.mxu1 %v3792_v45  ;;  %3421 = vmatprep.subr.bf16.mxu0 %v3793_v46  ;;  %v182_v45 = vld [vmem:[%s4194_s28 + $0x28] sm:$0xff]  ;;  %v3090_v46 = vcombine.low %v181_v44, %v181_v44 }
  0x2f   : > { %3443 = vmatprep.subr.bf16.mxu1 %v3794_v47  ;;  %v3091_v47 = vcombine.high %v181_v44, %v181_v44  ;;  %v3913_v44 = vld [vmem:[%s4904_s1 + $0x468] sm:$0xff]  }
  0x31   : > { %3422 = vmatpush3.bf16.msra.mxu0 %v3795_v48  ;;  %v3092_v48 = vcombine.low %v182_v45, %v182_v45 }
  0x32   : > { %3444 = vmatpush3.bf16.msra.mxu1 %v3796_v49  ;;  %3423 = vmatprep.subr.bf16.mxu0 %v3797_v50  ;;  %v3093_v49 = vcombine.high %v182_v45, %v182_v45  ;;  %v3857_v50 = vld [vmem:[%s4904_s1 + $0x340] sm:$0xff]   ;;  %v3914_v45 = vld [vmem:[%s4904_s1 + $0x4e8] sm:$0xff]  }
  0x33   : > { %3445 = vmatprep.subr.bf16.mxu1 %v3798_v51  ;;  %v3858_v51 = vld [vmem:[%s4904_s1 + $0x3c0] sm:$0xff]  }
  0x35   : > { %3424 = vmatpush3.bf16.msra.mxu0 %v3799_v52  ;;  %v3859_v52 = vld [vmem:[%s4904_s1 + $0x300] sm:$0xff]  }
  0x36   : > { %3446 = vmatpush3.bf16.msra.mxu1 %v3800_v53  ;;  %3425 = vmatprep.subr.bf16.mxu0 %v3801_v54  ;;  %v3860_v53 = vld [vmem:[%s4904_s1 + $0x380] sm:$0xff]   ;;  %v3861_v54 = vld [vmem:[%s4904_s1 + $0x348] sm:$0xff]  }
  0x37   : > { %3447 = vmatprep.subr.bf16.mxu1 %v3802_v55  ;;  %v3862_v55 = vld [vmem:[%s4904_s1 + $0x3c8] sm:$0xff]  }
  0x39   : > { %3426 = vmatpush3.bf16.msra.mxu0 %v3803_v56  ;;  %v3863_v56 = vld [vmem:[%s4904_s1 + $0x308] sm:$0xff]  }
  0x3a   : > { %3448 = vmatpush3.bf16.msra.mxu1 %v3804_v57  ;;  %3427 = vmatprep.subr.bf16.mxu0 %v3805_v58  ;;  %v3864_v57 = vld [vmem:[%s4904_s1 + $0x388] sm:$0xff]   ;;  %v3865_v58 = vld [vmem:[%s4904_s1 + $0x350] sm:$0xff]  }
  0x3b   : > { %3449 = vmatprep.subr.bf16.mxu1 %v3806_v59  ;;  %v3866_v59 = vld [vmem:[%s4904_s1 + $0x3d0] sm:$0xff]  }
  0x3d   : > { %3428 = vmatpush3.bf16.msra.mxu0 %v3807_v60  ;;  %v3867_v60 = vld [vmem:[%s4904_s1 + $0x310] sm:$0xff]  }
  0x3e   : > { %3450 = vmatpush3.bf16.msra.mxu1 %v3808_v61  ;;  %3429 = vmatprep.subr.bf16.mxu0 %v3809_v62  ;;  %v3868_v61 = vld [vmem:[%s4904_s1 + $0x390] sm:$0xff]   ;;  %v3869_v62 = vld [vmem:[%s4904_s1 + $0x358] sm:$0xff]  }
  0x3f   : > { %3451 = vmatprep.subr.bf16.mxu1 %v3810_v63  ;;  %v3870_v63 = vld [vmem:[%s4904_s1 + $0x3d8] sm:$0xff]  }
  0x41   : > { %3430 = vmatpush3.bf16.msra.mxu0 %v3811_v0  ;;  %v3871_v0 = vld [vmem:[%s4904_s1 + $0x318] sm:$0xff]  }
  0x42   : > { %3452 = vmatpush3.bf16.msra.mxu1 %v3812_v1  ;;  %3431 = vmatprep.subr.bf16.mxu0 %v3813_v2  ;;  %v3872_v1 = vld [vmem:[%s4904_s1 + $0x398] sm:$0xff]   ;;  %v3873_v2 = vld [vmem:[%s4904_s1 + $0x360] sm:$0xff]  }
  0x43   : > { %3453 = vmatprep.subr.bf16.mxu1 %v3814_v3  ;;  %v3874_v3 = vld [vmem:[%s4904_s1 + $0x3e0] sm:$0xff]  }
  0x45   : > { %3432 = vmatpush3.bf16.msra.mxu0 %v3815_v4  ;;  %v3875_v4 = vld [vmem:[%s4904_s1 + $0x320] sm:$0xff]  }
  0x46   : > { %3454 = vmatpush3.bf16.msra.mxu1 %v3816_v5  ;;  %3461 = vmatprep.subr.bf16.mxu0 %v3821_v12  ;;  %v3876_v5 = vld [vmem:[%s4904_s1 + $0x3a0] sm:$0xff]   ;;  %v3883_v12 = vld [vmem:[%s4904_s1 + $0x330] sm:$0xff]  }
  0x47   : > { %3483 = vmatprep.subr.bf16.mxu1 %v3822_v13  ;;  %v3884_v13 = vld [vmem:[%s4904_s1 + $0x3b0] sm:$0xff]  }
  0x48   : > { %2466 = vmatmul.mubr.bf16.vlgmr.msra.gmra.mrb[4].mxu0 %v3086_v7  ;;  %v3878_v7 = vld [vmem:[%s4904_s1 + $0x3e8] sm:$0xff]  }
  0x49   : > { %2506 = vmatmul.mubr.bf16.vlgmr.msra.gmra.mrb[4].mxu1 %v3088_v10  ;;  %3462 = vmatpush3.bf16.msra.mxu0 %v3823_v14  ;;  %v3881_v10 = vld [vmem:[%s4904_s1 + $0x370] sm:$0xff]   ;;  %v3885_v14 = vld [vmem:[%s4904_s1 + $0x378] sm:$0xff]  }
  0x4a   : > { %3484 = vmatpush3.bf16.msra.mxu1 %v3824_v15  ;;  %3463 = vmatprep.subr.bf16.mxu0 %v3825_v16  ;;  %v3886_v15 = vld [vmem:[%s4904_s1 + $0x3f8] sm:$0xff]  }
  0x4b   : > { %3485 = vmatprep.subr.bf16.mxu1 %v3826_v17  ;;  %2545 = vmatprep.mubr.bf16.mxu0 %v3091_v47  ;;  %v3887_v16 = vld [vmem:[%s4904_s1 + $0x338] sm:$0xff]   ;;  %v3916_v47 = vld [vmem:[%s4904_s1 + $0x4a8] sm:$0xff]  }
  0x4c   : > { %2585 = vmatprep.mubr.bf16.mxu1 %v3093_v49  ;;  %v3888_v17 = vld [vmem:[%s4904_s1 + $0x3b8] sm:$0xff]   ;;  %v3918_v49 = vld [vmem:[%s4904_s1 + $0x4f0] sm:$0xff]  }
  0x4d   : > { %3464 = vmatpush3.bf16.msra.mxu0 %v3827_v18  ;;  %v183_v18 = vld [vmem:[%s4194_s28 + $0x30] sm:$0xff] }
  0x4e   : > { %3486 = vmatpush3.bf16.msra.mxu1 %v3828_v19  ;;  %3465 = vmatprep.subr.bf16.mxu0 %v3829_v20  ;;  %v184_v19 = vld [vmem:[%s4194_s28 + $0x38] sm:$0xff]  ;;  %v3094_v20 = vcombine.low %v183_v18, %v183_v18 }
  0x4f   : > { %3487 = vmatprep.subr.bf16.mxu1 %v3830_v21  ;;  %v3095_v21 = vcombine.high %v183_v18, %v183_v18  ;;  %v3949_v18 = vld [vmem:[%s4904_s1 + $0x568] sm:$0xff]  }
  0x51   : > { %3466 = vmatpush3.bf16.msra.mxu0 %v3831_v22  ;;  %v3096_v22 = vcombine.low %v184_v19, %v184_v19 }
  0x52   : > { %3488 = vmatpush3.bf16.msra.mxu1 %v3832_v23  ;;  %3467 = vmatprep.subr.bf16.mxu0 %v3833_v24  ;;  %v3893_v23 = vld [vmem:[%s4904_s1 + $0x440] sm:$0xff]   ;;  %v3097_v24 = vcombine.high %v184_v19, %v184_v19  ;;  %v3950_v19 = vld [vmem:[%s4904_s1 + $0x5e8] sm:$0xff]  }
  0x53   : > { %3489 = vmatprep.subr.bf16.mxu1 %v3834_v25  ;;  %v3894_v25 = vld [vmem:[%s4904_s1 + $0x4c0] sm:$0xff]  }
  0x55   : > { %3468 = vmatpush3.bf16.msra.mxu0 %v3835_v26  ;;  %v3895_v26 = vld [vmem:[%s4904_s1 + $0x400] sm:$0xff]  }
  0x56   : > { %3490 = vmatpush3.bf16.msra.mxu1 %v3836_v27  ;;  %3469 = vmatprep.subr.bf16.mxu0 %v3837_v28  ;;  %v3896_v27 = vld [vmem:[%s4904_s1 + $0x480] sm:$0xff]   ;;  %v3897_v28 = vld [vmem:[%s4904_s1 + $0x448] sm:$0xff]  }
  0x57   : > { %3491 = vmatprep.subr.bf16.mxu1 %v3838_v29  ;;  %v3898_v29 = vld [vmem:[%s4904_s1 + $0x4c8] sm:$0xff]  }
  0x59   : > { %3470 = vmatpush3.bf16.msra.mxu0 %v3839_v30  ;;  %v3899_v30 = vld [vmem:[%s4904_s1 + $0x408] sm:$0xff]  }
  0x5a   : > { %3492 = vmatpush3.bf16.msra.mxu1 %v3840_v31  ;;  %3471 = vmatprep.subr.bf16.mxu0 %v3841_v32  ;;  %v3900_v31 = vld [vmem:[%s4904_s1 + $0x488] sm:$0xff]   ;;  %v3901_v32 = vld [vmem:[%s4904_s1 + $0x450] sm:$0xff]  }
  0x5b   : > { %3493 = vmatprep.subr.bf16.mxu1 %v3842_v33  ;;  %v3902_v33 = vld [vmem:[%s4904_s1 + $0x4d0] sm:$0xff]  }
  0x5d   : > { %3472 = vmatpush3.bf16.msra.mxu0 %v3843_v34  ;;  %v3903_v34 = vld [vmem:[%s4904_s1 + $0x410] sm:$0xff]  }
  0x5e   : > { %3494 = vmatpush3.bf16.msra.mxu1 %v3844_v35  ;;  %3473 = vmatprep.subr.bf16.mxu0 %v3845_v36  ;;  %v3904_v35 = vld [vmem:[%s4904_s1 + $0x490] sm:$0xff]   ;;  %v3905_v36 = vld [vmem:[%s4904_s1 + $0x458] sm:$0xff]  }
  0x5f   : > { %3495 = vmatprep.subr.bf16.mxu1 %v3846_v37  ;;  %v3906_v37 = vld [vmem:[%s4904_s1 + $0x4d8] sm:$0xff]  }
  0x61   : > { %3474 = vmatpush3.bf16.msra.mxu0 %v3847_v38  ;;  %v3907_v38 = vld [vmem:[%s4904_s1 + $0x418] sm:$0xff]  }
  0x62   : > { %3496 = vmatpush3.bf16.msra.mxu1 %v3848_v39  ;;  %3475 = vmatprep.subr.bf16.mxu0 %v3849_v40  ;;  %v3908_v39 = vld [vmem:[%s4904_s1 + $0x498] sm:$0xff]   ;;  %v3909_v40 = vld [vmem:[%s4904_s1 + $0x460] sm:$0xff]  }
  0x63   : > { %3497 = vmatprep.subr.bf16.mxu1 %v3850_v41  ;;  %v3910_v41 = vld [vmem:[%s4904_s1 + $0x4e0] sm:$0xff]  }
  0x65   : > { %3476 = vmatpush3.bf16.msra.mxu0 %v3851_v42  ;;  %v3911_v42 = vld [vmem:[%s4904_s1 + $0x420] sm:$0xff]  }
  0x66   : > { %3498 = vmatpush3.bf16.msra.mxu1 %v3852_v43  ;;  %3505 = vmatprep.subr.bf16.mxu0 %v3857_v50  ;;  %v3912_v43 = vld [vmem:[%s4904_s1 + $0x4a0] sm:$0xff]   ;;  %v3919_v50 = vld [vmem:[%s4904_s1 + $0x430] sm:$0xff]  }
  0x67   : > { %3527 = vmatprep.subr.bf16.mxu1 %v3858_v51  ;;  %v3920_v51 = vld [vmem:[%s4904_s1 + $0x4b0] sm:$0xff]  }
  0x68   : > { %2546 = vmatmul.mubr.bf16.vlgmr.msra.gmra.mrb[8].mxu0 %v3090_v46  ;;  %v3915_v46 = vld [vmem:[%s4904_s1 + $0x428] sm:$0xff]  }
  0x69   : > { %2586 = vmatmul.mubr.bf16.vlgmr.msra.gmra.mrb[8].mxu1 %v3092_v48  ;;  %3506 = vmatpush3.bf16.msra.mxu0 %v3859_v52  ;;  %v3917_v48 = vld [vmem:[%s4904_s1 + $0x470] sm:$0xff]   ;;  %v3921_v52 = vld [vmem:[%s4904_s1 + $0x478] sm:$0xff]  }
  0x6a   : > { %3528 = vmatpush3.bf16.msra.mxu1 %v3860_v53  ;;  %3507 = vmatprep.subr.bf16.mxu0 %v3861_v54  ;;  %v3922_v53 = vld [vmem:[%s4904_s1 + $0x4f8] sm:$0xff]  }
  0x6b   : > { %3529 = vmatprep.subr.bf16.mxu1 %v3862_v55  ;;  %2625 = vmatprep.mubr.bf16.mxu0 %v3095_v21  ;;  %v3923_v54 = vld [vmem:[%s4904_s1 + $0x438] sm:$0xff]   ;;  %v3952_v21 = vld [vmem:[%s4904_s1 + $0x5a8] sm:$0xff]  }
  0x6c   : > { %2665 = vmatprep.mubr.bf16.mxu1 %v3097_v24  ;;  %v3924_v55 = vld [vmem:[%s4904_s1 + $0x4b8] sm:$0xff]   ;;  %v3955_v24 = vld [vmem:[%s4904_s1 + $0x530] sm:$0xff]  }
  0x6d   : > { %3508 = vmatpush3.bf16.msra.mxu0 %v3863_v56  ;;  %v185_v56 = vld [vmem:[%s4194_s28 + $0x40] sm:$0xff] }
  0x6e   : > { %3530 = vmatpush3.bf16.msra.mxu1 %v3864_v57  ;;  %3509 = vmatprep.subr.bf16.mxu0 %v3865_v58  ;;  %v3098_v57 = vcombine.low %v185_v56, %v185_v56  ;;  %v3099_v58 = vcombine.high %v185_v56, %v185_v56  ;;  %v3985_v56 = vld [vmem:[%s4904_s1 + $0x668] sm:$0xff]  }
  0x6f   : > { %3531 = vmatprep.subr.bf16.mxu1 %v3866_v59  ;;  %v186_v59 = vld [vmem:[%s4194_s28 + $0x48] sm:$0xff] }
  0x71   : > { %3510 = vmatpush3.bf16.msra.mxu0 %v3867_v60  ;;  %v3100_v60 = vcombine.low %v186_v59, %v186_v59 }
  0x72   : > { %3532 = vmatpush3.bf16.msra.mxu1 %v3868_v61  ;;  %3511 = vmatprep.subr.bf16.mxu0 %v3869_v62  ;;  %v3101_v61 = vcombine.high %v186_v59, %v186_v59  ;;  %v3929_v62 = vld [vmem:[%s4904_s1 + $0x540] sm:$0xff]   ;;  %v3988_v59 = vld [vmem:[%s4904_s1 + $0x6a8] sm:$0xff]  }
  0x73   : > { %3533 = vmatprep.subr.bf16.mxu1 %v3870_v63  ;;  %v3930_v63 = vld [vmem:[%s4904_s1 + $0x5c0] sm:$0xff]  }
  0x75   : > { %3512 = vmatpush3.bf16.msra.mxu0 %v3871_v0  ;;  %v3931_v0 = vld [vmem:[%s4904_s1 + $0x500] sm:$0xff]  }
  0x76   : > { %3534 = vmatpush3.bf16.msra.mxu1 %v3872_v1  ;;  %3513 = vmatprep.subr.bf16.mxu0 %v3873_v2  ;;  %v3932_v1 = vld [vmem:[%s4904_s1 + $0x580] sm:$0xff]   ;;  %v3933_v2 = vld [vmem:[%s4904_s1 + $0x548] sm:$0xff]  }
  0x77   : > { %3535 = vmatprep.subr.bf16.mxu1 %v3874_v3  ;;  %v3934_v3 = vld [vmem:[%s4904_s1 + $0x5c8] sm:$0xff]  }
  0x79   : > { %3514 = vmatpush3.bf16.msra.mxu0 %v3875_v4  ;;  %v3935_v4 = vld [vmem:[%s4904_s1 + $0x508] sm:$0xff]  }
  0x7a   : > { %3536 = vmatpush3.bf16.msra.mxu1 %v3876_v5  ;;  %3515 = vmatprep.subr.bf16.mxu0 %v3877_v6  ;;  %v3936_v5 = vld [vmem:[%s4904_s1 + $0x588] sm:$0xff]   ;;  %v3937_v6 = vld [vmem:[%s4904_s1 + $0x550] sm:$0xff]  }
  0x7b   : > { %3537 = vmatprep.subr.bf16.mxu1 %v3878_v7  ;;  %v3938_v7 = vld [vmem:[%s4904_s1 + $0x5d0] sm:$0xff]  }
  0x7d   : > { %3516 = vmatpush3.bf16.msra.mxu0 %v3879_v8  ;;  %v3939_v8 = vld [vmem:[%s4904_s1 + $0x510] sm:$0xff]  }
  0x7e   : > { %3538 = vmatpush3.bf16.msra.mxu1 %v3880_v9  ;;  %3517 = vmatprep.subr.bf16.mxu0 %v3881_v10  ;;  %v3940_v9 = vld [vmem:[%s4904_s1 + $0x590] sm:$0xff]   ;;  %v3941_v10 = vld [vmem:[%s4904_s1 + $0x558] sm:$0xff]  }
  0x7f   : > { %3539 = vmatprep.subr.bf16.mxu1 %v3882_v11  ;;  %v3942_v11 = vld [vmem:[%s4904_s1 + $0x5d8] sm:$0xff]  }
  0x81   : > { %3518 = vmatpush3.bf16.msra.mxu0 %v3883_v12  ;;  %v3943_v12 = vld [vmem:[%s4904_s1 + $0x518] sm:$0xff]  }
  0x82   : > { %3540 = vmatpush3.bf16.msra.mxu1 %v3884_v13  ;;  %3519 = vmatprep.subr.bf16.mxu0 %v3885_v14  ;;  %v3944_v13 = vld [vmem:[%s4904_s1 + $0x598] sm:$0xff]   ;;  %v3945_v14 = vld [vmem:[%s4904_s1 + $0x560] sm:$0xff]  }
  0x83   : > { %3541 = vmatprep.subr.bf16.mxu1 %v3886_v15  ;;  %v3946_v15 = vld [vmem:[%s4904_s1 + $0x5e0] sm:$0xff]  }
  0x85   : > { %3520 = vmatpush3.bf16.msra.mxu0 %v3887_v16  ;;  %v3947_v16 = vld [vmem:[%s4904_s1 + $0x520] sm:$0xff]  }
  0x86   : > { %3542 = vmatpush3.bf16.msra.mxu1 %v3888_v17  ;;  %3549 = vmatprep.subr.bf16.mxu0 %v3893_v23  ;;  %v3948_v17 = vld [vmem:[%s4904_s1 + $0x5a0] sm:$0xff]   ;;  %v3954_v23 = vld [vmem:[%s4904_s1 + $0x5f0] sm:$0xff]  }
  0x87   : > { %3571 = vmatprep.subr.bf16.mxu1 %v3894_v25  ;;  %v3956_v25 = vld [vmem:[%s4904_s1 + $0x5b0] sm:$0xff]  }
  0x88   : > { %2626 = vmatmul.mubr.bf16.vlgmr.msra.gmra.mrb[12].mxu0 %v3094_v20  ;;  %v3951_v20 = vld [vmem:[%s4904_s1 + $0x528] sm:$0xff]  }
  0x89   : > { %2666 = vmatmul.mubr.bf16.vlgmr.msra.gmra.mrb[12].mxu1 %v3096_v22  ;;  %3550 = vmatpush3.bf16.msra.mxu0 %v3895_v26  ;;  %v3953_v22 = vld [vmem:[%s4904_s1 + $0x570] sm:$0xff]   ;;  %v3957_v26 = vld [vmem:[%s4904_s1 + $0x578] sm:$0xff]  }
  0x8a   : > { %3572 = vmatpush3.bf16.msra.mxu1 %v3896_v27  ;;  %3551 = vmatprep.subr.bf16.mxu0 %v3897_v28  ;;  %v3958_v27 = vld [vmem:[%s4904_s1 + $0x5f8] sm:$0xff]  }
  0x8b   : > { %3573 = vmatprep.subr.bf16.mxu1 %v3898_v29  ;;  %2705 = vmatprep.mubr.bf16.mxu0 %v3099_v58  ;;  %v3959_v28 = vld [vmem:[%s4904_s1 + $0x538] sm:$0xff]   ;;  %v3987_v58 = vld [vmem:[%s4904_s1 + $0x628] sm:$0xff]  }
  0x8c   : > { %2745 = vmatprep.mubr.bf16.mxu1 %v3101_v61  ;;  %v3960_v29 = vld [vmem:[%s4904_s1 + $0x5b8] sm:$0xff]   ;;  %v3990_v61 = vld [vmem:[%s4904_s1 + $0x6f0] sm:$0xff]  }
  0x8d   : > { %3552 = vmatpush3.bf16.msra.mxu0 %v3899_v30  ;;  %v187_v30 = vld [vmem:[%s4194_s28 + $0x50] sm:$0xff] }
  0x8e   : > { %3574 = vmatpush3.bf16.msra.mxu1 %v3900_v31  ;;  %3553 = vmatprep.subr.bf16.mxu0 %v3901_v32  ;;  %v188_v31 = vld [vmem:[%s4194_s28 + $0x58] sm:$0xff]  ;;  %v3102_v32 = vcombine.low %v187_v30, %v187_v30 }
  0x8f   : > { %3575 = vmatprep.subr.bf16.mxu1 %v3902_v33  ;;  %v3103_v33 = vcombine.high %v187_v30, %v187_v30  ;;  %v4020_v30 = vld [vmem:[%s4904_s1 + $0x7a0] sm:$0xff]  }
  0x91   : > { %3554 = vmatpush3.bf16.msra.mxu0 %v3903_v34  ;;  %v3104_v34 = vcombine.low %v188_v31, %v188_v31 }
  0x92   : > { %3576 = vmatpush3.bf16.msra.mxu1 %v3904_v35  ;;  %3555 = vmatprep.subr.bf16.mxu0 %v3905_v36  ;;  %v3105_v35 = vcombine.high %v188_v31, %v188_v31  ;;  %v3965_v36 = vld [vmem:[%s4904_s1 + $0x640] sm:$0xff]  }
  0x93   : > { %3577 = vmatprep.subr.bf16.mxu1 %v3906_v37  ;;  %v3966_v37 = vld [vmem:[%s4904_s1 + $0x6c0] sm:$0xff]  }
  0x95   : > { %3556 = vmatpush3.bf16.msra.mxu0 %v3907_v38  ;;  %v3967_v38 = vld [vmem:[%s4904_s1 + $0x600] sm:$0xff]  }
  0x96   : > { %3578 = vmatpush3.bf16.msra.mxu1 %v3908_v39  ;;  %3557 = vmatprep.subr.bf16.mxu0 %v3909_v40  ;;  %v3968_v39 = vld [vmem:[%s4904_s1 + $0x680] sm:$0xff]   ;;  %v3969_v40 = vld [vmem:[%s4904_s1 + $0x648] sm:$0xff]  }
  0x97   : > { %3579 = vmatprep.subr.bf16.mxu1 %v3910_v41  ;;  %v3970_v41 = vld [vmem:[%s4904_s1 + $0x6c8] sm:$0xff]  }
  0x99   : > { %3558 = vmatpush3.bf16.msra.mxu0 %v3911_v42  ;;  %v3971_v42 = vld [vmem:[%s4904_s1 + $0x608] sm:$0xff]  }
  0x9a   : > { %3580 = vmatpush3.bf16.msra.mxu1 %v3912_v43  ;;  %3559 = vmatprep.subr.bf16.mxu0 %v3913_v44  ;;  %v3972_v43 = vld [vmem:[%s4904_s1 + $0x688] sm:$0xff]   ;;  %v3973_v44 = vld [vmem:[%s4904_s1 + $0x650] sm:$0xff]  }
  0x9b   : > { %3581 = vmatprep.subr.bf16.mxu1 %v3914_v45  ;;  %v3974_v45 = vld [vmem:[%s4904_s1 + $0x6d0] sm:$0xff]  }
  0x9d   : > { %3560 = vmatpush3.bf16.msra.mxu0 %v3915_v46  ;;  %v3975_v46 = vld [vmem:[%s4904_s1 + $0x610] sm:$0xff]  }
  0x9e   : > { %3582 = vmatpush3.bf16.msra.mxu1 %v3916_v47  ;;  %3561 = vmatprep.subr.bf16.mxu0 %v3917_v48  ;;  %v3976_v47 = vld [vmem:[%s4904_s1 + $0x690] sm:$0xff]   ;;  %v3977_v48 = vld [vmem:[%s4904_s1 + $0x658] sm:$0xff]  }
  0x9f   : > { %3583 = vmatprep.subr.bf16.mxu1 %v3918_v49  ;;  %v3978_v49 = vld [vmem:[%s4904_s1 + $0x6d8] sm:$0xff]  }
  0xa1   : > { %3562 = vmatpush3.bf16.msra.mxu0 %v3919_v50  ;;  %v3979_v50 = vld [vmem:[%s4904_s1 + $0x618] sm:$0xff]  }
  0xa2   : > { %3584 = vmatpush3.bf16.msra.mxu1 %v3920_v51  ;;  %3563 = vmatprep.subr.bf16.mxu0 %v3921_v52  ;;  %v3980_v51 = vld [vmem:[%s4904_s1 + $0x698] sm:$0xff]   ;;  %v3981_v52 = vld [vmem:[%s4904_s1 + $0x660] sm:$0xff]  }
  0xa3   : > { %3585 = vmatprep.subr.bf16.mxu1 %v3922_v53  ;;  %v3982_v53 = vld [vmem:[%s4904_s1 + $0x6e0] sm:$0xff]  }
  0xa5   : > { %3564 = vmatpush3.bf16.msra.mxu0 %v3923_v54  ;;  %v3983_v54 = vld [vmem:[%s4904_s1 + $0x620] sm:$0xff]  }
  0xa6   : > { %3586 = vmatpush3.bf16.msra.mxu1 %v3924_v55  ;;  %3593 = vmatprep.subr.bf16.mxu0 %v3929_v62  ;;  %v3984_v55 = vld [vmem:[%s4904_s1 + $0x6a0] sm:$0xff]   ;;  %v3991_v62 = vld [vmem:[%s4904_s1 + $0x630] sm:$0xff]  }
  0xa7   : > { %3615 = vmatprep.subr.bf16.mxu1 %v3930_v63  ;;  %v3992_v63 = vld [vmem:[%s4904_s1 + $0x6b0] sm:$0xff]  }
  0xa8   : > { %2706 = vmatmul.mubr.bf16.vlgmr.msra.gmra.mrb[16].mxu0 %v3098_v57  ;;  %v3986_v57 = vld [vmem:[%s4904_s1 + $0x6e8] sm:$0xff]  }
  0xa9   : > { %2746 = vmatmul.mubr.bf16.vlgmr.msra.gmra.mrb[16].mxu1 %v3100_v60  ;;  %3594 = vmatpush3.bf16.msra.mxu0 %v3931_v0  ;;  %v3989_v60 = vld [vmem:[%s4904_s1 + $0x670] sm:$0xff]   ;;  %v3993_v0 = vld [vmem:[%s4904_s1 + $0x678] sm:$0xff]  }
  0xaa   : > { %3616 = vmatpush3.bf16.msra.mxu1 %v3932_v1  ;;  %3595 = vmatprep.subr.bf16.mxu0 %v3933_v2  ;;  %v3994_v1 = vld [vmem:[%s4904_s1 + $0x6f8] sm:$0xff]  }
  0xab   : > { %3617 = vmatprep.subr.bf16.mxu1 %v3934_v3  ;;  %2785 = vmatprep.mubr.bf16.mxu0 %v3103_v33  ;;  %v3995_v2 = vld [vmem:[%s4904_s1 + $0x638] sm:$0xff]   ;;  %v4021_v33 = vld [vmem:[%s4904_s1 + $0x768] sm:$0xff]  }
  0xac   : > { %2825 = vmatprep.mubr.bf16.mxu1 %v3105_v35  ;;  %v3996_v3 = vld [vmem:[%s4904_s1 + $0x6b8] sm:$0xff]  }
  0xad   : > { %3596 = vmatpush3.bf16.msra.mxu0 %v3935_v4  ;;  %v189_v4 = vld [vmem:[%s4194_s28 + $0x60] sm:$0xff] }
  0xae   : > { %3618 = vmatpush3.bf16.msra.mxu1 %v3936_v5  ;;  %3597 = vmatprep.subr.bf16.mxu0 %v3937_v6  ;;  %v190_v5 = vld [vmem:[%s4194_s28 + $0x68] sm:$0xff]  ;;  %v3106_v6 = vcombine.low %v189_v4, %v189_v4 }
  0xaf   : > { %3619 = vmatprep.subr.bf16.mxu1 %v3938_v7  ;;  %v3107_v7 = vcombine.high %v189_v4, %v189_v4 }
  0xb1   : > { %3598 = vmatpush3.bf16.msra.mxu0 %v3939_v8  ;;  %v3108_v8 = vcombine.low %v190_v5, %v190_v5 }
  0xb2   : > { %3620 = vmatpush3.bf16.msra.mxu1 %v3940_v9  ;;  %3599 = vmatprep.subr.bf16.mxu0 %v3941_v10  ;;  %v4001_v9 = vld [vmem:[%s4904_s1 + $0x740] sm:$0xff]   ;;  %v3109_v10 = vcombine.high %v190_v5, %v190_v5 }
  0xb3   : > { %3621 = vmatprep.subr.bf16.mxu1 %v3942_v11  ;;  %v4002_v11 = vld [vmem:[%s4904_s1 + $0x7c0] sm:$0xff]  }
  0xb5   : > { %3600 = vmatpush3.bf16.msra.mxu0 %v3943_v12  ;;  %v4003_v12 = vld [vmem:[%s4904_s1 + $0x700] sm:$0xff]  }
  0xb6   : > { %3622 = vmatpush3.bf16.msra.mxu1 %v3944_v13  ;;  %3601 = vmatprep.subr.bf16.mxu0 %v3945_v14  ;;  %v4004_v13 = vld [vmem:[%s4904_s1 + $0x780] sm:$0xff]   ;;  %v4005_v14 = vld [vmem:[%s4904_s1 + $0x748] sm:$0xff]  }
  0xb7   : > { %3623 = vmatprep.subr.bf16.mxu1 %v3946_v15  ;;  %v4006_v15 = vld [vmem:[%s4904_s1 + $0x7c8] sm:$0xff]  }
  0xb9   : > { %3602 = vmatpush3.bf16.msra.mxu0 %v3947_v16  ;;  %v4007_v16 = vld [vmem:[%s4904_s1 + $0x708] sm:$0xff]  }
  0xba   : > { %3624 = vmatpush3.bf16.msra.mxu1 %v3948_v17  ;;  %3603 = vmatprep.subr.bf16.mxu0 %v3949_v18  ;;  %v4008_v17 = vld [vmem:[%s4904_s1 + $0x788] sm:$0xff]   ;;  %v4009_v18 = vld [vmem:[%s4904_s1 + $0x750] sm:$0xff]  }
  0xbb   : > { %3625 = vmatprep.subr.bf16.mxu1 %v3950_v19  ;;  %v4010_v19 = vld [vmem:[%s4904_s1 + $0x7d0] sm:$0xff]  }
  0xbd   : > { %3604 = vmatpush3.bf16.msra.mxu0 %v3951_v20  ;;  %v4011_v20 = vld [vmem:[%s4904_s1 + $0x710] sm:$0xff]  }
  0xbe   : > { %3626 = vmatpush3.bf16.msra.mxu1 %v3952_v21  ;;  %3605 = vmatprep.subr.bf16.mxu0 %v3953_v22  ;;  %v4012_v21 = vld [vmem:[%s4904_s1 + $0x790] sm:$0xff]   ;;  %v4013_v22 = vld [vmem:[%s4904_s1 + $0x758] sm:$0xff]  }
  0xbf   : > { %3627 = vmatprep.subr.bf16.mxu1 %v3954_v23  ;;  %v4014_v23 = vld [vmem:[%s4904_s1 + $0x7d8] sm:$0xff]  }
  0xc1   : > { %3606 = vmatpush3.bf16.msra.mxu0 %v3955_v24  ;;  %v4015_v24 = vld [vmem:[%s4904_s1 + $0x718] sm:$0xff]  }
  0xc2   : > { %3628 = vmatpush3.bf16.msra.mxu1 %v3956_v25  ;;  %3607 = vmatprep.subr.bf16.mxu0 %v3957_v26  ;;  %v4016_v25 = vld [vmem:[%s4904_s1 + $0x798] sm:$0xff]   ;;  %v4017_v26 = vld [vmem:[%s4904_s1 + $0x760] sm:$0xff]  }
  0xc3   : > { %3629 = vmatprep.subr.bf16.mxu1 %v3958_v27  ;;  %v4018_v27 = vld [vmem:[%s4904_s1 + $0x7e0] sm:$0xff]  }
  0xc5   : > { %3608 = vmatpush3.bf16.msra.mxu0 %v3959_v28  ;;  %v4019_v28 = vld [vmem:[%s4904_s1 + $0x720] sm:$0xff]  }
  0xc6   : > { %3630 = vmatpush3.bf16.msra.mxu1 %v3960_v29  ;;  %3637 = vmatprep.subr.bf16.mxu0 %v3965_v36  ;;  %v4022_v36 = vld [vmem:[%s4904_s1 + $0x7e8] sm:$0xff]  }
  0xc7   : > { %3659 = vmatprep.subr.bf16.mxu1 %v3966_v37 }
  0xc8   : > { %2786 = vmatmul.mubr.bf16.vlgmr.msra.gmra.mrb[20].mxu0 %v3102_v32 }
  0xc9   : > { %2826 = vmatmul.mubr.bf16.vlgmr.msra.gmra.mrb[20].mxu1 %v3104_v34  ;;  %3638 = vmatpush3.bf16.msra.mxu0 %v3967_v38 }
  0xca   : > { %3660 = vmatpush3.bf16.msra.mxu1 %v3968_v39  ;;  %3639 = vmatprep.subr.bf16.mxu0 %v3969_v40  ;;  %v4023_v40 = vld [vmem:[%s4904_s1 + $0x728] sm:$0xff]  }
  0xcb   : > { %3661 = vmatprep.subr.bf16.mxu1 %v3970_v41  ;;  %2865 = vmatprep.mubr.bf16.mxu0 %v3107_v7 }
  0xcc   : > { %2905 = vmatprep.mubr.bf16.mxu1 %v3109_v10 }
  0xcd   : > { %3640 = vmatpush3.bf16.msra.mxu0 %v3971_v42 }
  0xce   : > { %3662 = vmatpush3.bf16.msra.mxu1 %v3972_v43  ;;  %3641 = vmatprep.subr.bf16.mxu0 %v3973_v44  ;;  %v4024_v43 = vld [vmem:[%s4904_s1 + $0x7a8] sm:$0xff]  }
  0xcf   : > { %3663 = vmatprep.subr.bf16.mxu1 %v3974_v45  ;;  %v4025_v45 = vld [vmem:[%s4904_s1 + $0x770] sm:$0xff]  }
  0xd1   : > { %3642 = vmatpush3.bf16.msra.mxu0 %v3975_v46  ;;  %v4026_v46 = vld [vmem:[%s4904_s1 + $0x7f0] sm:$0xff]  }
  0xd2   : > { %3664 = vmatpush3.bf16.msra.mxu1 %v3976_v47  ;;  %3643 = vmatprep.subr.bf16.mxu0 %v3977_v48  ;;  %v4027_v47 = vld [vmem:[%s4904_s1 + $0x730] sm:$0xff]  }
  0xd3   : > { %3665 = vmatprep.subr.bf16.mxu1 %v3978_v49  ;;  %v4028_v48 = vld [vmem:[%s4904_s1 + $0x7b0] sm:$0xff]   ;;  %v4029_v49 = vld [vmem:[%s4904_s1 + $0x778] sm:$0xff]  }
  0xd5   : > { %3644 = vmatpush3.bf16.msra.mxu0 %v3979_v50  ;;  %v4030_v50 = vld [vmem:[%s4904_s1 + $0x7f8] sm:$0xff]  }
  0xd6   : > { %3666 = vmatpush3.bf16.msra.mxu1 %v3980_v51  ;;  %3645 = vmatprep.subr.bf16.mxu0 %v3981_v52  ;;  %v4031_v51 = vld [vmem:[%s4904_s1 + $0x738] sm:$0xff]  }
  0xd7   : > { %3667 = vmatprep.subr.bf16.mxu1 %v3982_v53  ;;  %v4032_v52 = vld [vmem:[%s4904_s1 + $0x7b8] sm:$0xff]   ;;  %v191_v53 = vld [vmem:[%s4194_s28 + $0x70] sm:$0xff] }
  0xd9   : > { %3646 = vmatpush3.bf16.msra.mxu0 %v3983_v54  ;;  %v192_v54 = vld [vmem:[%s4194_s28 + $0x78] sm:$0xff]  ;;  %s3081_s28 = sshll.u32 %s4911_s9, 3 }
  0xda   : > { %3668 = vmatpush3.bf16.msra.mxu1 %v3984_v55  ;;  %3647 = vmatprep.subr.bf16.mxu0 %v3985_v56  ;;  %v3110_v55 = vcombine.low %v191_v53, %v191_v53  ;;  %v3111_v56 = vcombine.high %v191_v53, %v191_v53  ;;  %s175_s22 = scalar_lea.vmem %s4905_s2, %s3081_s28 }
  0xdb   : > { %3669 = vmatprep.subr.bf16.mxu1 %v3986_v57  ;;  %v3112_v57 = vcombine.low %v192_v54, %v192_v54 }
  0xdd   : > { %3648 = vmatpush3.bf16.msra.mxu0 %v3987_v58  ;;  %v3113_v58 = vcombine.high %v192_v54, %v192_v54 }
  0xde   : > { %3670 = vmatpush3.bf16.msra.mxu1 %v3988_v59  ;;  %3649 = vmatprep.subr.bf16.mxu0 %v3989_v60 }
  0xdf   : > { %3671 = vmatprep.subr.bf16.mxu1 %v3990_v61 }
  0xe1   : > { %3650 = vmatpush3.bf16.msra.mxu0 %v3991_v62 }
  0xe2   : > { %3672 = vmatpush3.bf16.msra.mxu1 %v3992_v63  ;;  %3651 = vmatprep.subr.bf16.mxu0 %v3993_v0 }
  0xe3   : > { %3673 = vmatprep.subr.bf16.mxu1 %v3994_v1 }
  0xe5   : > { %3652 = vmatpush3.bf16.msra.mxu0 %v3995_v2 }
  0xe6   : > { %3674 = vmatpush3.bf16.msra.mxu1 %v3996_v3  ;;  %3681 = vmatprep.subr.bf16.mxu0 %v4001_v9 }
  0xe7   : > { %3703 = vmatprep.subr.bf16.mxu1 %v4002_v11 }
  0xe8   : > { %2866 = vmatmul.mubr.bf16.vlgmr.msra.gmra.mrb[24].mxu0 %v3106_v6 }
  0xe9   : > { %2906 = vmatmul.mubr.bf16.vlgmr.msra.gmra.mrb[24].mxu1 %v3108_v8  ;;  %3682 = vmatpush3.bf16.msra.mxu0 %v4003_v12 }
  0xea   : > { %3704 = vmatpush3.bf16.msra.mxu1 %v4004_v13  ;;  %3683 = vmatprep.subr.bf16.mxu0 %v4005_v14 }
  0xeb   : > { %3705 = vmatprep.subr.bf16.mxu1 %v4006_v15  ;;  %2945 = vmatprep.mubr.bf16.mxu0 %v3111_v56 }
  0xec   : > { %2985 = vmatprep.mubr.bf16.mxu1 %v3113_v58 }
  0xed   : > { %3684 = vmatpush3.bf16.msra.mxu0 %v4007_v16 }
  0xee   : > { %3706 = vmatpush3.bf16.msra.mxu1 %v4008_v17  ;;  %3685 = vmatprep.subr.bf16.mxu0 %v4009_v18 }
  0xef   : > { %3707 = vmatprep.subr.bf16.mxu1 %v4010_v19 }
  0xf1   : > { %3686 = vmatpush3.bf16.msra.mxu0 %v4011_v20 }
  0xf2   : > { %3708 = vmatpush3.bf16.msra.mxu1 %v4012_v21  ;;  %3687 = vmatprep.subr.bf16.mxu0 %v4013_v22 }
  0xf3   : > { %3709 = vmatprep.subr.bf16.mxu1 %v4014_v23 }
  0xf5   : > { %3688 = vmatpush3.bf16.msra.mxu0 %v4015_v24 }
  0xf6   : > { %3710 = vmatpush3.bf16.msra.mxu1 %v4016_v25  ;;  %3689 = vmatprep.subr.bf16.mxu0 %v4017_v26 }
  0xf7   : > { %3711 = vmatprep.subr.bf16.mxu1 %v4018_v27 }
  0xf9   : > { %3690 = vmatpush3.bf16.msra.mxu0 %v4019_v28 }
  0xfa   : > { %3712 = vmatpush3.bf16.msra.mxu1 %v4020_v30  ;;  %3691 = vmatprep.subr.bf16.mxu0 %v4021_v33 }
  0xfb   : > { %v3389_v29 = vpop.f32.mrb[0].mxu0  ;;  %3713 = vmatprep.subr.bf16.mxu1 %v4022_v36 }
  0xfc   : > { %v3411_v31 = vpop.f32.mrb[0].mxu1  ;;  %v3390_v32 = vpop.f32.mrb[1].mxu0 }
  0xfd   : > { %v3391_v34 = vadd.f32 %v3390_v32, %v3389_v29  ;;  %v3412_v35 = vpop.f32.mrb[1].mxu1  ;;  %v3392_v38 = vpop.f32.mrb[2].mxu0  ;;  %3692 = vmatpush3.bf16.msra.mxu0 %v4023_v40 }
  0xfe   : > { %v3413_v37 = vadd.f32 %v3412_v35, %v3411_v31  ;;  %v3414_v39 = vpop.f32.mrb[2].mxu1  ;;  %v3393_v41 = vpop.f32.mrb[3].mxu0  ;;  %3714 = vmatpush3.bf16.msra.mxu1 %v4024_v43  ;;  %3693 = vmatprep.subr.bf16.mxu0 %v4025_v45 }
  0xff   : > { %v3415_v44 = vpop.f32.mrb[3].mxu1  ;;  %3715 = vmatprep.subr.bf16.mxu1 %v4026_v46 }
 0x100   : > { %v2428_v42 = vadd.f32 %v3413_v37, %v3391_v34 }
 0x101   : > { %3694 = vmatpush3.bf16.msra.mxu0 %v4027_v47 }
 0x102   : > { %3716 = vmatpush3.bf16.msra.mxu1 %v4028_v48  ;;  %3695 = vmatprep.subr.bf16.mxu0 %v4029_v49 }
 0x103   : > { %3717 = vmatprep.subr.bf16.mxu1 %v4030_v50 }
 0x105   : > { %3696 = vmatpush3.bf16.msra.mxu0 %v4031_v51 }
 0x106   : > { %3718 = vmatpush3.bf16.msra.mxu1 %v4032_v52 }
 0x108   : > { %2946 = vmatmul.mubr.bf16.vlgmr.msra.gmra.mrb[28].mxu0 %v3110_v55 }
 0x109   : > { %2986 = vmatmul.mubr.bf16.vlgmr.msra.gmra.mrb[28].mxu1 %v3112_v57 }
 0x11b   : > { %v3433_v59 = vpop.f32.mrb[4].mxu0 }
 0x11c   : > { %v3455_v60 = vpop.f32.mrb[4].mxu1  ;;  %v3434_v61 = vpop.f32.mrb[5].mxu0 }
 0x11d   : > { %v3456_v62 = vpop.f32.mrb[5].mxu1  ;;  %v3435_v63 = vadd.f32 %v3434_v61, %v3433_v59  ;;  %v3436_v1 = vpop.f32.mrb[6].mxu0 }
 0x11e   : > { %v3457_v0 = vadd.f32 %v3456_v62, %v3455_v60  ;;  %v3458_v2 = vpop.f32.mrb[6].mxu1  ;;  %v3437_v3 = vpop.f32.mrb[7].mxu0 }
 0x11f   : > { %v3459_v4 = vpop.f32.mrb[7].mxu1  ;;  %v2468_v5 = vadd.f32 %v3435_v63, %v2428_v42 }
 0x121   : > { %v2508_v6 = vadd.f32 %v3457_v0, %v2468_v5 }
 0x13b   : > { %v3477_v7 = vpop.f32.mrb[8].mxu0 }
 0x13c   : > { %v3499_v8 = vpop.f32.mrb[8].mxu1  ;;  %v3478_v9 = vpop.f32.mrb[9].mxu0 }
 0x13d   : > { %v3479_v10 = vadd.f32 %v3478_v9, %v3477_v7  ;;  %v3500_v11 = vpop.f32.mrb[9].mxu1  ;;  %v3480_v12 = vpop.f32.mrb[10].mxu0 }
 0x13e   : > { %v3501_v13 = vadd.f32 %v3500_v11, %v3499_v8  ;;  %v3502_v14 = vpop.f32.mrb[10].mxu1  ;;  %v3481_v15 = vpop.f32.mrb[11].mxu0 }
 0x13f   : > { %v2548_v16 = vadd.f32 %v3479_v10, %v2508_v6  ;;  %v3503_v17 = vpop.f32.mrb[11].mxu1 }
 0x141   : > { %v2588_v18 = vadd.f32 %v3501_v13, %v2548_v16 }
 0x15b   : > { %v3521_v19 = vpop.f32.mrb[12].mxu0 }
 0x15c   : > { %v3543_v20 = vpop.f32.mrb[12].mxu1  ;;  %v3522_v21 = vpop.f32.mrb[13].mxu0 }
 0x15d   : > { %v3523_v22 = vadd.f32 %v3522_v21, %v3521_v19  ;;  %v3544_v23 = vpop.f32.mrb[13].mxu1  ;;  %v3524_v24 = vpop.f32.mrb[14].mxu0 }
 0x15e   : > { %v3545_v25 = vadd.f32 %v3544_v23, %v3543_v20  ;;  %v3546_v26 = vpop.f32.mrb[14].mxu1  ;;  %v3525_v27 = vpop.f32.mrb[15].mxu0 }
 0x15f   : > { %v2628_v28 = vadd.f32 %v3523_v22, %v2588_v18  ;;  %v3547_v29 = vpop.f32.mrb[15].mxu1 }
 0x161   : > { %v2668_v30 = vadd.f32 %v3545_v25, %v2628_v28 }
 0x17b   : > { %v3565_v31 = vpop.f32.mrb[16].mxu0 }
 0x17c   : > { %v3587_v32 = vpop.f32.mrb[16].mxu1  ;;  %v3566_v33 = vpop.f32.mrb[17].mxu0 }
 0x17d   : > { %v3588_v34 = vpop.f32.mrb[17].mxu1  ;;  %v3567_v35 = vadd.f32 %v3566_v33, %v3565_v31  ;;  %v3568_v37 = vpop.f32.mrb[18].mxu0 }
 0x17e   : > { %v3589_v36 = vadd.f32 %v3588_v34, %v3587_v32  ;;  %v3590_v38 = vpop.f32.mrb[18].mxu1  ;;  %v3569_v39 = vpop.f32.mrb[19].mxu0 }
 0x17f   : > { %v3591_v40 = vpop.f32.mrb[19].mxu1  ;;  %v2708_v41 = vadd.f32 %v3567_v35, %v2668_v30 }
 0x181   : > { %v2748_v42 = vadd.f32 %v3589_v36, %v2708_v41 }
 0x19b   : > { %v3609_v43 = vpop.f32.mrb[20].mxu0 }
 0x19c   : > { %v3631_v44 = vpop.f32.mrb[20].mxu1  ;;  %v3610_v45 = vpop.f32.mrb[21].mxu0 }
 0x19d   : > { %v3611_v46 = vadd.f32 %v3610_v45, %v3609_v43  ;;  %v3632_v47 = vpop.f32.mrb[21].mxu1  ;;  %v3612_v48 = vpop.f32.mrb[22].mxu0 }
 0x19e   : > { %v3633_v49 = vadd.f32 %v3632_v47, %v3631_v44  ;;  %v3634_v50 = vpop.f32.mrb[22].mxu1  ;;  %v3613_v51 = vpop.f32.mrb[23].mxu0 }
 0x19f   : > { %v2788_v52 = vadd.f32 %v3611_v46, %v2748_v42  ;;  %v3635_v53 = vpop.f32.mrb[23].mxu1 }
 0x1a1   : > { %v2828_v54 = vadd.f32 %v3633_v49, %v2788_v52 }
 0x1bb   : > { %v3653_v55 = vpop.f32.mrb[24].mxu0 }
 0x1bc   : > { %v3675_v56 = vpop.f32.mrb[24].mxu1  ;;  %v3654_v57 = vpop.f32.mrb[25].mxu0 }
 0x1bd   : > { %v3655_v58 = vadd.f32 %v3654_v57, %v3653_v55  ;;  %v3676_v59 = vpop.f32.mrb[25].mxu1  ;;  %v3656_v60 = vpop.f32.mrb[26].mxu0 }
 0x1be   : > { %v3677_v61 = vadd.f32 %v3676_v59, %v3675_v56  ;;  %v3678_v62 = vpop.f32.mrb[26].mxu1  ;;  %v3657_v63 = vpop.f32.mrb[27].mxu0 }
 0x1bf   : > { %v2868_v0 = vadd.f32 %v3655_v58, %v2828_v54  ;;  %v3679_v1 = vpop.f32.mrb[27].mxu1 }
 0x1c1   : > { %v2908_v2 = vadd.f32 %v3677_v61, %v2868_v0 }
 0x1db   : > { %v3697_v3 = vpop.f32.mrb[28].mxu0 }
 0x1dc   : > { %v3719_v4 = vpop.f32.mrb[28].mxu1  ;;  %v3698_v5 = vpop.f32.mrb[29].mxu0 }
 0x1dd   : > { %v3699_v6 = vadd.f32 %v3698_v5, %v3697_v3  ;;  %v3720_v7 = vpop.f32.mrb[29].mxu1  ;;  %v3700_v8 = vpop.f32.mrb[30].mxu0 }
 0x1de   : > { %v3721_v9 = vadd.f32 %v3720_v7, %v3719_v4  ;;  %v3722_v10 = vpop.f32.mrb[30].mxu1  ;;  %v3701_v11 = vpop.f32.mrb[31].mxu0 }
 0x1df   : > { %v2948_v12 = vadd.f32 %v3699_v6, %v2908_v2  ;;  %v3723_v13 = vpop.f32.mrb[31].mxu1 }
 0x1e1   : > { %v2988_v14 = vadd.f32 %v3721_v9, %v2948_v12 }
 0x1e3   : > { %2993 = vst [vmem:[%s175_s22] sm:$0xff] %v2988_v14 }
 0x1e4 PF: > { %s12_s11 = sadd.s32 1, %s4059_s11   ;;  %s4906_s9 = smov %s4055_s10 }
 0x1e5   : > { %p9_p5 = scmp.ge.s32.totalorder %s12_s11, 4   ;;  %s4907_s10 = smov %s4909_s12 }
 0x1e7   :  { %11 = sbr.rel (!%p9_p5) target bundleno = 2 (0x2), region = 58 }

</bundles_post_ra>
